<compile_context>
chip_gen: v7x
topology: tpu7x:2x2x1
jax: 0.10.0
libtpu: 0.0.40
codegen_flags: <defaults>
</compile_context>

<pallas_src>
import jax
import jax.numpy as jnp
import numpy as np
from jax.experimental import pallas as pl
from jax.experimental.pallas import tpu as pltpu


# ----------------------------- kernel ------------------------------------- #
def mixer_block_kernel(x_ref, conv_w_ref, conv_b_ref,
                       ln_seq_g_ref, ln_seq_b_ref,
                       ln_patch_g_ref, ln_patch_b_ref,
                       w1_ref, b1_ref, w2_ref, b2_ref,
                       o_ref):
    eps = 1e-5
    Bb, T, D = x_ref.shape

    def layernorm(v, g, b):
        # Fused one-pass moments (f32): var = E[x^2] - mu^2; gamma folded
        # into the rsqrt scale (one fewer elementwise pass per LN).
        mu = jnp.mean(v, axis=-1, keepdims=True)
        var = jnp.mean(v * v, axis=-1, keepdims=True) - mu * mu
        s = jax.lax.rsqrt(var + eps) * g
        return (v - mu) * s + b

    # Rows ordered (b, t): row b*T + t  <->  x[b, t, :]
    x2 = x_ref[...].astype(jnp.float32).reshape(Bb * T, D)

    # ---- seq LayerNorm (over dim axis), f32 ----
    xn = layernorm(x2, ln_seq_g_ref[0], ln_seq_b_ref[0])

    # ---- causal token mix: one 2D MXU matmul, batch folded into N ----
    # conv_w_ref is already tril-masked and bf16 (done in the wrapper).
    # Build the (T, Bb*D) right-hand side by lane-concatenating per-batch
    # (T, D) tiles (static slices + concat: robust Mosaic lowering).
    xn_b = xn.astype(jnp.bfloat16)
    xn_wide = jnp.concatenate(
        [xn_b[b * T:(b + 1) * T, :] for b in range(Bb)], axis=1)       # (T, Bb*D)
    y_wide = jnp.dot(conv_w_ref[...], xn_wide,
                     preferred_element_type=jnp.float32) + conv_b_ref[...]
    # Back to (b, t)-major rows, then add the residual.
    y2 = jnp.concatenate(
        [y_wide[:, b * D:(b + 1) * D] for b in range(Bb)], axis=0) + x2  # (Bb*T, D)

    # ---- patch LayerNorm (over dim axis), f32 ----
    yn = layernorm(y2, ln_patch_g_ref[0], ln_patch_b_ref[0])

    # ---- FeedForward: Linear -> GELU(tanh) -> Linear, + residual ----
    # M = Bb*T = 256 rows into the MXU for both matmuls.
    h = jnp.dot(yn.astype(jnp.bfloat16), w1_ref[...],
                preferred_element_type=jnp.float32) + b1_ref[0]
    h = jax.nn.gelu(h, approximate=True)       # tanh GELU -> EUP (review item)
    out = jnp.dot(h.astype(jnp.bfloat16), w2_ref[...],
                  preferred_element_type=jnp.float32) + b2_ref[0] + y2

    o_ref[...] = out.reshape(Bb, T, D).astype(o_ref.dtype)


# ----------------------------- wrapper ------------------------------------ #
def mixer_block(x, params, *, batch_block=16):
    B, T, D = x.shape
    assert B % batch_block == 0, "demo wrapper assumes B divisible by batch_block"
    Bb = batch_block

    # Hoist the causal mask out of the kernel; cast matmul weights to bf16.
    conv_w = jnp.tril(params["conv_w"]).astype(jnp.bfloat16)   # (T, T)
    w1 = params["w1"].astype(jnp.bfloat16)                     # (D, 4D)
    w2 = params["w2"].astype(jnp.bfloat16)                     # (4D, D)

    operands = (
        conv_w, params["conv_b"],
        params["ln_seq_g"], params["ln_seq_b"],
        params["ln_patch_g"], params["ln_patch_b"],
        w1, params["b1"], w2, params["b2"],
    )

    def const_spec(arr):
        zeros = (0,) * arr.ndim
        return pl.BlockSpec(arr.shape, lambda b, _z=zeros: _z)

    in_specs = [pl.BlockSpec((Bb, T, D), lambda b: (b, 0, 0))]
    in_specs += [const_spec(a) for a in operands]

    fn = pl.pallas_call(
        mixer_block_kernel,
        out_shape=jax.ShapeDtypeStruct((B, T, D), x.dtype),
        grid=(B // Bb,),
        in_specs=in_specs,
        out_specs=pl.BlockSpec((Bb, T, D), lambda b: (b, 0, 0)),
        compiler_params=pltpu.CompilerParams(
            dimension_semantics=("parallel",),
            vmem_limit_bytes=48 * 1024 * 1024,   # leave headroom under v7x's 64 MiB
        ),
    )
    return fn(x, *operands)


# --------------------------- pure-JAX reference ---------------------------- #
def mixer_block_ref(x, p):
    eps = 1e-5

    def ln(v, g, b):
        mu = v.mean(-1, keepdims=True)
        var = ((v - mu) ** 2).mean(-1, keepdims=True)
        return (v - mu) / jnp.sqrt(var + eps) * g + b

    xn = ln(x, p["ln_seq_g"][0], p["ln_seq_b"][0])
    w = jnp.tril(p["conv_w"])
    y = jnp.einsum("ij,bjd->bid", w, xn) + p["conv_b"][:, 0][None, :, None] + x
    yn = ln(y, p["ln_patch_g"][0], p["ln_patch_b"][0])
    h = jax.nn.gelu(yn @ p["w1"] + p["b1"][0], approximate=False)  # nn.GELU() exact
    return h @ p["w2"] + p["b2"][0] + y


# ------------------------------ main --------------------------------------- #
if __name__ == "__main__":
    # B chosen so Bb*T = 256 (full MXU rows on v6e/v7x) and grid = B//Bb = 4
    # (both v7x cores get >= 2 steps).  D is a multiple of 128 (lane-dense).
    B, T, D = 64, 16, 128       # batch, length (seq), dim
    INNER = 4 * D               # FeedForward expansion_factor = 4

    key = jax.random.PRNGKey(0)
    k = jax.random.split(key, 8)

    # Conv1d(length, length, 1) weight built from Conv1d(length, 1, 1) row
    # repeated over the output dim (as in the PyTorch __init__); the causal
    # tril mask from forward() is applied in the wrapper.
    conv_row = 0.1 * jax.random.normal(k[0], (T,), jnp.float32)
    params = {
        "conv_w": jnp.broadcast_to(conv_row[None, :], (T, T)),          # (T, T)
        "conv_b": 0.1 * jax.random.normal(k[1], (T, 1), jnp.float32),
        "ln_seq_g": jnp.ones((1, D), jnp.float32),                      # LN defaults
        "ln_seq_b": jnp.zeros((1, D), jnp.float32),
        "ln_patch_g": jnp.ones((1, D), jnp.float32),
        "ln_patch_b": jnp.zeros((1, D), jnp.float32),
        "w1": 0.05 * jax.random.normal(k[2], (D, INNER), jnp.float32),  # Linear(dim, 4*dim), transposed
        "b1": 0.05 * jax.random.normal(k[3], (1, INNER), jnp.float32),
        "w2": 0.05 * jax.random.normal(k[4], (INNER, D), jnp.float32),  # Linear(4*dim, dim), transposed
        "b2": 0.05 * jax.random.normal(k[5], (1, D), jnp.float32),
    }

    x = jax.random.normal(k[6], (B, T, D), jnp.float32)

    out = mixer_block(x, params, batch_block=16)
    out = jax.block_until_ready(out)

    ref = mixer_block_ref(x, params)
    # bf16 MXU operands (f32 accumulation) + tanh-GELU vs erf => loose tolerance.
    np.testing.assert_allclose(np.asarray(out), np.asarray(ref),
                               rtol=2e-2, atol=2e-2)

    print("KERNEL_OK")
</pallas_src>

<mosaic_0001>
module attributes {stable_mosaic.version = 11 : i64} {
  func.func @mixer_block_kernel(%arg0: i32, %arg1: memref<16x16x128xf32, #tpu.memory_space<vmem>>, %arg2: memref<16x16xbf16, #tpu.memory_space<vmem>>, %arg3: memref<16x1xf32, #tpu.memory_space<vmem>>, %arg4: memref<1x128xf32, #tpu.memory_space<vmem>>, %arg5: memref<1x128xf32, #tpu.memory_space<vmem>>, %arg6: memref<1x128xf32, #tpu.memory_space<vmem>>, %arg7: memref<1x128xf32, #tpu.memory_space<vmem>>, %arg8: memref<128x512xbf16, #tpu.memory_space<vmem>>, %arg9: memref<1x512xf32, #tpu.memory_space<vmem>>, %arg10: memref<512x128xbf16, #tpu.memory_space<vmem>>, %arg11: memref<1x128xf32, #tpu.memory_space<vmem>>, %arg12: memref<16x16x128xf32, #tpu.memory_space<vmem>>) attributes {dimension_semantics = [#tpu.dimension_semantics<parallel>], iteration_bounds = array<i64: 4>, scalar_prefetch = 0 : i64, scratch_operands = 0 : i64, tpu.core_type = #tpu.core_type<tc>, window_params = [{transform_indices = @transform_0, window_bounds = array<i64: 16, 16, 128>}, {pipeline_mode = #tpu.pipeline_mode<synchronous>, transform_indices = @transform_1, window_bounds = array<i64: 16, 16>}, {pipeline_mode = #tpu.pipeline_mode<synchronous>, transform_indices = @transform_2, window_bounds = array<i64: 16, 1>}, {pipeline_mode = #tpu.pipeline_mode<synchronous>, transform_indices = @transform_3, window_bounds = array<i64: 1, 128>}, {pipeline_mode = #tpu.pipeline_mode<synchronous>, transform_indices = @transform_4, window_bounds = array<i64: 1, 128>}, {pipeline_mode = #tpu.pipeline_mode<synchronous>, transform_indices = @transform_5, window_bounds = array<i64: 1, 128>}, {pipeline_mode = #tpu.pipeline_mode<synchronous>, transform_indices = @transform_6, window_bounds = array<i64: 1, 128>}, {pipeline_mode = #tpu.pipeline_mode<synchronous>, transform_indices = @transform_7, window_bounds = array<i64: 128, 512>}, {pipeline_mode = #tpu.pipeline_mode<synchronous>, transform_indices = @transform_8, window_bounds = array<i64: 1, 512>}, {pipeline_mode = #tpu.pipeline_mode<synchronous>, transform_indices = @transform_9, window_bounds = array<i64: 512, 128>}, {pipeline_mode = #tpu.pipeline_mode<synchronous>, transform_indices = @transform_10, window_bounds = array<i64: 1, 128>}, {transform_indices = @transform_11, window_bounds = array<i64: 16, 16, 128>}]} {
    %c0 = arith.constant 0 : index
    %c0_0 = arith.constant 0 : index
    %c0_1 = arith.constant 0 : index
    %0 = vector.load %arg1[%c0, %c0_0, %c0_1] : memref<16x16x128xf32, #tpu.memory_space<vmem>>, vector<16x16x128xf32>
    %1 = vector.shape_cast %0 : vector<16x16x128xf32> to vector<256x128xf32>
    %c0_2 = arith.constant 0 : index
    %c0_3 = arith.constant 0 : index
    %2 = vector.load %arg4[%c0_2, %c0_3] : memref<1x128xf32, #tpu.memory_space<vmem>>, vector<1x128xf32>
    %3 = vector.shape_cast %2 : vector<1x128xf32> to vector<128xf32>
    %c0_4 = arith.constant 0 : index
    %c0_5 = arith.constant 0 : index
    %4 = vector.load %arg5[%c0_4, %c0_5] : memref<1x128xf32, #tpu.memory_space<vmem>>, vector<1x128xf32>
    %5 = vector.shape_cast %4 : vector<1x128xf32> to vector<128xf32>
    %cst = arith.constant dense<0.000000e+00> : vector<256xf32>
    %6 = vector.multi_reduction <add>, %1, %cst [1] : vector<256x128xf32> to vector<256xf32>
    %7 = vector.shape_cast %6 : vector<256xf32> to vector<256x1xf32>
    %cst_6 = arith.constant 1.280000e+02 : f32
    %8 = vector.broadcast %cst_6 : f32 to vector<256x1xf32>
    %9 = arith.divf %7, %8 : vector<256x1xf32>
    %10 = arith.mulf %1, %1 : vector<256x128xf32>
    %cst_7 = arith.constant dense<0.000000e+00> : vector<256xf32>
    %11 = vector.multi_reduction <add>, %10, %cst_7 [1] : vector<256x128xf32> to vector<256xf32>
    %12 = vector.shape_cast %11 : vector<256xf32> to vector<256x1xf32>
    %cst_8 = arith.constant 1.280000e+02 : f32
    %13 = vector.broadcast %cst_8 : f32 to vector<256x1xf32>
    %14 = arith.divf %12, %13 : vector<256x1xf32>
    %15 = arith.mulf %9, %9 : vector<256x1xf32>
    %16 = arith.subf %14, %15 : vector<256x1xf32>
    %cst_9 = arith.constant 9.99999974E-6 : f32
    %17 = vector.broadcast %cst_9 : f32 to vector<256x1xf32>
    %18 = arith.addf %16, %17 : vector<256x1xf32>
    %19 = math.rsqrt %18 : vector<256x1xf32>
    %20 = vector.shape_cast %3 : vector<128xf32> to vector<1x128xf32>
    %21 = vector.broadcast %19 : vector<256x1xf32> to vector<256x128xf32>
    %22 = vector.broadcast %20 : vector<1x128xf32> to vector<256x128xf32>
    %23 = arith.mulf %21, %22 : vector<256x128xf32>
    %24 = vector.broadcast %9 : vector<256x1xf32> to vector<256x128xf32>
    %25 = arith.subf %1, %24 : vector<256x128xf32>
    %26 = arith.mulf %25, %23 : vector<256x128xf32>
    %27 = vector.shape_cast %5 : vector<128xf32> to vector<1x128xf32>
    %28 = vector.broadcast %27 : vector<1x128xf32> to vector<256x128xf32>
    %29 = arith.addf %26, %28 : vector<256x128xf32>
    %30 = arith.truncf %29 : vector<256x128xf32> to vector<256x128xbf16>
    %31 = vector.extract_strided_slice %30 {offsets = [0, 0], sizes = [16, 128], strides = [1, 1]} : vector<256x128xbf16> to vector<16x128xbf16>
    %32 = vector.extract_strided_slice %30 {offsets = [16, 0], sizes = [16, 128], strides = [1, 1]} : vector<256x128xbf16> to vector<16x128xbf16>
    %33 = vector.extract_strided_slice %30 {offsets = [32, 0], sizes = [16, 128], strides = [1, 1]} : vector<256x128xbf16> to vector<16x128xbf16>
    %34 = vector.extract_strided_slice %30 {offsets = [48, 0], sizes = [16, 128], strides = [1, 1]} : vector<256x128xbf16> to vector<16x128xbf16>
    %35 = vector.extract_strided_slice %30 {offsets = [64, 0], sizes = [16, 128], strides = [1, 1]} : vector<256x128xbf16> to vector<16x128xbf16>
    %36 = vector.extract_strided_slice %30 {offsets = [80, 0], sizes = [16, 128], strides = [1, 1]} : vector<256x128xbf16> to vector<16x128xbf16>
    %37 = vector.extract_strided_slice %30 {offsets = [96, 0], sizes = [16, 128], strides = [1, 1]} : vector<256x128xbf16> to vector<16x128xbf16>
    %38 = vector.extract_strided_slice %30 {offsets = [112, 0], sizes = [16, 128], strides = [1, 1]} : vector<256x128xbf16> to vector<16x128xbf16>
    %39 = vector.extract_strided_slice %30 {offsets = [128, 0], sizes = [16, 128], strides = [1, 1]} : vector<256x128xbf16> to vector<16x128xbf16>
    %40 = vector.extract_strided_slice %30 {offsets = [144, 0], sizes = [16, 128], strides = [1, 1]} : vector<256x128xbf16> to vector<16x128xbf16>
    %41 = vector.extract_strided_slice %30 {offsets = [160, 0], sizes = [16, 128], strides = [1, 1]} : vector<256x128xbf16> to vector<16x128xbf16>
    %42 = vector.extract_strided_slice %30 {offsets = [176, 0], sizes = [16, 128], strides = [1, 1]} : vector<256x128xbf16> to vector<16x128xbf16>
    %43 = vector.extract_strided_slice %30 {offsets = [192, 0], sizes = [16, 128], strides = [1, 1]} : vector<256x128xbf16> to vector<16x128xbf16>
    %44 = vector.extract_strided_slice %30 {offsets = [208, 0], sizes = [16, 128], strides = [1, 1]} : vector<256x128xbf16> to vector<16x128xbf16>
    %45 = vector.extract_strided_slice %30 {offsets = [224, 0], sizes = [16, 128], strides = [1, 1]} : vector<256x128xbf16> to vector<16x128xbf16>
    %46 = vector.extract_strided_slice %30 {offsets = [240, 0], sizes = [16, 128], strides = [1, 1]} : vector<256x128xbf16> to vector<16x128xbf16>
    %47 = tpu.concatenate %31, %32, %33, %34, %35, %36, %37, %38, %39, %40, %41, %42, %43, %44, %45, %46 in 1 : vector<16x128xbf16>, vector<16x128xbf16>, vector<16x128xbf16>, vector<16x128xbf16>, vector<16x128xbf16>, vector<16x128xbf16>, vector<16x128xbf16>, vector<16x128xbf16>, vector<16x128xbf16>, vector<16x128xbf16>, vector<16x128xbf16>, vector<16x128xbf16>, vector<16x128xbf16>, vector<16x128xbf16>, vector<16x128xbf16>, vector<16x128xbf16> -> vector<16x2048xbf16>
    %c0_10 = arith.constant 0 : index
    %c0_11 = arith.constant 0 : index
    %48 = vector.load %arg2[%c0_10, %c0_11] : memref<16x16xbf16, #tpu.memory_space<vmem>>, vector<16x16xbf16>
    %cst_12 = arith.constant dense<0.000000e+00> : vector<16x2048xf32>
    %49 = tpu.matmul %48, %47, %cst_12 {dimension_numbers = #tpu.dot_dimension_numbers<[1], [0], [0], [1], [0, 0, 1, 1], [], []>} : vector<16x16xbf16>, vector<16x2048xbf16>, vector<16x2048xf32> -> vector<16x2048xf32>
    %c0_13 = arith.constant 0 : index
    %c0_14 = arith.constant 0 : index
    %50 = vector.load %arg3[%c0_13, %c0_14] : memref<16x1xf32, #tpu.memory_space<vmem>>, vector<16x1xf32>
    %51 = vector.broadcast %50 : vector<16x1xf32> to vector<16x2048xf32>
    %52 = arith.addf %49, %51 : vector<16x2048xf32>
    %53 = vector.extract_strided_slice %52 {offsets = [0, 0], sizes = [16, 128], strides = [1, 1]} : vector<16x2048xf32> to vector<16x128xf32>
    %54 = vector.extract_strided_slice %52 {offsets = [0, 128], sizes = [16, 128], strides = [1, 1]} : vector<16x2048xf32> to vector<16x128xf32>
    %55 = vector.extract_strided_slice %52 {offsets = [0, 256], sizes = [16, 128], strides = [1, 1]} : vector<16x2048xf32> to vector<16x128xf32>
    %56 = vector.extract_strided_slice %52 {offsets = [0, 384], sizes = [16, 128], strides = [1, 1]} : vector<16x2048xf32> to vector<16x128xf32>
    %57 = vector.extract_strided_slice %52 {offsets = [0, 512], sizes = [16, 128], strides = [1, 1]} : vector<16x2048xf32> to vector<16x128xf32>
    %58 = vector.extract_strided_slice %52 {offsets = [0, 640], sizes = [16, 128], strides = [1, 1]} : vector<16x2048xf32> to vector<16x128xf32>
    %59 = vector.extract_strided_slice %52 {offsets = [0, 768], sizes = [16, 128], strides = [1, 1]} : vector<16x2048xf32> to vector<16x128xf32>
    %60 = vector.extract_strided_slice %52 {offsets = [0, 896], sizes = [16, 128], strides = [1, 1]} : vector<16x2048xf32> to vector<16x128xf32>
    %61 = vector.extract_strided_slice %52 {offsets = [0, 1024], sizes = [16, 128], strides = [1, 1]} : vector<16x2048xf32> to vector<16x128xf32>
    %62 = vector.extract_strided_slice %52 {offsets = [0, 1152], sizes = [16, 128], strides = [1, 1]} : vector<16x2048xf32> to vector<16x128xf32>
    %63 = vector.extract_strided_slice %52 {offsets = [0, 1280], sizes = [16, 128], strides = [1, 1]} : vector<16x2048xf32> to vector<16x128xf32>
    %64 = vector.extract_strided_slice %52 {offsets = [0, 1408], sizes = [16, 128], strides = [1, 1]} : vector<16x2048xf32> to vector<16x128xf32>
    %65 = vector.extract_strided_slice %52 {offsets = [0, 1536], sizes = [16, 128], strides = [1, 1]} : vector<16x2048xf32> to vector<16x128xf32>
    %66 = vector.extract_strided_slice %52 {offsets = [0, 1664], sizes = [16, 128], strides = [1, 1]} : vector<16x2048xf32> to vector<16x128xf32>
    %67 = vector.extract_strided_slice %52 {offsets = [0, 1792], sizes = [16, 128], strides = [1, 1]} : vector<16x2048xf32> to vector<16x128xf32>
    %68 = vector.extract_strided_slice %52 {offsets = [0, 1920], sizes = [16, 128], strides = [1, 1]} : vector<16x2048xf32> to vector<16x128xf32>
    %69 = tpu.concatenate %53, %54, %55, %56, %57, %58, %59, %60, %61, %62, %63, %64, %65, %66, %67, %68 in 0 : vector<16x128xf32>, vector<16x128xf32>, vector<16x128xf32>, vector<16x128xf32>, vector<16x128xf32>, vector<16x128xf32>, vector<16x128xf32>, vector<16x128xf32>, vector<16x128xf32>, vector<16x128xf32>, vector<16x128xf32>, vector<16x128xf32>, vector<16x128xf32>, vector<16x128xf32>, vector<16x128xf32>, vector<16x128xf32> -> vector<256x128xf32>
    %70 = arith.addf %69, %1 : vector<256x128xf32>
    %c0_15 = arith.constant 0 : index
    %c0_16 = arith.constant 0 : index
    %71 = vector.load %arg6[%c0_15, %c0_16] : memref<1x128xf32, #tpu.memory_space<vmem>>, vector<1x128xf32>
    %72 = vector.shape_cast %71 : vector<1x128xf32> to vector<128xf32>
    %c0_17 = arith.constant 0 : index
    %c0_18 = arith.constant 0 : index
    %73 = vector.load %arg7[%c0_17, %c0_18] : memref<1x128xf32, #tpu.memory_space<vmem>>, vector<1x128xf32>
    %74 = vector.shape_cast %73 : vector<1x128xf32> to vector<128xf32>
    %cst_19 = arith.constant dense<0.000000e+00> : vector<256xf32>
    %75 = vector.multi_reduction <add>, %70, %cst_19 [1] : vector<256x128xf32> to vector<256xf32>
    %76 = vector.shape_cast %75 : vector<256xf32> to vector<256x1xf32>
    %cst_20 = arith.constant 1.280000e+02 : f32
    %77 = vector.broadcast %cst_20 : f32 to vector<256x1xf32>
    %78 = arith.divf %76, %77 : vector<256x1xf32>
    %79 = arith.mulf %70, %70 : vector<256x128xf32>
    %cst_21 = arith.constant dense<0.000000e+00> : vector<256xf32>
    %80 = vector.multi_reduction <add>, %79, %cst_21 [1] : vector<256x128xf32> to vector<256xf32>
    %81 = vector.shape_cast %80 : vector<256xf32> to vector<256x1xf32>
    %cst_22 = arith.constant 1.280000e+02 : f32
    %82 = vector.broadcast %cst_22 : f32 to vector<256x1xf32>
    %83 = arith.divf %81, %82 : vector<256x1xf32>
    %84 = arith.mulf %78, %78 : vector<256x1xf32>
    %85 = arith.subf %83, %84 : vector<256x1xf32>
    %cst_23 = arith.constant 9.99999974E-6 : f32
    %86 = vector.broadcast %cst_23 : f32 to vector<256x1xf32>
    %87 = arith.addf %85, %86 : vector<256x1xf32>
    %88 = math.rsqrt %87 : vector<256x1xf32>
    %89 = vector.shape_cast %72 : vector<128xf32> to vector<1x128xf32>
    %90 = vector.broadcast %88 : vector<256x1xf32> to vector<256x128xf32>
    %91 = vector.broadcast %89 : vector<1x128xf32> to vector<256x128xf32>
    %92 = arith.mulf %90, %91 : vector<256x128xf32>
    %93 = vector.broadcast %78 : vector<256x1xf32> to vector<256x128xf32>
    %94 = arith.subf %70, %93 : vector<256x128xf32>
    %95 = arith.mulf %94, %92 : vector<256x128xf32>
    %96 = vector.shape_cast %74 : vector<128xf32> to vector<1x128xf32>
    %97 = vector.broadcast %96 : vector<1x128xf32> to vector<256x128xf32>
    %98 = arith.addf %95, %97 : vector<256x128xf32>
    %99 = arith.truncf %98 : vector<256x128xf32> to vector<256x128xbf16>
    %c0_24 = arith.constant 0 : index
    %c0_25 = arith.constant 0 : index
    %100 = vector.load %arg8[%c0_24, %c0_25] : memref<128x512xbf16, #tpu.memory_space<vmem>>, vector<128x512xbf16>
    %cst_26 = arith.constant dense<0.000000e+00> : vector<256x512xf32>
    %101 = tpu.matmul %99, %100, %cst_26 {dimension_numbers = #tpu.dot_dimension_numbers<[1], [0], [0], [1], [0, 0, 1, 1], [], []>} : vector<256x128xbf16>, vector<128x512xbf16>, vector<256x512xf32> -> vector<256x512xf32>
    %c0_27 = arith.constant 0 : index
    %c0_28 = arith.constant 0 : index
    %102 = vector.load %arg9[%c0_27, %c0_28] : memref<1x512xf32, #tpu.memory_space<vmem>>, vector<1x512xf32>
    %103 = vector.shape_cast %102 : vector<1x512xf32> to vector<512xf32>
    %104 = vector.shape_cast %103 : vector<512xf32> to vector<1x512xf32>
    %105 = vector.broadcast %104 : vector<1x512xf32> to vector<256x512xf32>
    %106 = arith.addf %101, %105 : vector<256x512xf32>
    %107 = arith.mulf %106, %106 : vector<256x512xf32>
    %108 = arith.mulf %106, %107 : vector<256x512xf32>
    %cst_29 = arith.constant 4.471500e-02 : f32
    %109 = vector.broadcast %cst_29 : f32 to vector<256x512xf32>
    %110 = arith.mulf %109, %108 : vector<256x512xf32>
    %111 = arith.addf %106, %110 : vector<256x512xf32>
    %cst_30 = arith.constant 0.797884583 : f32
    %112 = vector.broadcast %cst_30 : f32 to vector<256x512xf32>
    %113 = arith.mulf %112, %111 : vector<256x512xf32>
    %114 = math.tanh %113 : vector<256x512xf32>
    %cst_31 = arith.constant 1.000000e+00 : f32
    %115 = vector.broadcast %cst_31 : f32 to vector<256x512xf32>
    %116 = arith.addf %115, %114 : vector<256x512xf32>
    %cst_32 = arith.constant 5.000000e-01 : f32
    %117 = vector.broadcast %cst_32 : f32 to vector<256x512xf32>
    %118 = arith.mulf %117, %116 : vector<256x512xf32>
    %119 = arith.mulf %106, %118 : vector<256x512xf32>
    %120 = arith.truncf %119 : vector<256x512xf32> to vector<256x512xbf16>
    %c0_33 = arith.constant 0 : index
    %c0_34 = arith.constant 0 : index
    %121 = vector.load %arg10[%c0_33, %c0_34] : memref<512x128xbf16, #tpu.memory_space<vmem>>, vector<512x128xbf16>
    %cst_35 = arith.constant dense<0.000000e+00> : vector<256x128xf32>
    %122 = tpu.matmul %120, %121, %cst_35 {dimension_numbers = #tpu.dot_dimension_numbers<[1], [0], [0], [1], [0, 0, 1, 1], [], []>} : vector<256x512xbf16>, vector<512x128xbf16>, vector<256x128xf32> -> vector<256x128xf32>
    %c0_36 = arith.constant 0 : index
    %c0_37 = arith.constant 0 : index
    %123 = vector.load %arg11[%c0_36, %c0_37] : memref<1x128xf32, #tpu.memory_space<vmem>>, vector<1x128xf32>
    %124 = vector.shape_cast %123 : vector<1x128xf32> to vector<128xf32>
    %125 = vector.shape_cast %124 : vector<128xf32> to vector<1x128xf32>
    %126 = vector.broadcast %125 : vector<1x128xf32> to vector<256x128xf32>
    %127 = arith.addf %122, %126 : vector<256x128xf32>
    %128 = arith.addf %127, %70 : vector<256x128xf32>
    %129 = vector.shape_cast %128 : vector<256x128xf32> to vector<16x16x128xf32>
    %c0_38 = arith.constant 0 : index
    %c0_39 = arith.constant 0 : index
    %c0_40 = arith.constant 0 : index
    %130 = vector.load %arg12[%c0_38, %c0_39, %c0_40] : memref<16x16x128xf32, #tpu.memory_space<vmem>>, vector<16x16x128xf32>
    tpu.vector_store %arg12[%c0_38, %c0_39, %c0_40], %129 {strides = array<i32>} : memref<16x16x128xf32, #tpu.memory_space<vmem>>, vector<16x16x128xf32>,
    return
  }
  func.func @transform_0(%arg0: i32) -> (i32, i32, i32) {
    %c0_i32 = arith.constant 0 : i32
    %c0_i32_0 = arith.constant 0 : i32
    %c0_i32_1 = arith.constant 0 : i32
    return %arg0, %c0_i32, %c0_i32_0 : i32, i32, i32
  }
  func.func @transform_1(%arg0: i32) -> (i32, i32) {
    %c0_i32 = arith.constant 0 : i32
    %c0_i32_0 = arith.constant 0 : i32
    %c0_i32_1 = arith.constant 0 : i32
    return %c0_i32, %c0_i32_0 : i32, i32
  }
  func.func @transform_2(%arg0: i32) -> (i32, i32) {
    %c0_i32 = arith.constant 0 : i32
    %c0_i32_0 = arith.constant 0 : i32
    %c0_i32_1 = arith.constant 0 : i32
    return %c0_i32, %c0_i32_0 : i32, i32
  }
  func.func @transform_3(%arg0: i32) -> (i32, i32) {
    %c0_i32 = arith.constant 0 : i32
    %c0_i32_0 = arith.constant 0 : i32
    %c0_i32_1 = arith.constant 0 : i32
    return %c0_i32, %c0_i32_0 : i32, i32
  }
  func.func @transform_4(%arg0: i32) -> (i32, i32) {
    %c0_i32 = arith.constant 0 : i32
    %c0_i32_0 = arith.constant 0 : i32
    %c0_i32_1 = arith.constant 0 : i32
    return %c0_i32, %c0_i32_0 : i32, i32
  }
  func.func @transform_5(%arg0: i32) -> (i32, i32) {
    %c0_i32 = arith.constant 0 : i32
    %c0_i32_0 = arith.constant 0 : i32
    %c0_i32_1 = arith.constant 0 : i32
    return %c0_i32, %c0_i32_0 : i32, i32
  }
  func.func @transform_6(%arg0: i32) -> (i32, i32) {
    %c0_i32 = arith.constant 0 : i32
    %c0_i32_0 = arith.constant 0 : i32
    %c0_i32_1 = arith.constant 0 : i32
    return %c0_i32, %c0_i32_0 : i32, i32
  }
  func.func @transform_7(%arg0: i32) -> (i32, i32) {
    %c0_i32 = arith.constant 0 : i32
    %c0_i32_0 = arith.constant 0 : i32
    %c0_i32_1 = arith.constant 0 : i32
    return %c0_i32, %c0_i32_0 : i32, i32
  }
  func.func @transform_8(%arg0: i32) -> (i32, i32) {
    %c0_i32 = arith.constant 0 : i32
    %c0_i32_0 = arith.constant 0 : i32
    %c0_i32_1 = arith.constant 0 : i32
    return %c0_i32, %c0_i32_0 : i32, i32
  }
  func.func @transform_9(%arg0: i32) -> (i32, i32) {
    %c0_i32 = arith.constant 0 : i32
    %c0_i32_0 = arith.constant 0 : i32
    %c0_i32_1 = arith.constant 0 : i32
    return %c0_i32, %c0_i32_0 : i32, i32
  }
  func.func @transform_10(%arg0: i32) -> (i32, i32) {
    %c0_i32 = arith.constant 0 : i32
    %c0_i32_0 = arith.constant 0 : i32
    %c0_i32_1 = arith.constant 0 : i32
    return %c0_i32, %c0_i32_0 : i32, i32
  }
  func.func @transform_11(%arg0: i32) -> (i32, i32, i32) {
    %c0_i32 = arith.constant 0 : i32
    %c0_i32_0 = arith.constant 0 : i32
    %c0_i32_1 = arith.constant 0 : i32
    return %arg0, %c0_i32, %c0_i32_0 : i32, i32, i32
  }
}

</mosaic_0001>

<bundles_post_ra>
// kernel: tpu_custom_call.1
= control target key start
LH: loop header
LB: loop body
LE: loop exit
PB: predicated region body
PF: predicated region fallthrough
CT: control target
= control target key end

     0   :  { %s8739_s0 = inlined_call_operand.hbm [shape: f32[64,16,128], index: 0, kind: input, shape index: {}]   ;;  %s8740_s1 = inlined_call_operand.vmem [shape: bf16[16,16], index: 1, kind: input, shape index: {}]   ;;  %s8741_s2 = inlined_call_operand.vmem [shape: f32[16,1], index: 2, kind: input, shape index: {}]   ;;  %s8742_s3 = inlined_call_operand.vmem [shape: f32[1,128], index: 3, kind: input, shape index: {}]   ;;  %s8743_s4 = inlined_call_operand.vmem [shape: f32[1,128], index: 4, kind: input, shape index: {}]   ;;  %s8744_s5 = inlined_call_operand.vmem [shape: f32[1,128], index: 5, kind: input, shape index: {}]   ;;  %s8745_s6 = inlined_call_operand.vmem [shape: f32[1,128], index: 6, kind: input, shape index: {}]   ;;  %s8746_s7 = inlined_call_operand.hbm [shape: bf16[128,512], index: 7, kind: input, shape index: {}]   ;;  %s8747_s8 = inlined_call_operand.vmem [shape: f32[1,512], index: 8, kind: input, shape index: {}]   ;;  %s8748_s9 = inlined_call_operand.hbm [shape: bf16[512,128], index: 9, kind: input, shape index: {}]   ;;  %s8749_s10 = inlined_call_operand.vmem [shape: f32[1,128], index: 10, kind: input, shape index: {}]   ;;  %s8750_s11 = inlined_call_operand.hbm [shape: f32[64,16,128], index: 11, kind: output, shape index: {}]  }
   0x1   :  { %8876 = sst [smem:[#allocation132_spill]] %s8750_s11 }
   0x2   :  { %16 = vsyncpa [#allocation3], 0 }
   0x3   :  { %18 = vsyncpa [#allocation3 + $0x1], 0 }
   0x4   :  { %19 = vsyncpa [#allocation6], 0 }
   0x5   :  { %20 = vsyncpa [#allocation4], 0 }
   0x6   :  { %22 = vsyncpa [#allocation4 + $0x1], 0  ;;  %s5594_s17 = smov 0   ;;  %s5596_s18 = smov 0  }
   0x7   :  { %s5598_s19 = smov 0   ;;  %s5600_s20 = smov 0  }
   0x8 LB: > { %8877 = sst [smem:[#allocation12_spill]] %s5507_s17  ;;  %s5615_s21 = sadd.s32 4294967295, %s5519_s20   ;;  %s5519_s20 = sphi %s5600_s20, %s9351_s20   ;;  %s5515_s19 = sphi %s5598_s19, %s9350_s19   ;;  %s5511_s18 = sphi %s5596_s18, %s9349_s18   ;;  %s5507_s17 = sphi %s5594_s17, %s9348_s17  }
   0x9   : > { %s4462_s22 = sadd.s32 4294967294, %s5519_s20   ;;  %p48_p0 = scmp.ne.s32.totalorder %s5511_s18, %s5507_s17 }
   0xa   : > { %p8751_p1 = scmp.eq.s32.totalorder %s5615_s21, 0  ;;  %p288_p3 = scmp.eq.s32.totalorder %s4462_s22, 3 }
   0xb   : > { %p4463_p5 = scmp.ge.s32.totalorder %s5519_s20, 1  ;;  %p295_p7 = scmp.lt.s32.totalorder %s5519_s20, 5 }
   0xc   : > { %p5624_p4 = por %p8751_p1, %p48_p0  ;;  %p5629_p6 = por %p288_p3, %p48_p0 }
   0xd   : > { %p5634_p8 = pnand %p4463_p5, %p295_p7  ;;  %s5521_s26 = smov [#allocation5]  }
   0xe   : > { %s8878_s23 = scalar_select %p5624_p4, 1, 0 }
   0xf   : > { %s8879_s24 = scalar_select %p5629_p6, 1, 0 }
  0x10   : > { %s8881_s25 = scalar_select %p5634_p8, 1, 0 }
  0x11   : > { %8880 = sst [smem:[#allocation13_spill]] %s8879_s24  ;;  %s325_s27 = sshll.u32 %s5521_s26, 4  ;;  %s326_s27 = int_to_ptr.vmem [resolvable:$true] %s325_s27 }
  0x12   : > { %p4800_p9 = pneg %p5634_p8  ;;  %s5522_s29 = smov [#allocation7]  }
  0x13   : > { %s341_s30 = sshll.u32 %s5522_s29, 4  ;;  %s5363_s14 = scalar_lea.hbm %s8746_s7, 4096  ;;  %s5646_s30 = int_to_ptr.vmem [resolvable:$true] %s341_s30 }
  0x14   : > { %p5642_p10 = pnand %p4800_p9, %p8751_p1  ;;  %p5364_p11 = scmp.ne.s32.totalorder %s8746_s7, %s5363_s14 }
  0x15   : > { %p5370_p3 = scmp.lt.u32.totalorder %s5363_s14, %s8746_s7 }
  0x16   : > { %p5365_p12 = pneg %p5642_p10 }
  0x18   : > { %p5366_p13 = pnand %p5365_p12, %p5364_p11 }
  0x1a   : > { %p5367_p0 = pneg %p5366_p13 }
  0x1c   : > { %p5372_p5 = pnand %p5370_p3, %p5367_p0 }
  0x1e   : > { %5375 = shalt.err (!%p5372_p5)
}
  0x1f   : > { %s5376_s29 = scalar_lea.vmem %s326_s27, 4096  ;;  %p5384_p2 = scmp.lt.s32.totalorder %s326_s27, %s326_s27 }
  0x20   : > { %p5377_p7 = scmp.ne.s32.totalorder %s326_s27, %s5376_s29  ;;  %p5385_p6 = scmp.lt.s32.totalorder %s5376_s29, %s5376_s29 }
  0x22   : > { %p5379_p9 = pnand %p5377_p7, %p5365_p12  ;;  %p5386_p4 = por %p5385_p6, %p5384_p2 }
  0x24   : > { %p5380_p1 = pneg %p5379_p9 }
  0x26   : > { %p5387_p8 = pnand %p5386_p4, %p5380_p1 }
  0x28   : > { %5390 = shalt.err (!%p5387_p8)
}
  0x29   : > { %s5523_s12 = smov 256   ;;  %s5524_s13 = smov 16  }
  0x2a   : > { %4803 = dma.hbm_to_vmem [thread:$0]  (!%p5642_p10), %s8746_s7, 4096, %s326_s27, [#allocation6], %s5523_s12, %s5523_s12, %s5524_s13  }
  0x2b   : > { %s5391_s26 = scalar_lea.hbm %s8748_s9, 4096 }
  0x2c   : > { %p5392_p11 = scmp.ne.s32.totalorder %s8748_s9, %s5391_s26  ;;  %p5398_p4 = scmp.lt.u32.totalorder %s5391_s26, %s8748_s9 }
  0x2e   : > { %p5394_p1 = pnand %p5392_p11, %p5365_p12 }
  0x30   : > { %p5395_p2 = pneg %p5394_p1 }
  0x32   : > { %p5400_p6 = pnand %p5398_p4, %p5395_p2 }
  0x34   : > { %5403 = shalt.err (!%p5400_p6)
}
  0x35   : > { %s5404_s27 = scalar_lea.vmem %s5646_s30, 4096  ;;  %p5412_p3 = scmp.lt.s32.totalorder %s5646_s30, %s5646_s30 }
  0x36   : > { %p5405_p8 = scmp.ne.s32.totalorder %s5646_s30, %s5404_s27  ;;  %p5413_p5 = scmp.lt.s32.totalorder %s5404_s27, %s5404_s27 }
  0x38   : > { %p5407_p13 = pnand %p5405_p8, %p5365_p12  ;;  %p5414_p7 = por %p5413_p5, %p5412_p3 }
  0x3a   : > { %p5408_p0 = pneg %p5407_p13 }
  0x3c   : > { %p5415_p9 = pnand %p5414_p7, %p5408_p0 }
  0x3e   : > { %5418 = shalt.err (!%p5415_p9)
}
  0x3f   : > { %s5525_s11 = smov 64   ;;  %s5526_s17 = smov 4  }
  0x40   : > { %4806 = dma.hbm_to_vmem [thread:$0]  (!%p5642_p10), %s8748_s9, 4096, %s5646_s30, [#allocation6], %s5525_s11, %s5525_s11, %s5526_s17  }
  0x41   : > { %s5696_s13 = sadd.s32 1, %s5519_s20   ;;  %s35_s15 = sadd.s32 1, %s5515_s19 }
  0x42   : > { %s32_s14 = ssub.s32 %s5519_s20, %s5696_s13  ;;  %p42_p11 = scmp.ne.s32.totalorder %s5515_s19, %s5511_s18 }
  0x43   : > { %p33_p12 = scmp.eq.s32.totalorder %s32_s14, 0  ;;  %p43_p1 = scmp.eq.s32.totalorder %s5519_s20, 0 }
  0x44   : > { %p8883_p4 = scmp.eq.s32.totalorder %s5615_s21, 3  ;;  %p4817_p8 = scmp.lt.s32.totalorder %s5519_s20, 4 }
  0x45   : > { %s5705_s16 = scalar_select %p33_p12, %s5515_s19, %s35_s15  }
  0x46   : > { %p44_p2 = por %p43_p1, %p42_p11  ;;  %p5709_p6 = por %p8883_p4, %p42_p11 }
  0x47   : > { %s358_s28 = sand.u32 1, %s5515_s19   ;;  %s4561_s30 = sshll.u32 %s5519_s20, 12 }
  0x48   : > { %s4467_s26 = sshll.u32 %s358_s28, 8  ;;  %s5719_s11 = scalar_lea.hbm %s8739_s0, %s4561_s30 }
  0x49   : > { %s362_s17 = scalar_lea.vmem [#allocation2], %s4467_s26  ;;  %p5723_p10 = pnand %p4817_p8, %p44_p2 }
  0x4a   : > { %s370_s24 = sshll.u32 %s362_s17, 4  ;;  %s5727_s14 = scalar_lea.sflag [#allocation3], %s358_s28  ;;  %s5721_s24 = int_to_ptr.vmem [resolvable:$true] %s370_s24 }
  0x4b   : > { %s5419_s15 = scalar_lea.hbm %s5719_s11, 4096  ;;  %p5421_p0 = pneg %p5723_p10 }
  0x4c   : > { %p5420_p13 = scmp.ne.s32.totalorder %s5719_s11, %s5419_s15  ;;  %s5424_s29 = scalar_lea.hbm %s8739_s0, 16384 }
  0x4d   : > { %p5425_p7 = scmp.lt.u32.totalorder %s5719_s11, %s8739_s0  ;;  %p5426_p9 = scmp.lt.u32.totalorder %s5424_s29, %s5419_s15 }
  0x4e   : > { %p5422_p3 = pnand %p5421_p0, %p5420_p13  ;;  %p5428_p11 = scmp.lt.u32.totalorder %s5419_s15, %s5719_s11 }
  0x4f   : > { %p5427_p12 = por %p5426_p9, %p5425_p7 }
  0x50   : > { %p5423_p5 = pneg %p5422_p3 }
  0x51   : > { %p5429_p1 = por %p5428_p11, %p5427_p12 }
  0x53   : > { %p5430_p2 = pnand %p5429_p1, %p5423_p5 }
  0x55   : > { %5433 = shalt.err (!%p5430_p2)
}
  0x56   : > { %s5434_s28 = scalar_lea.vmem %s5721_s24, 4096  ;;  %s5527_s26 = smov [#allocation2]  }
  0x57   : > { %p5435_p4 = scmp.ne.s32.totalorder %s5721_s24, %s5434_s28  ;;  %s5439_s30 = sshll.u32 %s5527_s26, 4  ;;  %s5440_s30 = int_to_ptr.vmem [resolvable:$false] %s5439_s30 }
  0x58   : > { %s5441_s27 = scalar_lea.vmem %s5440_s30, 8192  ;;  %p5442_p3 = scmp.lt.s32.totalorder %s5721_s24, %s5440_s30 }
  0x59   : > { %p5437_p8 = pnand %p5435_p4, %p5421_p0  ;;  %p5443_p7 = scmp.lt.s32.totalorder %s5441_s27, %s5434_s28 }
  0x5b   : > { %p5438_p13 = pneg %p5437_p8  ;;  %p5444_p9 = por %p5443_p7, %p5442_p3 }
  0x5d   : > { %p5445_p12 = pnand %p5444_p9, %p5438_p13 }
  0x5f   : > { %5448 = shalt.err (!%p5445_p12)
}
  0x60   : > { %s5528_s15 = smov 128   ;;  %s5529_s29 = smov 8  }
  0x61   : > { %4810 = dma.hbm_to_vmem [thread:$0]  (!%p5723_p10), %s5719_s11, 4096, %s5721_s24, %s5727_s14, %s5528_s15, %s5528_s15, %s5529_s29  }
  0x62   : > { %p8886_p0 = scmp.ne.s32.totalorder %s8881_s25, 0 }
  0x64   : > { %382 = sbr.rel (%p8886_p0) target bundleno = 1499 (0x5db), region = 64 }
  0x6b   : > { %s5758_s17 = sand.u32 1, %s5511_s18   ;;  %p8887_p5 = scmp.ne.s32.totalorder %s8878_s23, 0 }
  0x6c   : > { %s4472_s28 = sshll.u32 %s5758_s17, 8  ;;  %s385_s26 = scalar_lea.sflag [#allocation3], %s5758_s17 }
  0x6d   : > { %s5764_s30 = scalar_lea.vmem [#allocation2], %s4472_s28 }
  0x6e   : > { %5494 = dma.done.wait (%p8887_p5), %s385_s26, 4096  }
  0x6f   : > { %5496 = vsyncadd (%p8887_p5), %s385_s26, 4294963200  ;;  %p8888_p10 = scmp.eq.s32.totalorder %s5615_s21, 0 }
  0x71   : > { %5498 = dma.done.wait (%p8888_p10), [#allocation6], 8192   ;;  %p8889_p11 = pmov %p8888_p10 }
  0x72   : > { %v5775_v0 = vld [vmem:[%s5764_s30 + $0x10] sm:$0xff]  ;;  %v5778_v1 = vld [vmem:[%s5764_s30] sm:$0xff]  ;;  %v5783_v2 = vld [vmem:[%s5764_s30 + $0x18] sm:$0xff]  ;;  %v5530_v30 = vmov 0   ;;  %vm1000_vm0 = vcmask 130048   ;;  %s8596_s15 = scalar_lea.vmem [#allocation8], %s4472_s28 }
  0x73   : > { %5500 = vsyncadd (%p8889_p11), [#allocation6], 4294959104  ;;  %476 = vadd.xlane.f32.xlu0 %v5775_v0  ;;  %472 = vadd.xlane.f32.xlu1 %v5778_v1  ;;  %v5786_v3 = vld [vmem:[%s5764_s30 + $0x8] sm:$0xff]  ;;  %v571_v4 = vmul.f32 %v5775_v0, %v5775_v0  ;;  %v572_v5 = vmul.f32 %v5783_v2, %v5783_v2  ;;  %v569_v7 = vmul.f32 %v5778_v1, %v5778_v1  ;;  %v5799_v8 = vld [vmem:[%s5764_s30 + $0x38] sm:$0xff]  ;;  %s4563_s28 = sshll.u32 %s5615_s21, 12  ;;  %s4370_s29 = sshll.u32 %s8596_s15, 4  ;;  %s8693_s29 = int_to_ptr.vmem [resolvable:$true] %s4370_s29 }
  0x74   : > { %v570_v6 = vmul.f32 %v5786_v3, %v5786_v3  ;;  %v5802_v9 = vld [vmem:[%s5764_s30 + $0x30] sm:$0xff]  ;;  %v5805_v10 = vld [vmem:[%s5764_s30 + $0x28] sm:$0xff]  ;;  %v5808_v11 = vld [vmem:[%s5764_s30 + $0x20] sm:$0xff]  ;;  %v576_v12 = vmul.f32 %v5799_v8, %v5799_v8  ;;  %1036 = vmatprep.mubr.bf16.mxu0 %v5530_v30  ;;  %1079 = vmatprep.mubr.bf16.mxu1 %v5530_v30  ;;  %s9343_s23 = sld [smem:[#allocation132_spill]]  ;;  %s4356_s11 = scalar_lea.sflag [#allocation4], %s5758_s17 }
  0x75   : > { %v575_v13 = vmul.f32 %v5802_v9, %v5802_v9  ;;  %v574_v14 = vmul.f32 %v5805_v10, %v5805_v10  ;;  %v573_v15 = vmul.f32 %v5808_v11, %v5808_v11  ;;  %v5823_v16 = vld [vmem:[%s5764_s30 + $0x58] sm:$0xff]  ;;  %v5826_v17 = vld [vmem:[%s5764_s30 + $0x50] sm:$0xff]  ;;  %v5829_v18 = vld [vmem:[%s5764_s30 + $0x48] sm:$0xff]  ;;  %4864 = vset.pattern.permute.xlu0 %v5530_v30  ;;  %4865 = vset.pattern.permute.xlu1 %v5530_v30  ;;  %s5449_s21 = scalar_lea.vmem %s8693_s29, 4096  ;;  %s5531_s24 = smov [#allocation8]  }
  0x76   : > { %v5832_v19 = vld [vmem:[%s5764_s30 + $0x40] sm:$0xff]  ;;  %v580_v20 = vmul.f32 %v5823_v16, %v5823_v16  ;;  %v579_v21 = vmul.f32 %v5826_v17, %v5826_v17  ;;  %v578_v22 = vmul.f32 %v5829_v18, %v5829_v18  ;;  %v5847_v24 = vld [vmem:[%s5764_s30 + $0x78] sm:$0xff]  ;;  %v5850_v25 = vld [vmem:[%s5764_s30 + $0x70] sm:$0xff]  ;;  %p5450_p1 = scmp.ne.s32.totalorder %s8693_s29, %s5449_s21  ;;  %s5453_s12 = sshll.u32 %s5531_s24, 4  ;;  %s5454_s12 = int_to_ptr.vmem [resolvable:$false] %s5453_s12 }
  0x77   : > { %478 = vadd.xlane.f32.xlu0 %v5783_v2  ;;  %474 = vadd.xlane.f32.xlu1 %v5786_v3  ;;  %v577_v23 = vmul.f32 %v5832_v19, %v5832_v19  ;;  %v5855_v26 = vld [vmem:[%s5764_s30 + $0x68] sm:$0xff]  ;;  %v5858_v27 = vld [vmem:[%s5764_s30 + $0x60] sm:$0xff]  ;;  %v584_v28 = vmul.f32 %v5847_v24, %v5847_v24  ;;  %v583_v29 = vmul.f32 %v5850_v25, %v5850_v25  ;;  %v5875_v33 = vld [vmem:[%s5764_s30 + $0x98] sm:$0xff]  ;;  %s5455_s14 = scalar_lea.vmem %s5454_s12, 8192  ;;  %p5456_p8 = scmp.lt.s32.totalorder %s8693_s29, %s5454_s12 }
  0x78   : > { %v582_v31 = vmul.f32 %v5855_v26, %v5855_v26  ;;  %v581_v32 = vmul.f32 %v5858_v27, %v5858_v27  ;;  %v5878_v34 = vld [vmem:[%s5764_s30 + $0x90] sm:$0xff]  ;;  %v5883_v35 = vld [vmem:[%s5764_s30 + $0x88] sm:$0xff]  ;;  %v5886_v36 = vld [vmem:[%s5764_s30 + $0x80] sm:$0xff]  ;;  %v588_v37 = vmul.f32 %v5875_v33, %v5875_v33  ;;  %p5451_p2 = pnand %p5450_p1, %p5709_p6  ;;  %p5457_p13 = scmp.lt.s32.totalorder %s5455_s14, %s5449_s21 }
  0x79   : > { %v587_v38 = vmul.f32 %v5878_v34, %v5878_v34  ;;  %v586_v39 = vmul.f32 %v5883_v35, %v5883_v35  ;;  %v585_v40 = vmul.f32 %v5886_v36, %v5886_v36  ;;  %v5899_v41 = vld [vmem:[%s5764_s30 + $0xb8] sm:$0xff]  ;;  %v5902_v42 = vld [vmem:[%s5764_s30 + $0xb0] sm:$0xff]  ;;  %v5907_v43 = vld [vmem:[%s5764_s30 + $0xa8] sm:$0xff] }
  0x7a   : > { %v5910_v44 = vld [vmem:[%s5764_s30 + $0xa0] sm:$0xff]  ;;  %v592_v45 = vmul.f32 %v5899_v41, %v5899_v41  ;;  %v591_v46 = vmul.f32 %v5902_v42, %v5902_v42  ;;  %v590_v47 = vmul.f32 %v5907_v43, %v5907_v43  ;;  %v5923_v49 = vld [vmem:[%s5764_s30 + $0xd8] sm:$0xff]  ;;  %v5926_v50 = vld [vmem:[%s5764_s30 + $0xd0] sm:$0xff]  ;;  %s8691_s25 = scalar_lea.hbm %s9343_s23, %s4563_s28  ;;  %p5452_p4 = pneg %p5451_p2 }
  0x7b   : > { %605 = vadd.xlane.f32.xlu0 %v571_v4  ;;  %607 = vadd.xlane.f32.xlu1 %v572_v5  ;;  %v589_v48 = vmul.f32 %v5910_v44, %v5910_v44  ;;  %v5931_v51 = vld [vmem:[%s5764_s30 + $0xc8] sm:$0xff]  ;;  %v5934_v52 = vld [vmem:[%s5764_s30 + $0xc0] sm:$0xff]  ;;  %v596_v53 = vmul.f32 %v5923_v49, %v5923_v49  ;;  %v595_v54 = vmul.f32 %v5926_v50, %v5926_v50  ;;  %v5947_v57 = vld [vmem:[%s5764_s30 + $0xf8] sm:$0xff]  ;;  %p5458_p3 = por %p5457_p13, %p5456_p8 }
  0x7c   : > { %v594_v55 = vmul.f32 %v5931_v51, %v5931_v51  ;;  %v593_v56 = vmul.f32 %v5934_v52, %v5934_v52  ;;  %v5950_v58 = vld [vmem:[%s5764_s30 + $0xf0] sm:$0xff]  ;;  %v5955_v59 = vld [vmem:[%s5764_s30 + $0xe8] sm:$0xff]  ;;  %v5958_v60 = vld [vmem:[%s5764_s30 + $0xe0] sm:$0xff]  ;;  %v600_v61 = vmul.f32 %v5947_v57, %v5947_v57 }
  0x7d   : > { %v599_v62 = vmul.f32 %v5950_v58, %v5950_v58  ;;  %v598_v63 = vmul.f32 %v5955_v59, %v5955_v59  ;;  %v597_v4 = vmul.f32 %v5958_v60, %v5958_v60  ;;  %p5459_p7 = pnand %p5458_p3, %p5452_p4 }
  0x7f   : > { %603 = vadd.xlane.f32.xlu1 %v570_v6  ;;  %601 = vadd.xlane.f32.xlu0 %v569_v7  ;;  %v984_v7 = vld [vmem:[%s8741_s2 + $0x8] sm:$0xff] }
  0x83   : > { %486 = vadd.xlane.f32.xlu1 %v5799_v8  ;;  %484 = vadd.xlane.f32.xlu0 %v5802_v9 }
  0x87   : > { %482 = vadd.xlane.f32.xlu1 %v5805_v10  ;;  %480 = vadd.xlane.f32.xlu0 %v5808_v11 }
  0x8b   : > { %615 = vadd.xlane.f32.xlu1 %v576_v12  ;;  %613 = vadd.xlane.f32.xlu0 %v575_v13  ;;  %v983_v12 = vld [vmem:[%s8741_s2] sm:$0xff] }
  0x8f   : > { %611 = vadd.xlane.f32.xlu1 %v574_v14  ;;  %609 = vadd.xlane.f32.xlu0 %v573_v15 }
  0x93   : > { %494 = vadd.xlane.f32.xlu1 %v5823_v16  ;;  %492 = vadd.xlane.f32.xlu0 %v5826_v17 }
  0x97   : > { %490 = vadd.xlane.f32.xlu1 %v5829_v18  ;;  %488 = vadd.xlane.f32.xlu0 %v5832_v19 }
  0x9b   : > { %623 = vadd.xlane.f32.xlu1 %v580_v20  ;;  %621 = vadd.xlane.f32.xlu0 %v579_v21 }
  0x9f   : > { %619 = vadd.xlane.f32.xlu1 %v578_v22  ;;  %617 = vadd.xlane.f32.xlu0 %v577_v23 }
  0xa3   : > { %502 = vadd.xlane.f32.xlu1 %v5847_v24  ;;  %500 = vadd.xlane.f32.xlu0 %v5850_v25 }
  0xa7   : > { %498 = vadd.xlane.f32.xlu1 %v5855_v26  ;;  %496 = vadd.xlane.f32.xlu0 %v5858_v27 }
  0xab   : > { %631 = vadd.xlane.f32.xlu1 %v584_v28  ;;  %629 = vadd.xlane.f32.xlu0 %v583_v29 }
  0xaf   : > { %627 = vadd.xlane.f32.xlu1 %v582_v31  ;;  %625 = vadd.xlane.f32.xlu0 %v581_v32 }
  0xb3   : > { %510 = vadd.xlane.f32.xlu1 %v5875_v33  ;;  %508 = vadd.xlane.f32.xlu0 %v5878_v34 }
  0xb7   : > { %506 = vadd.xlane.f32.xlu1 %v5883_v35  ;;  %504 = vadd.xlane.f32.xlu0 %v5886_v36 }
  0xbb   : > { %639 = vadd.xlane.f32.xlu1 %v588_v37  ;;  %637 = vadd.xlane.f32.xlu0 %v587_v38 }
  0xbf   : > { %635 = vadd.xlane.f32.xlu1 %v586_v39  ;;  %633 = vadd.xlane.f32.xlu0 %v585_v40 }
  0xc3   : > { %518 = vadd.xlane.f32.xlu1 %v5899_v41  ;;  %516 = vadd.xlane.f32.xlu0 %v5902_v42 }
  0xc7   : > { %514 = vadd.xlane.f32.xlu1 %v5907_v43  ;;  %512 = vadd.xlane.f32.xlu0 %v5910_v44 }
  0xcb   : > { %647 = vadd.xlane.f32.xlu1 %v592_v45  ;;  %645 = vadd.xlane.f32.xlu0 %v591_v46 }
  0xcf   : > { %643 = vadd.xlane.f32.xlu1 %v590_v47  ;;  %641 = vadd.xlane.f32.xlu0 %v589_v48 }
  0xd3   : > { %526 = vadd.xlane.f32.xlu1 %v5923_v49  ;;  %524 = vadd.xlane.f32.xlu0 %v5926_v50 }
  0xd7   : > { %522 = vadd.xlane.f32.xlu1 %v5931_v51  ;;  %520 = vadd.xlane.f32.xlu0 %v5934_v52 }
  0xdb   : > { %655 = vadd.xlane.f32.xlu1 %v596_v53  ;;  %653 = vadd.xlane.f32.xlu0 %v595_v54 }
  0xdf   : > { %651 = vadd.xlane.f32.xlu1 %v594_v55  ;;  %649 = vadd.xlane.f32.xlu0 %v593_v56 }
  0xe3   : > { %534 = vadd.xlane.f32.xlu1 %v5947_v57  ;;  %532 = vadd.xlane.f32.xlu0 %v5950_v58 }
  0xe7   : > { %530 = vadd.xlane.f32.xlu1 %v5955_v59  ;;  %528 = vadd.xlane.f32.xlu0 %v5958_v60 }
  0xeb   : > { %663 = vadd.xlane.f32.xlu1 %v600_v61  ;;  %661 = vadd.xlane.f32.xlu0 %v599_v62 }
  0xef   : > { %659 = vadd.xlane.f32.xlu1 %v598_v63  ;;  %657 = vadd.xlane.f32.xlu0 %v597_v4 }
 0x100   : > { %v477_v5 = vpop.xlane.xlu0 %476  ;;  %v473_v6 = vpop.xlane.xlu1 %472  ;;  %992 = vperm.xlu1 %4865, %v984_v7  }
 0x101   : > { %v539_v15 = vmul.f32 0.0078125, %v477_v5  ;;  %v5978_v21 = vmul.f32 0.0078125, %v473_v6 }
 0x103   : > { %v699_v29 = vmul.f32 %v539_v15, %v539_v15  ;;  %v697_v40 = vmul.f32 %v5978_v21, %v5978_v21 }
 0x104   : > { %v479_v13 = vpop.xlane.xlu0 %478  ;;  %v475_v14 = vpop.xlane.xlu1 %474 }
 0x105   : > { %v5976_v20 = vmul.f32 0.0078125, %v479_v13  ;;  %987 = vperm.xlu0 %4864, %v983_v12   ;;  %v5980_v22 = vmul.f32 0.0078125, %v475_v14 }
 0x107   : > { %v700_v31 = vmul.f32 %v5976_v20, %v5976_v20  ;;  %v698_v45 = vmul.f32 %v5980_v22, %v5980_v22 }
 0x108   : > { %v606_v23 = vpop.xlane.xlu0 %605  ;;  %v608_v28 = vpop.xlane.xlu1 %607 }
 0x109   : > { %v667_v32 = vmul.f32 0.0078125, %v606_v23  ;;  %v668_v37 = vmul.f32 0.0078125, %v608_v28 }
 0x10b   : > { %v731_v38 = vsub.f32 %v667_v32, %v699_v29  ;;  %v732_v39 = vsub.f32 %v668_v37, %v700_v31  ;;  %v6003_v31 = vld [vmem:[%s8742_s3] ss:$0 sm:$0xff] }
 0x10c   : > { %v604_v46 = vpop.xlane.xlu1 %603  ;;  %v602_v47 = vpop.xlane.xlu0 %601 }
 0x10d   : > { %v763_v48 = vadd.f32 1e-05, %v731_v38  ;;  %v764_v53 = vadd.f32 1e-05, %v732_v39  ;;  %v666_v54 = vmul.f32 0.0078125, %v604_v46  ;;  %v665_v55 = vmul.f32 0.0078125, %v602_v47 }
 0x10e   : > { %v865_v46 = vsub.f32 %v5775_v0, %v539_v15  ;;  %v866_v0 = vsub.f32 %v5783_v2, %v5976_v20 }
 0x10f   : > { %4947 = vrsqrt.f32 %v763_v48  ;;  %v730_v56 = vsub.f32 %v666_v54, %v698_v45  ;;  %v729_v61 = vsub.f32 %v665_v55, %v697_v40 }
 0x110   : > { %4949 = vrsqrt.f32 %v764_v53  ;;  %v487_v62 = vpop.xlane.xlu1 %486  ;;  %v485_v63 = vpop.xlane.xlu0 %484 }
 0x111   : > { %v762_v4 = vadd.f32 1e-05, %v730_v56  ;;  %v761_v5 = vadd.f32 1e-05, %v729_v61  ;;  %v5988_v6 = vmul.f32 0.0078125, %v487_v62  ;;  %v5990_v7 = vmul.f32 0.0078125, %v485_v63 }
 0x112   : > { %v6014_v56 = vld [vmem:[%s8743_s4] ss:$0 sm:$0xff] }
 0x113   : > { %4951 = vrsqrt.f32 %v762_v4  ;;  %v704_v23 = vmul.f32 %v5988_v6, %v5988_v6  ;;  %v703_v28 = vmul.f32 %v5990_v7, %v5990_v7 }
 0x114   : > { %4953 = vrsqrt.f32 %v761_v5  ;;  %v483_v12 = vpop.xlane.xlu1 %482  ;;  %v481_v13 = vpop.xlane.xlu0 %480 }
 0x115   : > { %v5992_v14 = vmul.f32 0.0078125, %v483_v12  ;;  %v5998_v29 = vmul.f32 0.0078125, %v481_v13 }
 0x117   : > { %v702_v47 = vmul.f32 %v5992_v14, %v5992_v14  ;;  %v701_v53 = vmul.f32 %v5998_v29, %v5998_v29 }
 0x118   : > { %v616_v32 = vpop.xlane.xlu1 %615  ;;  %v614_v37 = vpop.xlane.xlu0 %613 }
 0x119   : > { %v4948_v38 = vpop.eup %4947  ;;  %v672_v39 = vmul.f32 0.0078125, %v616_v32  ;;  %v671_v40 = vmul.f32 0.0078125, %v614_v37 }
 0x11a   : > { %v4950_v45 = vpop.eup %4949  ;;  %v833_v48 = vmul.f32 %v4948_v38, %v6003_v31 }
 0x11b   : > { %v736_v54 = vsub.f32 %v672_v39, %v704_v23  ;;  %v735_v55 = vsub.f32 %v671_v40, %v703_v28  ;;  %v834_v61 = vmul.f32 %v4950_v45, %v6003_v31  ;;  %v864_v28 = vsub.f32 %v5786_v3, %v5980_v22 }
 0x11c   : > { %v612_v15 = vpop.xlane.xlu1 %611  ;;  %v610_v62 = vpop.xlane.xlu0 %609  ;;  %v897_v63 = vmul.f32 %v865_v46, %v833_v48  ;;  %v863_v45 = vsub.f32 %v5778_v1, %v5978_v21 }
 0x11d   : > { %v4952_v4 = vpop.eup %4951  ;;  %v768_v5 = vadd.f32 1e-05, %v736_v54  ;;  %v767_v12 = vadd.f32 1e-05, %v735_v55  ;;  %v670_v13 = vmul.f32 0.0078125, %v612_v15  ;;  %v669_v32 = vmul.f32 0.0078125, %v610_v62 }
 0x11e   : > { %v4954_v23 = vpop.eup %4953  ;;  %v898_v37 = vmul.f32 %v866_v0, %v834_v61  ;;  %v935_v38 = vadd.f32 %v6014_v56, %v897_v63  ;;  %v832_v39 = vmul.f32 %v4952_v4, %v6003_v31 }
 0x11f   : > { %4955 = vrsqrt.f32 %v768_v5  ;;  %v734_v40 = vsub.f32 %v670_v13, %v702_v47  ;;  %v733_v2 = vsub.f32 %v669_v32, %v701_v53  ;;  %v831_v20 = vmul.f32 %v4954_v23, %v6003_v31  ;;  %v6044_v32 = vld [vmem:[%s8740_s1] sm:$0xff]  }
 0x120   : > { %4957 = vrsqrt.f32 %v767_v12  ;;  %v495_v46 = vpop.xlane.xlu1 %494  ;;  %v493_v48 = vpop.xlane.xlu0 %492  ;;  %v936_v54 = vadd.f32 %v6014_v56, %v898_v37  ;;  %v896_v55 = vmul.f32 %v864_v28, %v832_v39 }
 0x121   : > { %v766_v3 = vadd.f32 1e-05, %v734_v40  ;;  %v765_v22 = vadd.f32 1e-05, %v733_v2  ;;  %v895_v0 = vmul.f32 %v863_v45, %v831_v20  ;;  %v6028_v47 = vmul.f32 0.0078125, %v495_v46 }
 0x122   : > { %v966_v61 = vpack.c.bf16 %v936_v54, %v935_v38  ;;  %v934_v15 = vadd.f32 %v6014_v56, %v896_v55  ;;  %v6030_v53 = vmul.f32 0.0078125, %v493_v48  ;;  %v870_v2 = vsub.f32 %v5799_v8, %v5988_v6 }
 0x123   : > { %4959 = vrsqrt.f32 %v766_v3  ;;  %v933_v62 = vadd.f32 %v6014_v56, %v895_v0  ;;  %v708_v5 = vmul.f32 %v6028_v47, %v6028_v47  ;;  %v869_v3 = vsub.f32 %v5802_v9, %v5990_v7 }
 0x124   : > { %4961 = vrsqrt.f32 %v765_v22  ;;  %1004 = vmatprep.subr.bf16.mxu0 %v966_v61  ;;  %v491_v1 = vpop.xlane.xlu1 %490  ;;  %v489_v21 = vpop.xlane.xlu0 %488  ;;  %v707_v12 = vmul.f32 %v6030_v53, %v6030_v53 }
 0x125   : > { %v6033_v63 = vmul.f32 0.0078125, %v491_v1  ;;  %v965_v4 = vpack.c.bf16 %v934_v15, %v933_v62  ;;  %v6039_v13 = vmul.f32 0.0078125, %v489_v21 }
 0x127   : > { %1005 = vmatpush1.bf16.msra.mxu0 %v965_v4  ;;  %v706_v20 = vmul.f32 %v6033_v63, %v6033_v63  ;;  %v705_v46 = vmul.f32 %v6039_v13, %v6039_v13  ;;  %v868_v4 = vsub.f32 %v5805_v10, %v5992_v14 }
 0x128   : > { %v624_v23 = vpop.xlane.xlu1 %623  ;;  %v622_v28 = vpop.xlane.xlu0 %621 }
 0x129   : > { %v4956_v37 = vpop.eup %4955  ;;  %v676_v38 = vmul.f32 0.0078125, %v624_v23  ;;  %v675_v39 = vmul.f32 0.0078125, %v622_v28 }
 0x12a   : > { %v4958_v40 = vpop.eup %4957  ;;  %v838_v45 = vmul.f32 %v4956_v37, %v6003_v31  ;;  %4479 = vmatmul.mubr.msk.bf16.vlgmr.msra.gmra.mrb[0].mxu0 %vm1000_vm0, %v6044_v32  ;;  %v867_v37 = vsub.f32 %v5808_v11, %v5998_v29 }
 0x12b   : > { %v740_v48 = vsub.f32 %v676_v38, %v708_v5  ;;  %v739_v54 = vsub.f32 %v675_v39, %v707_v12  ;;  %v837_v55 = vmul.f32 %v4958_v40, %v6003_v31  ;;  %1122 = vmatprep.mubr.bf16.mxu0 %v5530_v30 }
 0x12c   : > { %v620_v22 = vpop.xlane.xlu1 %619  ;;  %v618_v8 = vpop.xlane.xlu0 %617  ;;  %v902_v6 = vmul.f32 %v870_v2, %v838_v45 }
 0x12d   : > { %v4960_v61 = vpop.eup %4959  ;;  %v772_v0 = vadd.f32 1e-05, %v740_v48  ;;  %v771_v15 = vadd.f32 1e-05, %v739_v54  ;;  %v674_v1 = vmul.f32 0.0078125, %v620_v22  ;;  %v673_v21 = vmul.f32 0.0078125, %v618_v8 }
 0x12e   : > { %v4962_v62 = vpop.eup %4961  ;;  %v901_v5 = vmul.f32 %v869_v3, %v837_v55  ;;  %v940_v12 = vadd.f32 %v6014_v56, %v902_v6  ;;  %v836_v23 = vmul.f32 %v4960_v61, %v6003_v31 }
 0x12f   : > { %4963 = vrsqrt.f32 %v772_v0  ;;  %v738_v9 = vsub.f32 %v674_v1, %v706_v20  ;;  %v737_v7 = vsub.f32 %v673_v21, %v705_v46  ;;  %v835_v28 = vmul.f32 %v4962_v62, %v6003_v31 }
 0x130   : > { %4965 = vrsqrt.f32 %v771_v15  ;;  %v503_v38 = vpop.xlane.xlu1 %502  ;;  %v501_v39 = vpop.xlane.xlu0 %500  ;;  %v939_v40 = vadd.f32 %v6014_v56, %v901_v5  ;;  %v900_v2 = vmul.f32 %v868_v4, %v836_v23  ;;  %v874_v5 = vsub.f32 %v5823_v16, %v6028_v47 }
 0x131   : > { %v770_v10 = vadd.f32 1e-05, %v738_v9  ;;  %v769_v14 = vadd.f32 1e-05, %v737_v7  ;;  %v899_v48 = vmul.f32 %v867_v37, %v835_v28  ;;  %v6068_v20 = vmul.f32 0.0078125, %v503_v38 }
 0x132   : > { %v968_v45 = vpack.c.bf16 %v940_v12, %v939_v40  ;;  %v938_v54 = vadd.f32 %v6014_v56, %v900_v2  ;;  %v6070_v46 = vmul.f32 0.0078125, %v501_v39  ;;  %v873_v38 = vsub.f32 %v5826_v17, %v6030_v53 }
 0x133   : > { %4967 = vrsqrt.f32 %v770_v10  ;;  %v937_v55 = vadd.f32 %v6014_v56, %v899_v48  ;;  %v712_v8 = vmul.f32 %v6068_v20, %v6068_v20 }
 0x134   : > { %4969 = vrsqrt.f32 %v769_v14  ;;  %1047 = vmatprep.subr.bf16.mxu1 %v968_v45  ;;  %v499_v11 = vpop.xlane.xlu1 %498  ;;  %v497_v29 = vpop.xlane.xlu0 %496  ;;  %v711_v6 = vmul.f32 %v6070_v46, %v6070_v46 }
 0x135   : > { %v6073_v3 = vmul.f32 0.0078125, %v499_v11  ;;  %v967_v22 = vpack.c.bf16 %v938_v54, %v937_v55  ;;  %v6079_v61 = vmul.f32 0.0078125, %v497_v29  ;;  %v872_v54 = vsub.f32 %v5829_v18, %v6033_v63 }
 0x137   : > { %1048 = vmatpush1.bf16.msra.mxu1 %v967_v22  ;;  %v710_v12 = vmul.f32 %v6073_v3, %v6073_v3  ;;  %v709_v9 = vmul.f32 %v6079_v61, %v6079_v61 }
 0x138   : > { %v632_v0 = vpop.xlane.xlu1 %631  ;;  %v630_v15 = vpop.xlane.xlu0 %629 }
 0x139   : > { %v4964_v1 = vpop.eup %4963  ;;  %v680_v21 = vmul.f32 0.0078125, %v632_v0  ;;  %v679_v62 = vmul.f32 0.0078125, %v630_v15 }
 0x13a   : > { %v4966_v4 = vpop.eup %4965  ;;  %v842_v23 = vmul.f32 %v4964_v1, %v6003_v31  ;;  %4480 = vmatmul.mubr.msk.bf16.vlgmr.msra.gmra.mrb[0].mxu1 %vm1000_vm0, %v6044_v32 }
 0x13b   : > { %v744_v7 = vsub.f32 %v680_v21, %v712_v8  ;;  %v743_v28 = vsub.f32 %v679_v62, %v711_v6  ;;  %v841_v37 = vmul.f32 %v4966_v4, %v6003_v31  ;;  %1165 = vmatprep.mubr.bf16.mxu1 %v5530_v30  ;;  %v871_v8 = vsub.f32 %v5832_v19, %v6039_v13 }
 0x13c   : > { %v628_v39 = vpop.xlane.xlu1 %627  ;;  %v626_v16 = vpop.xlane.xlu0 %625  ;;  %v906_v47 = vmul.f32 %v874_v5, %v842_v23 }
 0x13d   : > { %v4968_v40 = vpop.eup %4967  ;;  %v776_v2 = vadd.f32 1e-05, %v744_v7  ;;  %v775_v10 = vadd.f32 1e-05, %v743_v28  ;;  %v678_v14 = vmul.f32 0.0078125, %v628_v39  ;;  %v677_v45 = vmul.f32 0.0078125, %v626_v16 }
 0x13e   : > { %v4970_v48 = vpop.eup %4969  ;;  %v905_v11 = vmul.f32 %v873_v38, %v841_v37  ;;  %v944_v29 = vadd.f32 %v6014_v56, %v906_v47  ;;  %v840_v55 = vmul.f32 %v4968_v40, %v6003_v31 }
 0x13f   : > { %4971 = vrsqrt.f32 %v776_v2  ;;  %v742_v17 = vsub.f32 %v678_v14, %v710_v12  ;;  %v741_v53 = vsub.f32 %v677_v45, %v709_v9  ;;  %v839_v22 = vmul.f32 %v4970_v48, %v6003_v31 }
 0x140   : > { %4973 = vrsqrt.f32 %v775_v10  ;;  %v511_v6 = vpop.xlane.xlu1 %510  ;;  %v509_v0 = vpop.xlane.xlu0 %508  ;;  %v943_v15 = vadd.f32 %v6014_v56, %v905_v11  ;;  %v904_v1 = vmul.f32 %v872_v54, %v840_v55  ;;  %v878_v14 = vsub.f32 %v5847_v24, %v6068_v20 }
 0x141   : > { %v774_v18 = vadd.f32 1e-05, %v742_v17  ;;  %v773_v63 = vadd.f32 1e-05, %v741_v53  ;;  %v903_v62 = vmul.f32 %v871_v8, %v839_v22  ;;  %v6103_v5 = vmul.f32 0.0078125, %v511_v6 }
 0x142   : > { %v970_v21 = vpack.c.bf16 %v944_v29, %v943_v15  ;;  %v942_v4 = vadd.f32 %v6014_v56, %v904_v1  ;;  %v6105_v12 = vmul.f32 0.0078125, %v509_v0  ;;  %v877_v17 = vsub.f32 %v5850_v25, %v6070_v46 }
 0x143   : > { %4975 = vrsqrt.f32 %v774_v18  ;;  %v941_v23 = vadd.f32 %v6014_v56, %v903_v62  ;;  %v716_v28 = vmul.f32 %v6103_v5, %v6103_v5  ;;  %v876_v18 = vsub.f32 %v5855_v26, %v6073_v3 }
 0x144   : > { %4977 = vrsqrt.f32 %v773_v63  ;;  %1090 = vmatprep.subr.bf16.mxu0 %v970_v21  ;;  %v507_v19 = vpop.xlane.xlu1 %506  ;;  %v505_v13 = vpop.xlane.xlu0 %504  ;;  %v715_v37 = vmul.f32 %v6105_v12, %v6105_v12 }
 0x145   : > { %v6108_v9 = vmul.f32 0.0078125, %v507_v19  ;;  %v969_v7 = vpack.c.bf16 %v942_v4, %v941_v23  ;;  %v6114_v38 = vmul.f32 0.0078125, %v505_v13  ;;  %v875_v19 = vsub.f32 %v5858_v27, %v6079_v61 }
 0x147   : > { %1091 = vmatpush1.bf16.msra.mxu0 %v969_v7  ;;  %v714_v45 = vmul.f32 %v6108_v9, %v6108_v9  ;;  %v713_v54 = vmul.f32 %v6114_v38, %v6114_v38 }
 0x148   : > { %v640_v39 = vpop.xlane.xlu1 %639  ;;  %v638_v16 = vpop.xlane.xlu0 %637 }
 0x149   : > { %v4972_v47 = vpop.eup %4971  ;;  %v684_v40 = vmul.f32 0.0078125, %v640_v39  ;;  %v683_v2 = vmul.f32 0.0078125, %v638_v16 }
 0x14a   : > { %v4974_v10 = vpop.eup %4973  ;;  %v846_v48 = vmul.f32 %v4972_v47, %v6003_v31  ;;  %4481 = vmatmul.mubr.msk.bf16.vlgmr.msra.gmra.mrb[4].mxu0 %vm1000_vm0, %v6044_v32 }
 0x14b   : > { %v748_v11 = vsub.f32 %v684_v40, %v716_v28  ;;  %v747_v29 = vsub.f32 %v683_v2, %v715_v37  ;;  %v845_v55 = vmul.f32 %v4974_v10, %v6003_v31  ;;  %1208 = vmatprep.mubr.bf16.mxu0 %v5530_v30 }
 0x14c   : > { %v636_v53 = vpop.xlane.xlu1 %635  ;;  %v634_v24 = vpop.xlane.xlu0 %633  ;;  %v910_v20 = vmul.f32 %v878_v14, %v846_v48 }
 0x14d   : > { %v4976_v22 = vpop.eup %4975  ;;  %v780_v8 = vadd.f32 1e-05, %v748_v11  ;;  %v779_v6 = vadd.f32 1e-05, %v747_v29  ;;  %v682_v0 = vmul.f32 0.0078125, %v636_v53  ;;  %v681_v15 = vmul.f32 0.0078125, %v634_v24 }
 0x14e   : > { %v4978_v1 = vpop.eup %4977  ;;  %v909_v63 = vmul.f32 %v877_v17, %v845_v55  ;;  %v948_v21 = vadd.f32 %v6014_v56, %v910_v20  ;;  %v844_v62 = vmul.f32 %v4976_v22, %v6003_v31  ;;  %v882_v20 = vsub.f32 %v5875_v33, %v6103_v5 }
 0x14f   : > { %4979 = vrsqrt.f32 %v780_v8  ;;  %v746_v25 = vsub.f32 %v682_v0, %v714_v45  ;;  %v745_v46 = vsub.f32 %v681_v15, %v713_v54  ;;  %v843_v4 = vmul.f32 %v4978_v1, %v6003_v31 }
 0x150   : > { %4981 = vrsqrt.f32 %v779_v6  ;;  %v519_v13 = vpop.xlane.xlu1 %518  ;;  %v517_v23 = vpop.xlane.xlu0 %516  ;;  %v947_v7 = vadd.f32 %v6014_v56, %v909_v63  ;;  %v908_v28 = vmul.f32 %v876_v18, %v844_v62  ;;  %v881_v18 = vsub.f32 %v5878_v34, %v6105_v12 }
 0x151   : > { %v778_v26 = vadd.f32 1e-05, %v746_v25  ;;  %v777_v3 = vadd.f32 1e-05, %v745_v46  ;;  %v907_v39 = vmul.f32 %v875_v19, %v843_v4  ;;  %v6138_v47 = vmul.f32 0.0078125, %v519_v13 }
 0x152   : > { %v972_v37 = vpack.c.bf16 %v948_v21, %v947_v7  ;;  %v946_v16 = vadd.f32 %v6014_v56, %v908_v28  ;;  %v6140_v40 = vmul.f32 0.0078125, %v517_v23  ;;  %v880_v13 = vsub.f32 %v5883_v35, %v6108_v9 }
 0x153   : > { %4983 = vrsqrt.f32 %v778_v26  ;;  %v945_v2 = vadd.f32 %v6014_v56, %v907_v39  ;;  %v720_v45 = vmul.f32 %v6138_v47, %v6138_v47 }
 0x154   : > { %4985 = vrsqrt.f32 %v777_v3  ;;  %1133 = vmatprep.subr.bf16.mxu1 %v972_v37  ;;  %v515_v27 = vpop.xlane.xlu1 %514  ;;  %v513_v61 = vpop.xlane.xlu0 %512  ;;  %v719_v48 = vmul.f32 %v6140_v40, %v6140_v40  ;;  %v879_v3 = vsub.f32 %v5886_v36, %v6114_v38 }
 0x155   : > { %v6143_v10 = vmul.f32 0.0078125, %v515_v27  ;;  %v971_v14 = vpack.c.bf16 %v946_v16, %v945_v2  ;;  %v6149_v54 = vmul.f32 0.0078125, %v513_v61 }
 0x157   : > { %1134 = vmatpush1.bf16.msra.mxu1 %v971_v14  ;;  %v718_v22 = vmul.f32 %v6143_v10, %v6143_v10  ;;  %v717_v6 = vmul.f32 %v6149_v54, %v6149_v54 }
 0x158   : > { %v648_v11 = vpop.xlane.xlu1 %647  ;;  %v646_v29 = vpop.xlane.xlu0 %645 }
 0x159   : > { %v4980_v55 = vpop.eup %4979  ;;  %v688_v17 = vmul.f32 0.0078125, %v648_v11  ;;  %v687_v53 = vmul.f32 0.0078125, %v646_v29 }
 0x15a   : > { %v4982_v24 = vpop.eup %4981  ;;  %v850_v8 = vmul.f32 %v4980_v55, %v6003_v31  ;;  %4482 = vmatmul.mubr.msk.bf16.vlgmr.msra.gmra.mrb[4].mxu1 %vm1000_vm0, %v6044_v32 }
 0x15b   : > { %v752_v0 = vsub.f32 %v688_v17, %v720_v45  ;;  %v751_v15 = vsub.f32 %v687_v53, %v719_v48  ;;  %v849_v1 = vmul.f32 %v4982_v24, %v6003_v31  ;;  %1251 = vmatprep.mubr.bf16.mxu1 %v5530_v30 }
 0x15c   : > { %v644_v63 = vpop.xlane.xlu1 %643  ;;  %v642_v33 = vpop.xlane.xlu0 %641  ;;  %v914_v5 = vmul.f32 %v882_v20, %v850_v8 }
 0x15d   : > { %v4984_v21 = vpop.eup %4983  ;;  %v784_v62 = vadd.f32 1e-05, %v752_v0  ;;  %v783_v25 = vadd.f32 1e-05, %v751_v15  ;;  %v686_v46 = vmul.f32 0.0078125, %v644_v63  ;;  %v685_v4 = vmul.f32 0.0078125, %v642_v33 }
 0x15e   : > { %v4986_v19 = vpop.eup %4985  ;;  %v913_v23 = vmul.f32 %v881_v18, %v849_v1  ;;  %v952_v7 = vadd.f32 %v6014_v56, %v914_v5  ;;  %v848_v28 = vmul.f32 %v4984_v21, %v6003_v31  ;;  %v886_v1 = vsub.f32 %v5899_v41, %v6138_v47 }
 0x15f   : > { %4987 = vrsqrt.f32 %v784_v62  ;;  %v750_v34 = vsub.f32 %v686_v46, %v718_v22  ;;  %v749_v12 = vsub.f32 %v685_v4, %v717_v6  ;;  %v847_v26 = vmul.f32 %v4986_v19, %v6003_v31 }
 0x160   : > { %4989 = vrsqrt.f32 %v783_v25  ;;  %v527_v37 = vpop.xlane.xlu1 %526  ;;  %v525_v39 = vpop.xlane.xlu0 %524  ;;  %v951_v16 = vadd.f32 %v6014_v56, %v913_v23  ;;  %v912_v27 = vmul.f32 %v880_v13, %v848_v28  ;;  %v885_v25 = vsub.f32 %v5902_v42, %v6140_v40 }
 0x161   : > { %v782_v35 = vadd.f32 1e-05, %v750_v34  ;;  %v781_v9 = vadd.f32 1e-05, %v749_v12  ;;  %v911_v2 = vmul.f32 %v879_v3, %v847_v26  ;;  %v6173_v45 = vmul.f32 0.0078125, %v527_v37 }
 0x162   : > { %v974_v61 = vpack.c.bf16 %v952_v7, %v951_v16  ;;  %v950_v14 = vadd.f32 %v6014_v56, %v912_v27  ;;  %v6175_v48 = vmul.f32 0.0078125, %v525_v39  ;;  %v884_v34 = vsub.f32 %v5907_v43, %v6143_v10 }
 0x163   : > { %4991 = vrsqrt.f32 %v782_v35  ;;  %v949_v11 = vadd.f32 %v6014_v56, %v911_v2  ;;  %v724_v17 = vmul.f32 %v6173_v45, %v6173_v45  ;;  %v883_v39 = vsub.f32 %v5910_v44, %v6149_v54 }
 0x164   : > { %4993 = vrsqrt.f32 %v781_v9  ;;  %1176 = vmatprep.subr.bf16.mxu0 %v974_v61  ;;  %v523_v36 = vpop.xlane.xlu1 %522  ;;  %v521_v38 = vpop.xlane.xlu0 %520  ;;  %v723_v53 = vmul.f32 %v6175_v48, %v6175_v48 }
 0x165   : > { %v6178_v29 = vmul.f32 0.0078125, %v523_v36  ;;  %v973_v55 = vpack.c.bf16 %v950_v14, %v949_v11  ;;  %v6184_v24 = vmul.f32 0.0078125, %v521_v38 }
 0x167   : > { %1177 = vmatpush1.bf16.msra.mxu0 %v973_v55  ;;  %v722_v18 = vmul.f32 %v6178_v29, %v6178_v29  ;;  %v721_v33 = vmul.f32 %v6184_v24, %v6184_v24 }
 0x168   : > { %v656_v20 = vpop.xlane.xlu1 %655  ;;  %v654_v22 = vpop.xlane.xlu0 %653 }
 0x169   : > { %v4988_v8 = vpop.eup %4987  ;;  %v692_v6 = vmul.f32 0.0078125, %v656_v20  ;;  %v691_v0 = vmul.f32 0.0078125, %v654_v22 }
 0x16a   : > { %v4990_v15 = vpop.eup %4989  ;;  %v854_v63 = vmul.f32 %v4988_v8, %v6003_v31  ;;  %4483 = vmatmul.mubr.msk.bf16.vlgmr.msra.gmra.mrb[8].mxu0 %vm1000_vm0, %v6044_v32 }
 0x16b   : > { %v756_v5 = vsub.f32 %v692_v6, %v724_v17  ;;  %v755_v21 = vsub.f32 %v691_v0, %v723_v53  ;;  %v853_v62 = vmul.f32 %v4990_v15, %v6003_v31  ;;  %1294 = vmatprep.mubr.bf16.mxu0 %v5530_v30 }
 0x16c   : > { %v652_v46 = vpop.xlane.xlu1 %651  ;;  %v650_v41 = vpop.xlane.xlu0 %649  ;;  %v918_v47 = vmul.f32 %v886_v1, %v854_v63  ;;  %v890_v63 = vsub.f32 %v5923_v49, %v6173_v45  ;;  %v888_v49 = vsub.f32 %v5931_v51, %v6178_v29 }
 0x16d   : > { %v4992_v4 = vpop.eup %4991  ;;  %v788_v19 = vadd.f32 1e-05, %v756_v5  ;;  %v787_v13 = vadd.f32 1e-05, %v755_v21  ;;  %v690_v23 = vmul.f32 0.0078125, %v652_v46  ;;  %v689_v7 = vmul.f32 0.0078125, %v650_v41 }
 0x16e   : > { %v4994_v28 = vpop.eup %4993  ;;  %v917_v12 = vmul.f32 %v885_v25, %v853_v62  ;;  %v956_v26 = vadd.f32 %v6014_v56, %v918_v47  ;;  %v852_v3 = vmul.f32 %v4992_v4, %v6003_v31  ;;  %v889_v41 = vsub.f32 %v5926_v50, %v6175_v48 }
 0x16f   : > { %4995 = vrsqrt.f32 %v788_v19  ;;  %v754_v42 = vsub.f32 %v690_v23, %v722_v18  ;;  %v753_v40 = vsub.f32 %v689_v7, %v721_v33  ;;  %v851_v37 = vmul.f32 %v4994_v28, %v6003_v31 }
 0x170   : > { %4997 = vrsqrt.f32 %v787_v13  ;;  %v535_v16 = vpop.xlane.xlu1 %534  ;;  %v533_v27 = vpop.xlane.xlu0 %532  ;;  %v955_v35 = vadd.f32 %v6014_v56, %v917_v12  ;;  %v916_v9 = vmul.f32 %v884_v34, %v852_v3  ;;  %v887_v12 = vsub.f32 %v5934_v52, %v6184_v24 }
 0x171   : > { %v786_v43 = vadd.f32 1e-05, %v754_v42  ;;  %v785_v10 = vadd.f32 1e-05, %v753_v40  ;;  %v915_v2 = vmul.f32 %v883_v39, %v851_v37  ;;  %v6208_v36 = vmul.f32 0.0078125, %v535_v16 }
 0x172   : > { %v976_v61 = vpack.c.bf16 %v956_v26, %v955_v35  ;;  %v954_v14 = vadd.f32 %v6014_v56, %v916_v9  ;;  %v6210_v38 = vmul.f32 0.0078125, %v533_v27 }
 0x173   : > { %4999 = vrsqrt.f32 %v786_v43  ;;  %v953_v11 = vadd.f32 %v6014_v56, %v915_v2  ;;  %v728_v53 = vmul.f32 %v6208_v36, %v6208_v36 }
 0x174   : > { %5001 = vrsqrt.f32 %v785_v10  ;;  %1219 = vmatprep.subr.bf16.mxu1 %v976_v61  ;;  %v531_v44 = vpop.xlane.xlu1 %530  ;;  %v529_v54 = vpop.xlane.xlu0 %528  ;;  %v727_v20 = vmul.f32 %v6210_v38, %v6210_v38  ;;  %v894_v10 = vsub.f32 %v5947_v57, %v6208_v36  ;;  %v893_v2 = vsub.f32 %v5950_v58, %v6210_v38 }
 0x175   : > { %v6213_v55 = vmul.f32 0.0078125, %v531_v44  ;;  %v975_v17 = vpack.c.bf16 %v954_v14, %v953_v11  ;;  %v6219_v22 = vmul.f32 0.0078125, %v529_v54 }
 0x177   : > { %1220 = vmatpush1.bf16.msra.mxu1 %v975_v17  ;;  %v726_v33 = vmul.f32 %v6213_v55, %v6213_v55  ;;  %v725_v21 = vmul.f32 %v6219_v22, %v6219_v22 }
 0x178   : > { %v664_v8 = vpop.xlane.xlu1 %663  ;;  %v662_v6 = vpop.xlane.xlu0 %661 }
 0x179   : > { %v4996_v0 = vpop.eup %4995  ;;  %v696_v15 = vmul.f32 0.0078125, %v664_v8  ;;  %v695_v1 = vmul.f32 0.0078125, %v662_v6 }
 0x17a   : > { %v4998_v18 = vpop.eup %4997  ;;  %v858_v5 = vmul.f32 %v4996_v0, %v6003_v31  ;;  %4484 = vmatmul.mubr.msk.bf16.vlgmr.msra.gmra.mrb[8].mxu1 %vm1000_vm0, %v6044_v32 }
 0x17b   : > { %v760_v62 = vsub.f32 %v696_v15, %v728_v53  ;;  %v759_v25 = vsub.f32 %v695_v1, %v727_v20  ;;  %v857_v46 = vmul.f32 %v4998_v18, %v6003_v31  ;;  %1337 = vmatprep.mubr.bf16.mxu1 %v5530_v30  ;;  %v892_v53 = vsub.f32 %v5955_v59, %v6213_v55 }
 0x17c   : > { %v660_v45 = vpop.xlane.xlu1 %659  ;;  %v658_v47 = vpop.xlane.xlu0 %657  ;;  %v922_v4 = vmul.f32 %v890_v63, %v858_v5  ;;  %v891_v20 = vsub.f32 %v5958_v60, %v6219_v22 }
 0x17d   : > { %v5000_v19 = vpop.eup %4999  ;;  %v792_v13 = vadd.f32 1e-05, %v760_v62  ;;  %v791_v23 = vadd.f32 1e-05, %v759_v25  ;;  %v694_v7 = vmul.f32 0.0078125, %v660_v45  ;;  %v693_v28 = vmul.f32 0.0078125, %v658_v47 }
 0x17e   : > { %v5002_v34 = vpop.eup %5001  ;;  %v921_v26 = vmul.f32 %v889_v41, %v857_v46  ;;  %v960_v50 = vadd.f32 %v6014_v56, %v922_v4  ;;  %v856_v48 = vmul.f32 %v5000_v19, %v6003_v31  ;;  %v5332_v62 = vld [vmem:[%s5764_s30 + $0x8] sm:$0xff]  ;;  %v5333_v46 = vld [vmem:[%s5764_s30 + $0x10] sm:$0xff]  ;;  %v5334_v47 = vld [vmem:[%s5764_s30 + $0x18] sm:$0xff] }
 0x17f   : > { %5003 = vrsqrt.f32 %v792_v13  ;;  %v758_v51 = vsub.f32 %v694_v7, %v726_v33  ;;  %v757_v29 = vsub.f32 %v693_v28, %v725_v21  ;;  %v855_v3 = vmul.f32 %v5002_v34, %v6003_v31  ;;  %v5331_v21 = vld [vmem:[%s5764_s30] sm:$0xff] }
 0x180   : > { %5005 = vrsqrt.f32 %v791_v23  ;;  %v959_v42 = vadd.f32 %v6014_v56, %v921_v26  ;;  %v920_v40 = vmul.f32 %v888_v49, %v856_v48  ;;  %v6268_v22 = vpop.permute.xlu1 %992  ;;  %v5335_v28 = vld [vmem:[%s5764_s30 + $0x20] sm:$0xff] }
 0x181   : > { %v790_v37 = vadd.f32 1e-05, %v758_v51  ;;  %v789_v39 = vadd.f32 1e-05, %v757_v29  ;;  %v919_v16 = vmul.f32 %v887_v12, %v855_v3  ;;  %v4869_v29 = vld [vmem:[#allocation5 + $0x4] ss:$16 sps:$4 sm:$0xff]  }
 0x182   : > { %v978_v27 = vpack.c.bf16 %v960_v50, %v959_v42  ;;  %v958_v52 = vadd.f32 %v6014_v56, %v920_v40  ;;  %v4872_v3 = vld [vmem:[#allocation5 + $0xc] ss:$16 sps:$4 sm:$0xff]   ;;  %v5336_v42 = vld [vmem:[%s5764_s30 + $0x30] sm:$0xff] }
 0x183   : > { %5007 = vrsqrt.f32 %v790_v37  ;;  %v957_v24 = vadd.f32 %v6014_v56, %v919_v16  ;;  %v4867_v16 = vld [vmem:[#allocation5] ss:$16 sps:$4 sm:$0xff]  }
 0x184   : > { %5009 = vrsqrt.f32 %v789_v39  ;;  %1262 = vmatprep.subr.bf16.mxu0 %v978_v27  ;;  %v6266_v60 = vpop.permute.xlu0 %987  ;;  %v4870_v27 = vld [vmem:[#allocation5 + $0x8] ss:$16 sps:$4 sm:$0xff]  }
 0x185   : > { %v977_v35 = vpack.c.bf16 %v958_v52, %v957_v24  ;;  %v4875_v52 = vld [vmem:[#allocation5 + $0x24] ss:$16 sps:$4 sm:$0xff]   ;;  %v4878_v24 = vld [vmem:[#allocation5 + $0x2c] ss:$16 sps:$4 sm:$0xff]  }
 0x187   : > { %1263 = vmatpush1.bf16.msra.mxu0 %v977_v35  ;;  %v5337_v35 = vld [vmem:[%s5764_s30 + $0x28] sm:$0xff] }
 0x188   : > { %2104 = vmatprep.subr.bf16.mxu0 %v4869_v29  ;;  %v5342_v29 = vld [vmem:[%s5764_s30 + $0x60] sm:$0xff] }
 0x189   : > { %v5004_v9 = vpop.eup %5003 }
 0x18a   : > { %v5006_v43 = vpop.eup %5005  ;;  %4485 = vmatmul.mubr.msk.bf16.vlgmr.msra.gmra.mrb[12].mxu0 %vm1000_vm0, %v6044_v32  ;;  %v862_v61 = vmul.f32 %v5004_v9, %v6003_v31 }
 0x18b   : > { %v861_v14 = vmul.f32 %v5006_v43, %v6003_v31  ;;  %2136 = vmatprep.mubr.bf16.mxu0 %v5530_v30  ;;  %2105 = vmatpush1.bf16.msra.mxu0 %v4867_v16  ;;  %v4908_v16 = vld [vmem:[#allocation5 + $0xcc] ss:$16 sps:$4 sm:$0xff]  }
 0x18c   : > { %v926_v44 = vmul.f32 %v894_v10, %v862_v61  ;;  %v4873_v10 = vld [vmem:[#allocation5 + $0x20] ss:$16 sps:$4 sm:$0xff]   ;;  %v4876_v61 = vld [vmem:[#allocation5 + $0x28] ss:$16 sps:$4 sm:$0xff]   ;;  %2106 = vmatprep.subr.bf16.mxu0 %v4875_v52 }
 0x18d   : > { %v5008_v54 = vpop.eup %5007  ;;  %v925_v11 = vmul.f32 %v893_v2, %v861_v14  ;;  %v4906_v52 = vld [vmem:[#allocation5 + $0xc8] ss:$16 sps:$4 sm:$0xff]  }
 0x18e   : > { %v5010_v17 = vpop.eup %5009  ;;  %v964_v57 = vadd.f32 %v6014_v56, %v926_v44  ;;  %v860_v36 = vmul.f32 %v5008_v54, %v6003_v31 }
 0x18f   : > { %v963_v58 = vadd.f32 %v6014_v56, %v925_v11  ;;  %v859_v38 = vmul.f32 %v5010_v17, %v6003_v31  ;;  %2107 = vmatpush1.bf16.msra.mxu0 %v4873_v10  ;;  %v4881_v11 = vld [vmem:[#allocation5 + $0x44] ss:$16 sps:$4 sm:$0xff]   ;;  %v4884_v17 = vld [vmem:[#allocation5 + $0x4c] ss:$16 sps:$4 sm:$0xff]  }
 0x190   : > { %v924_v8 = vmul.f32 %v892_v53, %v860_v36  ;;  %2108 = vmatprep.subr.bf16.mxu0 %v4881_v11 }
 0x191   : > { %v980_v6 = vpack.c.bf16 %v964_v57, %v963_v58  ;;  %v923_v0 = vmul.f32 %v891_v20, %v859_v38  ;;  %v5338_v57 = vld [vmem:[%s5764_s30 + $0x40] sm:$0xff] }
 0x192   : > { %v962_v15 = vadd.f32 %v6014_v56, %v924_v8  ;;  %v4879_v38 = vld [vmem:[#allocation5 + $0x40] ss:$16 sps:$4 sm:$0xff]   ;;  %v4882_v8 = vld [vmem:[#allocation5 + $0x48] ss:$16 sps:$4 sm:$0xff]  }
 0x193   : > { %1305 = vmatprep.subr.bf16.mxu1 %v980_v6  ;;  %v961_v59 = vadd.f32 %v6014_v56, %v923_v0  ;;  %2109 = vmatpush1.bf16.msra.mxu0 %v4879_v38  ;;  %v5339_v6 = vld [vmem:[%s5764_s30 + $0x38] sm:$0xff] }
 0x195   : > { %v979_v55 = vpack.c.bf16 %v962_v15, %v961_v59 }
 0x197   : > { %1306 = vmatpush1.bf16.msra.mxu1 %v979_v55  ;;  %v4887_v55 = vld [vmem:[#allocation5 + $0x64] ss:$16 sps:$4 sm:$0xff]  }
 0x198   : > { %2297 = vmatprep.subr.bf16.mxu1 %v4872_v3  ;;  %2110 = vmatprep.subr.bf16.mxu0 %v4887_v55  ;;  %v5346_v55 = vld [vmem:[%s5764_s30 + $0x80] sm:$0xff] }
 0x19a   : > { %4486 = vmatmul.mubr.msk.bf16.vlgmr.msra.gmra.mrb[12].mxu1 %vm1000_vm0, %v6044_v32 }
 0x19b   : > { %2329 = vmatprep.mubr.bf16.mxu1 %v5530_v30  ;;  %2298 = vmatpush1.bf16.msra.mxu1 %v4870_v27  ;;  %v4903_v27 = vld [vmem:[#allocation5 + $0xc0] ss:$16 sps:$4 sm:$0xff]  }
 0x19c   : > { %2299 = vmatprep.subr.bf16.mxu1 %v4878_v24  ;;  %v5343_v24 = vld [vmem:[%s5764_s30 + $0x58] sm:$0xff] }
 0x19f   : > { %2300 = vmatpush1.bf16.msra.mxu1 %v4876_v61  ;;  %v4911_v61 = vld [vmem:[#allocation5 + $0xe4] ss:$16 sps:$4 sm:$0xff]  }
 0x1a0   : > { %2301 = vmatprep.subr.bf16.mxu1 %v4884_v17 }
 0x1a3   : > { %2302 = vmatpush1.bf16.msra.mxu1 %v4882_v8 }
 0x1fd   : > { %v1038_v31 = vpop.f32.mrb[0].mxu0 }
 0x1fe   : > { %v1040_v1 = vpop.f32.mrb[1].mxu0  ;;  %v1039_v18 = vadd.f32 %v1038_v31, %v6266_v60  ;;  %v4890_v31 = vld [vmem:[#allocation5 + $0x6c] ss:$16 sps:$4 sm:$0xff]  }
 0x1ff   : > { %v1042_v63 = vpop.f32.mrb[2].mxu0  ;;  %v1041_v56 = vadd.f32 %v1040_v1, %v6266_v60  ;;  %v4885_v1 = vld [vmem:[#allocation5 + $0x60] ss:$16 sps:$4 sm:$0xff]   ;;  %2303 = vmatprep.subr.bf16.mxu1 %v4890_v31 }
 0x200   : > { %v1043_v33 = vadd.f32 %v1042_v63, %v6268_v22  ;;  %v1044_v5 = vpop.f32.mrb[3].mxu0  ;;  %v6274_v32 = vadd.f32 %v5331_v21, %v1039_v18  ;;  %v4888_v18 = vld [vmem:[#allocation5 + $0x68] ss:$16 sps:$4 sm:$0xff]   ;;  %v5340_v63 = vld [vmem:[%s5764_s30 + $0x50] sm:$0xff]  ;;  %2111 = vmatpush1.bf16.msra.mxu0 %v4885_v1 }
 0x201   : > { %v6281_v41 = vadd.f32 %v5333_v46, %v1041_v56  ;;  %v1045_v49 = vadd.f32 %v1044_v5, %v6268_v22  ;;  %2304 = vmatpush1.bf16.msra.mxu1 %v4888_v18  ;;  %v4893_v21 = vld [vmem:[#allocation5 + $0x84] ss:$16 sps:$4 sm:$0xff]   ;;  %v4891_v46 = vld [vmem:[#allocation5 + $0x80] ss:$16 sps:$4 sm:$0xff]  }
 0x202   : > { %8890 = vst [vmem:[#allocation14_spill] sm:$0xff] %v6274_v32  ;;  %v6277_v25 = vadd.f32 %v5332_v62, %v1043_v33  ;;  %1382 = vadd.xlane.f32.xlu1 %v6274_v32  ;;  %v1478_v45 = vmul.f32 %v6274_v32, %v6274_v32  ;;  %v4896_v62 = vld [vmem:[#allocation5 + $0x8c] ss:$16 sps:$4 sm:$0xff]   ;;  %2112 = vmatprep.subr.bf16.mxu0 %v4893_v21 }
 0x203   : > { %8892 = vst [vmem:[#allocation16_spill] sm:$0xff] %v6281_v41  ;;  %v6289_v4 = vadd.f32 %v5334_v47, %v1045_v49  ;;  %v1480_v51 = vmul.f32 %v6281_v41, %v6281_v41  ;;  %v4894_v49 = vld [vmem:[#allocation5 + $0x88] ss:$16 sps:$4 sm:$0xff]   ;;  %2305 = vmatprep.subr.bf16.mxu1 %v4896_v62  ;;  %v5348_v62 = vld [vmem:[%s5764_s30 + $0x90] sm:$0xff] }
 0x204   : > { %8891 = vst [vmem:[#allocation15_spill] sm:$0xff] %v6277_v25  ;;  %1384 = vadd.xlane.f32.xlu0 %v6277_v25  ;;  %v1479_v26 = vmul.f32 %v6277_v25, %v6277_v25  ;;  %2113 = vmatpush1.bf16.msra.mxu0 %v4891_v46 }
 0x205   : > { %8893 = vst [vmem:[#allocation17_spill] sm:$0xff] %v6289_v4  ;;  %v1481_v39 = vmul.f32 %v6289_v4, %v6289_v4  ;;  %2306 = vmatpush1.bf16.msra.mxu1 %v4894_v49 }
 0x206   : > { %1386 = vadd.xlane.f32.xlu1 %v6281_v41 }
 0x20a   : > { %1510 = vadd.xlane.f32.xlu1 %v1478_v45  ;;  %v5341_v45 = vld [vmem:[%s5764_s30 + $0x48] sm:$0xff] }
 0x20d   : > { %v1081_v19 = vpop.f32.mrb[0].mxu1 }
 0x20e   : > { %v1082_v13 = vadd.f32 %v1081_v19, %v6266_v60  ;;  %v1083_v23 = vpop.f32.mrb[1].mxu1  ;;  %1388 = vadd.xlane.f32.xlu1 %v6289_v4 }
 0x20f   : > { %v1085_v7 = vpop.f32.mrb[2].mxu1  ;;  %v1084_v50 = vadd.f32 %v1083_v23, %v6266_v60  ;;  %v4902_v23 = vld [vmem:[#allocation5 + $0xac] ss:$16 sps:$4 sm:$0xff]  }
 0x210   : > { %v6294_v34 = vadd.f32 %v5335_v28, %v1082_v13  ;;  %v1087_v12 = vpop.f32.mrb[3].mxu1  ;;  %v1086_v37 = vadd.f32 %v1085_v7, %v6268_v22  ;;  %v4899_v13 = vld [vmem:[#allocation5 + $0xa4] ss:$16 sps:$4 sm:$0xff]   ;;  %v4897_v28 = vld [vmem:[#allocation5 + $0xa0] ss:$16 sps:$4 sm:$0xff]   ;;  %2307 = vmatprep.subr.bf16.mxu1 %v4902_v23 }
 0x211   : > { %v6305_v40 = vadd.f32 %v5336_v42, %v1084_v50  ;;  %v1088_v53 = vadd.f32 %v1087_v12, %v6268_v22  ;;  %v4900_v12 = vld [vmem:[#allocation5 + $0xa8] ss:$16 sps:$4 sm:$0xff]   ;;  %2114 = vmatprep.subr.bf16.mxu0 %v4899_v13 }
 0x212   : > { %8894 = vst [vmem:[#allocation18_spill] sm:$0xff] %v6294_v34  ;;  %1390 = vadd.xlane.f32.xlu0 %v6294_v34  ;;  %1512 = vadd.xlane.f32.xlu1 %v1479_v26  ;;  %v1482_v48 = vmul.f32 %v6294_v34, %v6294_v34  ;;  %v6312_v9 = vadd.f32 %v5337_v35, %v1086_v37 }
 0x213   : > { %8895 = vst [vmem:[#allocation19_spill] sm:$0xff] %v6305_v40  ;;  %v1484_v43 = vmul.f32 %v6305_v40, %v6305_v40  ;;  %v6326_v0 = vadd.f32 %v5339_v6, %v1088_v53  ;;  %2115 = vmatpush1.bf16.msra.mxu0 %v4897_v28  ;;  %2308 = vmatpush1.bf16.msra.mxu1 %v4900_v12 }
 0x214   : > { %8896 = vst [vmem:[#allocation20_spill] sm:$0xff] %v6312_v9  ;;  %v1483_v58 = vmul.f32 %v6312_v9, %v6312_v9  ;;  %2309 = vmatprep.subr.bf16.mxu1 %v4908_v16 }
 0x215   : > { %8898 = vst [vmem:[#allocation22_spill] sm:$0xff] %v6326_v0  ;;  %v1485_v5 = vmul.f32 %v6326_v0, %v6326_v0 }
 0x216   : > { %1518 = vadd.xlane.f32.xlu0 %v1482_v48  ;;  %1514 = vadd.xlane.f32.xlu1 %v1480_v51 }
 0x217   : > { %2310 = vmatpush1.bf16.msra.mxu1 %v4906_v52  ;;  %v5352_v52 = vld [vmem:[%s5764_s30 + $0xb0] sm:$0xff] }
 0x21a   : > { %1394 = vadd.xlane.f32.xlu0 %v6305_v40  ;;  %1516 = vadd.xlane.f32.xlu1 %v1481_v39  ;;  %v4905_v39 = vld [vmem:[#allocation5 + $0xc4] ss:$16 sps:$4 sm:$0xff]  }
 0x21b   : > { %2116 = vmatprep.subr.bf16.mxu0 %v4905_v39 }
 0x21c   : > { %2117 = vmatpush1.bf16.msra.mxu0 %v4903_v27 }
 0x21d   : > { %v1124_v2 = vpop.f32.mrb[4].mxu0  ;;  %2118 = vmatprep.subr.bf16.mxu0 %v4911_v61  ;;  %v5353_v61 = vld [vmem:[%s5764_s30 + $0xa8] sm:$0xff] }
 0x21e   : > { %v1125_v14 = vadd.f32 %v1124_v2, %v6266_v60  ;;  %v1126_v44 = vpop.f32.mrb[5].mxu0  ;;  %1522 = vadd.xlane.f32.xlu0 %v1484_v43  ;;  %1392 = vadd.xlane.f32.xlu1 %v6312_v9  ;;  %v4914_v2 = vld [vmem:[#allocation5 + $0xec] ss:$16 sps:$4 sm:$0xff]  }
 0x21f   : > { %v1128_v54 = vpop.f32.mrb[6].mxu0  ;;  %v1127_v15 = vadd.f32 %v1126_v44, %v6266_v60  ;;  %v4912_v44 = vld [vmem:[#allocation5 + $0xe8] ss:$16 sps:$4 sm:$0xff]   ;;  %2311 = vmatprep.subr.bf16.mxu1 %v4914_v2 }
 0x220   : > { %v6320_v36 = vadd.f32 %v5338_v57, %v1125_v14  ;;  %v1130_v20 = vpop.f32.mrb[7].mxu0  ;;  %v1129_v33 = vadd.f32 %v1128_v54, %v6268_v22  ;;  %v4909_v14 = vld [vmem:[#allocation5 + $0xe0] ss:$16 sps:$4 sm:$0xff]   ;;  %2312 = vmatpush1.bf16.msra.mxu1 %v4912_v44  ;;  %v5345_v57 = vld [vmem:[%s5764_s30 + $0x68] sm:$0xff] }
 0x221   : > { %v6333_v56 = vadd.f32 %v5340_v63, %v1127_v15  ;;  %v1131_v51 = vadd.f32 %v1130_v20, %v6268_v22  ;;  %v5344_v54 = vld [vmem:[%s5764_s30 + $0x70] sm:$0xff]  ;;  %2119 = vmatpush1.bf16.msra.mxu0 %v4909_v14  ;;  %v5347_v63 = vld [vmem:[%s5764_s30 + $0x78] sm:$0xff] }
 0x222   : > { %8897 = vst [vmem:[#allocation21_spill] sm:$0xff] %v6320_v36  ;;  %1398 = vadd.xlane.f32.xlu0 %v6320_v36  ;;  %1520 = vadd.xlane.f32.xlu1 %v1483_v58  ;;  %v1486_v59 = vmul.f32 %v6320_v36, %v6320_v36  ;;  %v6340_v47 = vadd.f32 %v5341_v45, %v1129_v33 }
 0x223   : > { %8899 = vst [vmem:[#allocation23_spill] sm:$0xff] %v6333_v56  ;;  %v1488_v19 = vmul.f32 %v6333_v56, %v6333_v56  ;;  %v6354_v35 = vadd.f32 %v5343_v24, %v1131_v51 }
 0x224   : > { %8900 = vst [vmem:[#allocation24_spill] sm:$0xff] %v6340_v47  ;;  %v1487_v37 = vmul.f32 %v6340_v47, %v6340_v47 }
 0x225   : > { %8902 = vst [vmem:[#allocation26_spill] sm:$0xff] %v6354_v35  ;;  %v1489_v53 = vmul.f32 %v6354_v35, %v6354_v35 }
 0x226   : > { %1526 = vadd.xlane.f32.xlu0 %v1486_v59  ;;  %1396 = vadd.xlane.f32.xlu1 %v6326_v0 }
 0x22a   : > { %1402 = vadd.xlane.f32.xlu0 %v6333_v56  ;;  %1524 = vadd.xlane.f32.xlu1 %v1485_v5 }
 0x22d   : > { %v1167_v7 = vpop.f32.mrb[4].mxu1 }
 0x22e   : > { %v1168_v26 = vadd.f32 %v1167_v7, %v6266_v60  ;;  %v1169_v50 = vpop.f32.mrb[5].mxu1  ;;  %1530 = vadd.xlane.f32.xlu0 %v1488_v19  ;;  %1400 = vadd.xlane.f32.xlu1 %v6340_v47  ;;  %v5349_v19 = vld [vmem:[%s5764_s30 + $0x88] sm:$0xff] }
 0x22f   : > { %v1171_v48 = vpop.f32.mrb[6].mxu1  ;;  %v1170_v43 = vadd.f32 %v1169_v50, %v6266_v60 }
 0x230   : > { %v6348_v3 = vadd.f32 %v5342_v29, %v1168_v26  ;;  %v1173_v42 = vpop.f32.mrb[7].mxu1  ;;  %v1172_v17 = vadd.f32 %v1171_v48, %v6268_v22  ;;  %v5350_v48 = vld [vmem:[%s5764_s30 + $0xa0] sm:$0xff] }
 0x231   : > { %v6361_v11 = vadd.f32 %v5344_v54, %v1170_v43  ;;  %v1174_v59 = vadd.f32 %v1173_v42, %v6268_v22 }
 0x232   : > { %8901 = vst [vmem:[#allocation25_spill] sm:$0xff] %v6348_v3  ;;  %1406 = vadd.xlane.f32.xlu0 %v6348_v3  ;;  %1528 = vadd.xlane.f32.xlu1 %v1487_v37  ;;  %v1490_v10 = vmul.f32 %v6348_v3, %v6348_v3  ;;  %v6368_v20 = vadd.f32 %v5345_v57, %v1172_v17  ;;  %v5351_v37 = vld [vmem:[%s5764_s30 + $0x98] sm:$0xff]  ;;  %v5354_v57 = vld [vmem:[%s5764_s30 + $0xc0] sm:$0xff] }
 0x233   : > { %8903 = vst [vmem:[#allocation27_spill] sm:$0xff] %v6361_v11  ;;  %v1492_v58 = vmul.f32 %v6361_v11, %v6361_v11  ;;  %v6382_v33 = vadd.f32 %v5347_v63, %v1174_v59 }
 0x234   : > { %8904 = vst [vmem:[#allocation28_spill] sm:$0xff] %v6368_v20  ;;  %v1491_v18 = vmul.f32 %v6368_v20, %v6368_v20 }
 0x235   : > { %8906 = vst [vmem:[#allocation30_spill] sm:$0xff] %v6382_v33  ;;  %v1493_v45 = vmul.f32 %v6382_v33, %v6382_v33 }
 0x236   : > { %1534 = vadd.xlane.f32.xlu0 %v1490_v10  ;;  %1404 = vadd.xlane.f32.xlu1 %v6354_v35 }
 0x23a   : > { %1410 = vadd.xlane.f32.xlu0 %v6361_v11  ;;  %1532 = vadd.xlane.f32.xlu1 %v1489_v53 }
 0x23d   : > { %v1210_v38 = vpop.f32.mrb[8].mxu0 }
 0x23e   : > { %v1211_v8 = vadd.f32 %v1210_v38, %v6266_v60  ;;  %v1212_v6 = vpop.f32.mrb[9].mxu0  ;;  %1538 = vadd.xlane.f32.xlu0 %v1492_v58  ;;  %1408 = vadd.xlane.f32.xlu1 %v6368_v20 }
 0x23f   : > { %v1214_v15 = vpop.f32.mrb[10].mxu0  ;;  %v1213_v5 = vadd.f32 %v1212_v6, %v6266_v60 }
 0x240   : > { %v6376_v31 = vadd.f32 %v5346_v55, %v1211_v8  ;;  %v1216_v1 = vpop.f32.mrb[11].mxu0  ;;  %v1215_v49 = vadd.f32 %v1214_v15, %v6268_v22  ;;  %v5355_v15 = vld [vmem:[%s5764_s30 + $0xb8] sm:$0xff] }
 0x241   : > { %v6389_v46 = vadd.f32 %v5348_v62, %v1213_v5  ;;  %v1217_v50 = vadd.f32 %v1216_v1, %v6268_v22  ;;  %v5357_v62 = vld [vmem:[%s5764_s30 + $0xc8] sm:$0xff] }
 0x242   : > { %8905 = vst [vmem:[#allocation29_spill] sm:$0xff] %v6376_v31  ;;  %1414 = vadd.xlane.f32.xlu0 %v6376_v31  ;;  %1536 = vadd.xlane.f32.xlu1 %v1491_v18  ;;  %v1494_v21 = vmul.f32 %v6376_v31, %v6376_v31  ;;  %v6396_v13 = vadd.f32 %v5349_v19, %v1215_v49  ;;  %v5356_v18 = vld [vmem:[%s5764_s30 + $0xd0] sm:$0xff] }
 0x243   : > { %8907 = vst [vmem:[#allocation31_spill] sm:$0xff] %v6389_v46  ;;  %v1496_v23 = vmul.f32 %v6389_v46, %v6389_v46  ;;  %v6410_v39 = vadd.f32 %v5351_v37, %v1217_v50 }
 0x244   : > { %8908 = vst [vmem:[#allocation32_spill] sm:$0xff] %v6396_v13  ;;  %v1495_v42 = vmul.f32 %v6396_v13, %v6396_v13 }
 0x245   : > { %8910 = vst [vmem:[#allocation34_spill] sm:$0xff] %v6410_v39  ;;  %v1497_v10 = vmul.f32 %v6410_v39, %v6410_v39 }
 0x246   : > { %1542 = vadd.xlane.f32.xlu0 %v1494_v21  ;;  %1412 = vadd.xlane.f32.xlu1 %v6382_v33 }
 0x24a   : > { %1418 = vadd.xlane.f32.xlu0 %v6389_v46  ;;  %1540 = vadd.xlane.f32.xlu1 %v1493_v45 }
 0x24d   : > { %v1253_v7 = vpop.f32.mrb[8].mxu1 }
 0x24e   : > { %v1254_v28 = vadd.f32 %v1253_v7, %v6266_v60  ;;  %v1255_v12 = vpop.f32.mrb[9].mxu1  ;;  %1546 = vadd.xlane.f32.xlu0 %v1496_v23  ;;  %1416 = vadd.xlane.f32.xlu1 %v6396_v13 }
 0x24f   : > { %v1257_v26 = vpop.f32.mrb[10].mxu1  ;;  %v1256_v16 = vadd.f32 %v1255_v12, %v6266_v60  ;;  %v5358_v12 = vld [vmem:[%s5764_s30 + $0xe0] sm:$0xff] }
 0x250   : > { %v6404_v51 = vadd.f32 %v5350_v48, %v1254_v28  ;;  %v1259_v29 = vpop.f32.mrb[11].mxu1  ;;  %v1258_v43 = vadd.f32 %v1257_v26, %v6268_v22 }
 0x251   : > { %v6417_v24 = vadd.f32 %v5352_v52, %v1256_v16  ;;  %v1260_v8 = vadd.f32 %v1259_v29, %v6268_v22  ;;  %v5360_v52 = vld [vmem:[%s5764_s30 + $0xf0] sm:$0xff] }
 0x252   : > { %8909 = vst [vmem:[#allocation33_spill] sm:$0xff] %v6404_v51  ;;  %1422 = vadd.xlane.f32.xlu0 %v6404_v51  ;;  %1544 = vadd.xlane.f32.xlu1 %v1495_v42  ;;  %v1498_v27 = vmul.f32 %v6404_v51, %v6404_v51  ;;  %v6424_v2 = vadd.f32 %v5353_v61, %v1258_v43  ;;  %v5359_v42 = vld [vmem:[%s5764_s30 + $0xd8] sm:$0xff] }
 0x253   : > { %8911 = vst [vmem:[#allocation35_spill] sm:$0xff] %v6417_v24  ;;  %v1500_v44 = vmul.f32 %v6417_v24, %v6417_v24  ;;  %v6438_v59 = vadd.f32 %v5355_v15, %v1260_v8 }
 0x254   : > { %8912 = vst [vmem:[#allocation36_spill] sm:$0xff] %v6424_v2  ;;  %v1499_v6 = vmul.f32 %v6424_v2, %v6424_v2 }
 0x255   : > { %8914 = vst [vmem:[#allocation38_spill] sm:$0xff] %v6438_v59  ;;  %v1501_v21 = vmul.f32 %v6438_v59, %v6438_v59 }
 0x256   : > { %1550 = vadd.xlane.f32.xlu0 %v1498_v27  ;;  %1420 = vadd.xlane.f32.xlu1 %v6410_v39 }
 0x25a   : > { %1426 = vadd.xlane.f32.xlu0 %v6417_v24  ;;  %1548 = vadd.xlane.f32.xlu1 %v1497_v10 }
 0x25d   : > { %v1296_v14 = vpop.f32.mrb[12].mxu0 }
 0x25e   : > { %v1297_v54 = vadd.f32 %v1296_v14, %v6266_v60  ;;  %v1298_v17 = vpop.f32.mrb[13].mxu0  ;;  %1554 = vadd.xlane.f32.xlu0 %v1500_v44  ;;  %1424 = vadd.xlane.f32.xlu1 %v6424_v2  ;;  %v5361_v14 = vld [vmem:[%s5764_s30 + $0xe8] sm:$0xff] }
 0x25f   : > { %v1300_v53 = vpop.f32.mrb[14].mxu0  ;;  %v1299_v55 = vadd.f32 %v1298_v17, %v6266_v60 }
 0x260   : > { %v6431_v58 = vadd.f32 %v5354_v57, %v1297_v54  ;;  %v1302_v38 = vpop.f32.mrb[15].mxu0  ;;  %v1301_v5 = vadd.f32 %v1300_v53, %v6268_v22  ;;  %v5362_v53 = vld [vmem:[%s5764_s30 + $0xf8] sm:$0xff] }
 0x261   : > { %v6445_v63 = vadd.f32 %v5356_v18, %v1299_v55  ;;  %v1303_v48 = vadd.f32 %v1302_v38, %v6268_v22 }
 0x262   : > { %8913 = vst [vmem:[#allocation37_spill] sm:$0xff] %v6431_v58  ;;  %1430 = vadd.xlane.f32.xlu0 %v6431_v58  ;;  %1552 = vadd.xlane.f32.xlu1 %v1499_v6  ;;  %v1502_v1 = vmul.f32 %v6431_v58, %v6431_v58  ;;  %v6452_v49 = vadd.f32 %v5357_v62, %v1301_v5 }
 0x263   : > { %8915 = vst [vmem:[#allocation39_spill] sm:$0xff] %v6445_v63  ;;  %v1504_v19 = vmul.f32 %v6445_v63, %v6445_v63  ;;  %v6466_v37 = vadd.f32 %v5359_v42, %v1303_v48 }
 0x264   : > { %8916 = vst [vmem:[#allocation40_spill] sm:$0xff] %v6452_v49  ;;  %v1503_v29 = vmul.f32 %v6452_v49, %v6452_v49 }
 0x265   : > { %8918 = vst [vmem:[#allocation42_spill] sm:$0xff] %v6466_v37  ;;  %v1505_v61 = vmul.f32 %v6466_v37, %v6466_v37 }
 0x266   : > { %1558 = vadd.xlane.f32.xlu0 %v1502_v1  ;;  %1428 = vadd.xlane.f32.xlu1 %v6438_v59 }
 0x26a   : > { %1434 = vadd.xlane.f32.xlu0 %v6445_v63  ;;  %1556 = vadd.xlane.f32.xlu1 %v1501_v21 }
 0x26d   : > { %v1339_v45 = vpop.f32.mrb[12].mxu1 }
 0x26e   : > { %v1340_v23 = vadd.f32 %v1339_v45, %v6266_v60  ;;  %v1341_v7 = vpop.f32.mrb[13].mxu1  ;;  %1562 = vadd.xlane.f32.xlu0 %v1504_v19  ;;  %1432 = vadd.xlane.f32.xlu1 %v6452_v49 }
 0x26f   : > { %v1343_v28 = vpop.f32.mrb[14].mxu1  ;;  %v1342_v16 = vadd.f32 %v1341_v7, %v6266_v60 }
 0x270   : > { %v6459_v26 = vadd.f32 %v5358_v12, %v1340_v23  ;;  %v1345_v50 = vpop.f32.mrb[15].mxu1  ;;  %v1344_v10 = vadd.f32 %v1343_v28, %v6268_v22 }
 0x271   : > { %v6473_v43 = vadd.f32 %v5360_v52, %v1342_v16  ;;  %v1346_v54 = vadd.f32 %v1345_v50, %v6268_v22 }
 0x272   : > { %8917 = vst [vmem:[#allocation41_spill] sm:$0xff] %v6459_v26  ;;  %1438 = vadd.xlane.f32.xlu0 %v6459_v26  ;;  %1560 = vadd.xlane.f32.xlu1 %v1503_v29  ;;  %v1506_v27 = vmul.f32 %v6459_v26, %v6459_v26  ;;  %v6480_v60 = vadd.f32 %v5361_v14, %v1344_v10 }
 0x273   : > { %8919 = vst [vmem:[#allocation43_spill] sm:$0xff] %v6473_v43  ;;  %v1508_v44 = vmul.f32 %v6473_v43, %v6473_v43  ;;  %v6489_v57 = vadd.f32 %v5362_v53, %v1346_v54 }
 0x274   : > { %8920 = vst [vmem:[#allocation44_spill] sm:$0xff] %v6480_v60  ;;  %v1507_v17 = vmul.f32 %v6480_v60, %v6480_v60 }
 0x275   : > { %8921 = vst [vmem:[#allocation45_spill] sm:$0xff] %v6489_v57  ;;  %v1509_v38 = vmul.f32 %v6489_v57, %v6489_v57 }
 0x276   : > { %1566 = vadd.xlane.f32.xlu0 %v1506_v27  ;;  %1436 = vadd.xlane.f32.xlu1 %v6466_v37 }
 0x27a   : > { %1442 = vadd.xlane.f32.xlu0 %v6473_v43  ;;  %1564 = vadd.xlane.f32.xlu1 %v1505_v61 }
 0x27e   : > { %1570 = vadd.xlane.f32.xlu0 %v1508_v44  ;;  %1440 = vadd.xlane.f32.xlu1 %v6480_v60 }
 0x282   : > { %1568 = vadd.xlane.f32.xlu1 %v1507_v17 }
 0x286   : > { %1444 = vadd.xlane.f32.xlu1 %v6489_v57 }
 0x28a   : > { %1572 = vadd.xlane.f32.xlu1 %v1509_v38 }
 0x28f   : > { %v1383_v8 = vpop.xlane.xlu1 %1382 }
 0x290   : > { %v1446_v15 = vmul.f32 0.0078125, %v1383_v8 }
 0x291   : > { %v1385_v22 = vpop.xlane.xlu0 %1384 }
 0x292   : > { %v1606_v1 = vmul.f32 %v1446_v15, %v1446_v15  ;;  %v1447_v62 = vmul.f32 0.0078125, %v1385_v22 }
 0x293   : > { %v1387_v6 = vpop.xlane.xlu1 %1386 }
 0x294   : > { %v6494_v19 = vmul.f32 0.0078125, %v1387_v6  ;;  %v1607_v28 = vmul.f32 %v1447_v62, %v1447_v62 }
 0x296   : > { %v1608_v29 = vmul.f32 %v6494_v19, %v6494_v19 }
 0x297   : > { %v1511_v55 = vpop.xlane.xlu1 %1510 }
 0x298   : > { %v1574_v18 = vmul.f32 0.0078125, %v1511_v55  ;;  %v4915_v55 = vld [vmem:[#allocation7 + $0x40] sm:$0xff]  }
 0x299   : > { %4564 = vmatprep.subr.bf16.mxu0 %v4915_v55 }
 0x29a   : > { %v1638_v5 = vsub.f32 %v1574_v18, %v1606_v1 }
 0x29b   : > { %v1389_v21 = vpop.xlane.xlu1 %1388 }
 0x29c   : > { %v1670_v45 = vadd.f32 1e-05, %v1638_v5  ;;  %v6500_v27 = vmul.f32 0.0078125, %v1389_v21  ;;  %v6511_v5 = vld [vmem:[%s8744_s5] ss:$0 sm:$0xff] }
 0x29e   : > { %5011 = vrsqrt.f32 %v1670_v45  ;;  %v1609_v53 = vmul.f32 %v6500_v27, %v6500_v27 }
 0x29f   : > { %v1513_v23 = vpop.xlane.xlu1 %1512  ;;  %v1391_v7 = vpop.xlane.xlu0 %1390 }
 0x2a0   : > { %v1575_v12 = vmul.f32 0.0078125, %v1513_v23  ;;  %v6496_v48 = vmul.f32 0.0078125, %v1391_v7 }
 0x2a2   : > { %v1639_v50 = vsub.f32 %v1575_v12, %v1607_v28  ;;  %v1610_v14 = vmul.f32 %v6496_v48, %v6496_v48 }
 0x2a3   : > { %v1515_v42 = vpop.xlane.xlu1 %1514  ;;  %v1519_v16 = vpop.xlane.xlu0 %1518 }
 0x2a4   : > { %v1671_v52 = vadd.f32 1e-05, %v1639_v50  ;;  %v1576_v10 = vmul.f32 0.0078125, %v1515_v42  ;;  %v1578_v61 = vmul.f32 0.0078125, %v1519_v16  ;;  %v1772_v42 = vsub.f32 %v6274_v32, %v1446_v15  ;;  %v6528_v15 = vld [vmem:[%s8745_s6] ss:$0 sm:$0xff] }
 0x2a6   : > { %5013 = vrsqrt.f32 %v1671_v52  ;;  %v1640_v44 = vsub.f32 %v1576_v10, %v1608_v29  ;;  %v1642_v8 = vsub.f32 %v1578_v61, %v1610_v14 }
 0x2a7   : > { %v1517_v54 = vpop.xlane.xlu1 %1516  ;;  %v1395_v17 = vpop.xlane.xlu0 %1394 }
 0x2a8   : > { %v1672_v38 = vadd.f32 1e-05, %v1640_v44  ;;  %v1577_v6 = vmul.f32 0.0078125, %v1517_v54  ;;  %v5012_v1 = vpop.eup %5011  ;;  %v6506_v22 = vmul.f32 0.0078125, %v1395_v17  ;;  %v1674_v23 = vadd.f32 1e-05, %v1642_v8 }
 0x2a9   : > { %v1740_v50 = vmul.f32 %v5012_v1, %v6511_v5  ;;  %v1773_v54 = vsub.f32 %v6277_v25, %v1447_v62 }
 0x2aa   : > { %5015 = vrsqrt.f32 %v1672_v38  ;;  %v1641_v18 = vsub.f32 %v1577_v6, %v1609_v53  ;;  %v1612_v29 = vmul.f32 %v6506_v22, %v6506_v22  ;;  %v4917_v38 = vld [vmem:[#allocation7 + $0xc0] sm:$0xff]  }
 0x2ab   : > { %v1393_v21 = vpop.xlane.xlu1 %1392  ;;  %v1523_v45 = vpop.xlane.xlu0 %1522  ;;  %v1804_v53 = vmul.f32 %v1772_v42, %v1740_v50  ;;  %4676 = vmatprep.subr.bf16.mxu1 %v4917_v38 }
 0x2ac   : > { %v1673_v7 = vadd.f32 1e-05, %v1641_v18  ;;  %v6513_v28 = vmul.f32 0.0078125, %v1393_v21  ;;  %v1580_v12 = vmul.f32 0.0078125, %v1523_v45 }
 0x2ae   : > { %5017 = vrsqrt.f32 %v1673_v7  ;;  %v1611_v61 = vmul.f32 %v6513_v28, %v6513_v28  ;;  %v1644_v14 = vsub.f32 %v1580_v12, %v1612_v29  ;;  %v1842_v12 = vadd.f32 %v6528_v15, %v1804_v53 }
 0x2af   : > { %v1521_v16 = vpop.xlane.xlu1 %1520  ;;  %v1399_v52 = vpop.xlane.xlu0 %1398  ;;  %5019 = vrsqrt.f32 %v1674_v23 }
 0x2b0   : > { %v5014_v10 = vpop.eup %5013  ;;  %v1579_v44 = vmul.f32 0.0078125, %v1521_v16  ;;  %v6523_v6 = vmul.f32 0.0078125, %v1399_v52  ;;  %v1676_v45 = vadd.f32 1e-05, %v1644_v14  ;;  %v1774_v16 = vsub.f32 %v6281_v41, %v6494_v19  ;;  %v4916_v14 = vld [vmem:[#allocation7] sm:$0xff]  }
 0x2b1   : > { %v1741_v17 = vmul.f32 %v5014_v10, %v6511_v5 }
 0x2b2   : > { %v1643_v8 = vsub.f32 %v1579_v44, %v1611_v61  ;;  %v1614_v42 = vmul.f32 %v6523_v6, %v6523_v6  ;;  %v4918_v44 = vld [vmem:[#allocation7 + $0x80] sm:$0xff]  }
 0x2b3   : > { %v1397_v55 = vpop.xlane.xlu1 %1396  ;;  %v1527_v1 = vpop.xlane.xlu0 %1526  ;;  %v1805_v18 = vmul.f32 %v1773_v54, %v1741_v17 }
 0x2b4   : > { %v5016_v21 = vpop.eup %5015  ;;  %v1675_v23 = vadd.f32 1e-05, %v1643_v8  ;;  %v6530_v62 = vmul.f32 0.0078125, %v1397_v55  ;;  %v1582_v7 = vmul.f32 0.0078125, %v1527_v1  ;;  %v4919_v8 = vld [vmem:[#allocation7 + $0x48] sm:$0xff]   ;;  %v1775_v1 = vsub.f32 %v6289_v4, %v6500_v27 }
 0x2b5   : > { %v1843_v50 = vadd.f32 %v6528_v15, %v1805_v18  ;;  %v1742_v29 = vmul.f32 %v5016_v21, %v6511_v5  ;;  %v4921_v55 = vld [vmem:[#allocation7 + $0xc8] sm:$0xff]  }
 0x2b6   : > { %5021 = vrsqrt.f32 %v1675_v23  ;;  %v1613_v17 = vmul.f32 %v6530_v62, %v6530_v62  ;;  %v1646_v53 = vsub.f32 %v1582_v7, %v1614_v42  ;;  %v4922_v27 = vld [vmem:[#allocation7 + $0x88] sm:$0xff]  }
 0x2b7   : > { %v1525_v52 = vpop.xlane.xlu1 %1524  ;;  %v1403_v10 = vpop.xlane.xlu0 %1402  ;;  %v1874_v61 = vpack.c.bf16 %v1843_v50, %v1842_v12  ;;  %5023 = vrsqrt.f32 %v1676_v45  ;;  %v1806_v18 = vmul.f32 %v1774_v16, %v1742_v29  ;;  %v4920_v45 = vld [vmem:[#allocation7 + $0x8] sm:$0xff]  }
 0x2b8   : > { %v5018_v54 = vpop.eup %5017  ;;  %v1581_v38 = vmul.f32 0.0078125, %v1525_v52  ;;  %v6544_v12 = vmul.f32 0.0078125, %v1403_v10  ;;  %v4923_v52 = vld [vmem:[#allocation7 + $0x50] sm:$0xff]   ;;  %v1678_v4 = vadd.f32 1e-05, %v1646_v53 }
 0x2b9   : > { %2137 = vmatmul.mubr.bf16.vlgmr.msra.gmra.mrb[16].mxu0 %v1874_v61  ;;  %2330 = vmatmul.mubr.bf16.vlgmr.msra.gmra.mrb[16].mxu1 %v1874_v61  ;;  %v1743_v19 = vmul.f32 %v5018_v54, %v6511_v5  ;;  %v5020_v21 = vpop.eup %5019  ;;  %v4925_v61 = vld [vmem:[#allocation7 + $0xd0] sm:$0xff]   ;;  %v1844_v10 = vadd.f32 %v6528_v15, %v1806_v18 }
 0x2ba   : > { %v1645_v23 = vsub.f32 %v1581_v38, %v1613_v17  ;;  %2146 = vmatprep.mubr.bf16.mxu0 %v5530_v30  ;;  %2339 = vmatprep.mubr.bf16.mxu1 %v5530_v30  ;;  %v1744_v38 = vmul.f32 %v5020_v21, %v6511_v5 }
 0x2bb   : > { %v1401_v7 = vpop.xlane.xlu1 %1400  ;;  %v1531_v50 = vpop.xlane.xlu0 %1530  ;;  %v1807_v42 = vmul.f32 %v1775_v1, %v1743_v19  ;;  %4565 = vmatpush3.bf16.msra.mxu0 %v4916_v14  ;;  %4677 = vmatpush3.bf16.msra.mxu1 %v4918_v44  ;;  %v1616_v14 = vmul.f32 %v6544_v12, %v6544_v12  ;;  %v1776_v44 = vsub.f32 %v6294_v34, %v6496_v48 }
 0x2bc   : > { %v1677_v54 = vadd.f32 1e-05, %v1645_v23  ;;  %v6548_v29 = vmul.f32 0.0078125, %v1401_v7  ;;  %v1584_v16 = vmul.f32 0.0078125, %v1531_v50  ;;  %4566 = vmatprep.subr.bf16.mxu0 %v4919_v8  ;;  %4678 = vmatprep.subr.bf16.mxu1 %v4921_v55  ;;  %v4924_v8 = vld [vmem:[#allocation7 + $0x10] sm:$0xff]   ;;  %v4927_v50 = vld [vmem:[#allocation7 + $0x58] sm:$0xff]   ;;  %v1777_v48 = vsub.f32 %v6312_v9, %v6513_v28 }
 0x2bd   : > { %v1845_v17 = vadd.f32 %v6528_v15, %v1807_v42  ;;  %v4926_v55 = vld [vmem:[#allocation7 + $0x90] sm:$0xff]   ;;  %v4929_v42 = vld [vmem:[#allocation7 + $0xd8] sm:$0xff]  }
 0x2be   : > { %5025 = vrsqrt.f32 %v1677_v54  ;;  %v1615_v18 = vmul.f32 %v6548_v29, %v6548_v29  ;;  %v1648_v21 = vsub.f32 %v1584_v16, %v1616_v14  ;;  %v4930_v28 = vld [vmem:[#allocation7 + $0x98] sm:$0xff]   ;;  %v4931_v14 = vld [vmem:[#allocation7 + $0x60] sm:$0xff]  }
 0x2bf   : > { %v1529_v53 = vpop.xlane.xlu1 %1528  ;;  %v1407_v1 = vpop.xlane.xlu0 %1406  ;;  %v1875_v19 = vpack.c.bf16 %v1845_v17, %v1844_v10  ;;  %4567 = vmatpush3.bf16.msra.mxu0 %v4920_v45  ;;  %4679 = vmatpush3.bf16.msra.mxu1 %v4922_v27  ;;  %5027 = vrsqrt.f32 %v1678_v4  ;;  %v1808_v27 = vmul.f32 %v1776_v44, %v1744_v38 }
 0x2c0   : > { %v5022_v23 = vpop.eup %5021  ;;  %v1583_v7 = vmul.f32 0.0078125, %v1529_v53  ;;  %4568 = vmatprep.subr.bf16.mxu0 %v4923_v52  ;;  %4680 = vmatprep.subr.bf16.mxu1 %v4925_v61  ;;  %v6562_v4 = vmul.f32 0.0078125, %v1407_v1  ;;  %v4928_v52 = vld [vmem:[#allocation7 + $0x18] sm:$0xff]   ;;  %v4933_v53 = vld [vmem:[#allocation7 + $0xe0] sm:$0xff]  }
 0x2c1   : > { %2147 = vmatmul.mubr.bf16.gmra.mrb[20].mxu0 %v1875_v19  ;;  %2340 = vmatmul.mubr.bf16.gmra.mrb[20].mxu1 %v1875_v19  ;;  %v1745_v45 = vmul.f32 %v5022_v23, %v6511_v5  ;;  %v5024_v54 = vpop.eup %5023  ;;  %v1680_v19 = vadd.f32 1e-05, %v1648_v21  ;;  %v1846_v1 = vadd.f32 %v6528_v15, %v1808_v27 }
 0x2c2   : > { %v1647_v10 = vsub.f32 %v1583_v7, %v1615_v18  ;;  %2156 = vmatprep.mubr.bf16.mxu0 %v5530_v30  ;;  %2349 = vmatprep.mubr.bf16.mxu1 %v5530_v30  ;;  %v1746_v7 = vmul.f32 %v5024_v54, %v6511_v5 }
 0x2c3   : > { %v1405_v61 = vpop.xlane.xlu1 %1404  ;;  %v1535_v16 = vpop.xlane.xlu0 %1534  ;;  %v1809_v17 = vmul.f32 %v1777_v48, %v1745_v45  ;;  %4569 = vmatpush3.bf16.msra.mxu0 %v4924_v8  ;;  %4681 = vmatpush3.bf16.msra.mxu1 %v4926_v55  ;;  %v1618_v8 = vmul.f32 %v6562_v4, %v6562_v4  ;;  %v1778_v55 = vsub.f32 %v6305_v40, %v6506_v22 }
 0x2c4   : > { %v1679_v23 = vadd.f32 1e-05, %v1647_v10  ;;  %v6566_v38 = vmul.f32 0.0078125, %v1405_v61  ;;  %v1586_v44 = vmul.f32 0.0078125, %v1535_v16  ;;  %4570 = vmatprep.subr.bf16.mxu0 %v4927_v50  ;;  %4682 = vmatprep.subr.bf16.mxu1 %v4929_v42  ;;  %v4932_v50 = vld [vmem:[#allocation7 + $0x20] sm:$0xff]   ;;  %v4935_v16 = vld [vmem:[#allocation7 + $0x68] sm:$0xff]   ;;  %v1779_v22 = vsub.f32 %v6326_v0, %v6530_v62 }
 0x2c5   : > { %v1847_v18 = vadd.f32 %v6528_v15, %v1809_v17  ;;  %v4934_v42 = vld [vmem:[#allocation7 + $0xa0] sm:$0xff]   ;;  %v4937_v17 = vld [vmem:[#allocation7 + $0xe8] sm:$0xff]  }
 0x2c6   : > { %5029 = vrsqrt.f32 %v1679_v23  ;;  %v1617_v27 = vmul.f32 %v6566_v38, %v6566_v38  ;;  %v1650_v54 = vsub.f32 %v1586_v44, %v1618_v8  ;;  %v4938_v62 = vld [vmem:[#allocation7 + $0xa8] sm:$0xff]  }
 0x2c7   : > { %v1533_v21 = vpop.xlane.xlu1 %1532  ;;  %v1411_v48 = vpop.xlane.xlu0 %1410  ;;  %v1876_v45 = vpack.c.bf16 %v1847_v18, %v1846_v1  ;;  %4571 = vmatpush3.bf16.msra.mxu0 %v4928_v52  ;;  %4683 = vmatpush3.bf16.msra.mxu1 %v4930_v28  ;;  %5031 = vrsqrt.f32 %v1680_v19  ;;  %v1810_v28 = vmul.f32 %v1778_v55, %v1746_v7  ;;  %v4936_v18 = vld [vmem:[#allocation7 + $0x28] sm:$0xff]  }
 0x2c8   : > { %v5026_v10 = vpop.eup %5025  ;;  %v1585_v61 = vmul.f32 0.0078125, %v1533_v21  ;;  %4572 = vmatprep.subr.bf16.mxu0 %v4931_v14  ;;  %4684 = vmatprep.subr.bf16.mxu1 %v4933_v53  ;;  %v6580_v19 = vmul.f32 0.0078125, %v1411_v48  ;;  %v1682_v8 = vadd.f32 1e-05, %v1650_v54 }
 0x2c9   : > { %2157 = vmatmul.mubr.bf16.gmra.mrb[24].mxu0 %v1876_v45  ;;  %2350 = vmatmul.mubr.bf16.gmra.mrb[24].mxu1 %v1876_v45  ;;  %v1747_v52 = vmul.f32 %v5026_v10, %v6511_v5  ;;  %v5028_v23 = vpop.eup %5027  ;;  %v1848_v55 = vadd.f32 %v6528_v15, %v1810_v28  ;;  %v1781_v28 = vsub.f32 %v6340_v47, %v6548_v29 }
 0x2ca   : > { %v1649_v1 = vsub.f32 %v1585_v61, %v1617_v27  ;;  %2166 = vmatprep.mubr.bf16.mxu0 %v5530_v30  ;;  %2359 = vmatprep.mubr.bf16.mxu1 %v5530_v30  ;;  %v1748_v10 = vmul.f32 %v5028_v23, %v6511_v5 }
 0x2cb   : > { %v1409_v14 = vpop.xlane.xlu1 %1408  ;;  %v1539_v53 = vpop.xlane.xlu0 %1538  ;;  %v1811_v44 = vmul.f32 %v1779_v22, %v1747_v52  ;;  %4573 = vmatpush3.bf16.msra.mxu0 %v4932_v50  ;;  %4685 = vmatpush3.bf16.msra.mxu1 %v4934_v42  ;;  %v1620_v50 = vmul.f32 %v6580_v19, %v6580_v19  ;;  %v1780_v42 = vsub.f32 %v6320_v36, %v6523_v6 }
 0x2cc   : > { %v1681_v21 = vadd.f32 1e-05, %v1649_v1  ;;  %v6584_v45 = vmul.f32 0.0078125, %v1409_v14  ;;  %v1588_v7 = vmul.f32 0.0078125, %v1539_v53  ;;  %4574 = vmatprep.subr.bf16.mxu0 %v4935_v16  ;;  %4686 = vmatprep.subr.bf16.mxu1 %v4937_v17 }
 0x2cd   : > { %v1849_v48 = vadd.f32 %v6528_v15, %v1811_v44  ;;  %v1812_v6 = vmul.f32 %v1780_v42, %v1748_v10  ;;  %v1782_v42 = vsub.f32 %v6333_v56, %v6544_v12 }
 0x2ce   : > { %5033 = vrsqrt.f32 %v1681_v21  ;;  %v1619_v17 = vmul.f32 %v6584_v45, %v6584_v45  ;;  %v1652_v22 = vsub.f32 %v1588_v7, %v1620_v50 }
 0x2cf   : > { %v1537_v27 = vpop.xlane.xlu1 %1536  ;;  %v1415_v54 = vpop.xlane.xlu0 %1414  ;;  %v1877_v61 = vpack.c.bf16 %v1849_v48, %v1848_v55  ;;  %4575 = vmatpush3.bf16.msra.mxu0 %v4936_v18  ;;  %4687 = vmatpush3.bf16.msra.mxu1 %v4938_v62  ;;  %5035 = vrsqrt.f32 %v1682_v8  ;;  %v1850_v55 = vadd.f32 %v6528_v15, %v1812_v6 }
 0x2d0   : > { %v5030_v16 = vpop.eup %5029  ;;  %v1587_v52 = vmul.f32 0.0078125, %v1537_v27  ;;  %v6598_v53 = vmul.f32 0.0078125, %v1415_v54  ;;  %v1684_v8 = vadd.f32 1e-05, %v1652_v22 }
 0x2d1   : > { %2167 = vmatmul.mubr.bf16.gmra.mrb[28].mxu0 %v1877_v61  ;;  %2360 = vmatmul.mubr.bf16.gmra.mrb[28].mxu1 %v1877_v61  ;;  %v1749_v23 = vmul.f32 %v5030_v16, %v6511_v5  ;;  %v5032_v1 = vpop.eup %5031 }
 0x2d2   : > { %v1651_v14 = vsub.f32 %v1587_v52, %v1619_v17  ;;  %2176 = vmatprep.mubr.bf16.mxu0 %v5530_v30  ;;  %2369 = vmatprep.mubr.bf16.mxu1 %v5530_v30  ;;  %v1750_v10 = vmul.f32 %v5032_v1, %v6511_v5  ;;  %v1622_v50 = vmul.f32 %v6598_v53, %v6598_v53 }
 0x2d3   : > { %v1413_v44 = vpop.xlane.xlu1 %1412  ;;  %v1543_v18 = vpop.xlane.xlu0 %1542  ;;  %v1813_v62 = vmul.f32 %v1781_v28, %v1749_v23  ;;  %v1783_v28 = vsub.f32 %v6354_v35, %v6566_v38 }
 0x2d4   : > { %v1683_v21 = vadd.f32 1e-05, %v1651_v14  ;;  %v6602_v7 = vmul.f32 0.0078125, %v1413_v44  ;;  %v1590_v29 = vmul.f32 0.0078125, %v1543_v18  ;;  %v1814_v6 = vmul.f32 %v1782_v42, %v1750_v10 }
 0x2d5   : > { %v1851_v48 = vadd.f32 %v6528_v15, %v1813_v62  ;;  %v1784_v42 = vsub.f32 %v6348_v3, %v6562_v4 }
 0x2d6   : > { %5037 = vrsqrt.f32 %v1683_v21  ;;  %v1621_v17 = vmul.f32 %v6602_v7, %v6602_v7  ;;  %v1654_v22 = vsub.f32 %v1590_v29, %v1622_v50 }
 0x2d7   : > { %v1541_v27 = vpop.xlane.xlu1 %1540  ;;  %v1419_v54 = vpop.xlane.xlu0 %1418  ;;  %v1878_v61 = vpack.c.bf16 %v1851_v48, %v1850_v55  ;;  %5039 = vrsqrt.f32 %v1684_v8  ;;  %v1852_v55 = vadd.f32 %v6528_v15, %v1814_v6 }
 0x2d8   : > { %v5034_v16 = vpop.eup %5033  ;;  %v1589_v52 = vmul.f32 0.0078125, %v1541_v27  ;;  %v6616_v14 = vmul.f32 0.0078125, %v1419_v54  ;;  %v1686_v8 = vadd.f32 1e-05, %v1654_v22 }
 0x2d9   : > { %2177 = vmatmul.mubr.bf16.gmra.mrb[32].mxu0 %v1878_v61  ;;  %2370 = vmatmul.mubr.bf16.gmra.mrb[32].mxu1 %v1878_v61  ;;  %v1751_v23 = vmul.f32 %v5034_v16, %v6511_v5  ;;  %v5036_v1 = vpop.eup %5035 }
 0x2da   : > { %v1653_v12 = vsub.f32 %v1589_v52, %v1621_v17  ;;  %2186 = vmatprep.mubr.bf16.mxu0 %v5530_v30  ;;  %2379 = vmatprep.mubr.bf16.mxu1 %v5530_v30  ;;  %v1752_v10 = vmul.f32 %v5036_v1, %v6511_v5  ;;  %v1624_v50 = vmul.f32 %v6616_v14, %v6616_v14 }
 0x2db   : > { %v1417_v44 = vpop.xlane.xlu1 %1416  ;;  %v1547_v18 = vpop.xlane.xlu0 %1546  ;;  %v1815_v62 = vmul.f32 %v1783_v28, %v1751_v23  ;;  %v1785_v28 = vsub.f32 %v6368_v20, %v6584_v45 }
 0x2dc   : > { %v1685_v21 = vadd.f32 1e-05, %v1653_v12  ;;  %v6620_v29 = vmul.f32 0.0078125, %v1417_v44  ;;  %v1592_v38 = vmul.f32 0.0078125, %v1547_v18  ;;  %v1816_v6 = vmul.f32 %v1784_v42, %v1752_v10 }
 0x2dd   : > { %v1853_v48 = vadd.f32 %v6528_v15, %v1815_v62  ;;  %v1786_v42 = vsub.f32 %v6361_v11, %v6580_v19 }
 0x2de   : > { %5041 = vrsqrt.f32 %v1685_v21  ;;  %v1623_v17 = vmul.f32 %v6620_v29, %v6620_v29  ;;  %v1656_v22 = vsub.f32 %v1592_v38, %v1624_v50 }
 0x2df   : > { %v1545_v27 = vpop.xlane.xlu1 %1544  ;;  %v1423_v54 = vpop.xlane.xlu0 %1422  ;;  %v1879_v61 = vpack.c.bf16 %v1853_v48, %v1852_v55  ;;  %5043 = vrsqrt.f32 %v1686_v8  ;;  %v1854_v55 = vadd.f32 %v6528_v15, %v1816_v6 }
 0x2e0   : > { %v5038_v16 = vpop.eup %5037  ;;  %v1591_v52 = vmul.f32 0.0078125, %v1545_v27  ;;  %v6634_v12 = vmul.f32 0.0078125, %v1423_v54  ;;  %v1688_v8 = vadd.f32 1e-05, %v1656_v22 }
 0x2e1   : > { %2187 = vmatmul.mubr.bf16.gmra.mrb[36].mxu0 %v1879_v61  ;;  %2380 = vmatmul.mubr.bf16.gmra.mrb[36].mxu1 %v1879_v61  ;;  %v1753_v23 = vmul.f32 %v5038_v16, %v6511_v5  ;;  %v5040_v1 = vpop.eup %5039 }
 0x2e2   : > { %v1655_v4 = vsub.f32 %v1591_v52, %v1623_v17  ;;  %2196 = vmatprep.mubr.bf16.mxu0 %v5530_v30  ;;  %2389 = vmatprep.mubr.bf16.mxu1 %v5530_v30  ;;  %v1754_v10 = vmul.f32 %v5040_v1, %v6511_v5  ;;  %v1626_v50 = vmul.f32 %v6634_v12, %v6634_v12 }
 0x2e3   : > { %v1421_v44 = vpop.xlane.xlu1 %1420  ;;  %v1551_v18 = vpop.xlane.xlu0 %1550  ;;  %v1817_v62 = vmul.f32 %v1785_v28, %v1753_v23  ;;  %v1787_v28 = vsub.f32 %v6382_v33, %v6602_v7 }
 0x2e4   : > { %v1687_v21 = vadd.f32 1e-05, %v1655_v4  ;;  %v6638_v38 = vmul.f32 0.0078125, %v1421_v44  ;;  %v1594_v45 = vmul.f32 0.0078125, %v1551_v18  ;;  %v1818_v6 = vmul.f32 %v1786_v42, %v1754_v10 }
 0x2e5   : > { %v1855_v48 = vadd.f32 %v6528_v15, %v1817_v62  ;;  %v1788_v42 = vsub.f32 %v6376_v31, %v6598_v53 }
 0x2e6   : > { %5045 = vrsqrt.f32 %v1687_v21  ;;  %v1625_v17 = vmul.f32 %v6638_v38, %v6638_v38  ;;  %v1658_v22 = vsub.f32 %v1594_v45, %v1626_v50 }
 0x2e7   : > { %v1549_v27 = vpop.xlane.xlu1 %1548  ;;  %v1427_v54 = vpop.xlane.xlu0 %1426  ;;  %v1880_v61 = vpack.c.bf16 %v1855_v48, %v1854_v55  ;;  %5047 = vrsqrt.f32 %v1688_v8  ;;  %v1856_v55 = vadd.f32 %v6528_v15, %v1818_v6 }
 0x2e8   : > { %v5042_v16 = vpop.eup %5041  ;;  %v1593_v52 = vmul.f32 0.0078125, %v1549_v27  ;;  %v6652_v4 = vmul.f32 0.0078125, %v1427_v54  ;;  %v1690_v8 = vadd.f32 1e-05, %v1658_v22 }
 0x2e9   : > { %2197 = vmatmul.mubr.bf16.gmra.mrb[40].mxu0 %v1880_v61  ;;  %2390 = vmatmul.mubr.bf16.gmra.mrb[40].mxu1 %v1880_v61  ;;  %v1755_v23 = vmul.f32 %v5042_v16, %v6511_v5  ;;  %v5044_v1 = vpop.eup %5043 }
 0x2ea   : > { %v1657_v19 = vsub.f32 %v1593_v52, %v1625_v17  ;;  %2206 = vmatprep.mubr.bf16.mxu0 %v5530_v30  ;;  %2399 = vmatprep.mubr.bf16.mxu1 %v5530_v30  ;;  %v1756_v10 = vmul.f32 %v5044_v1, %v6511_v5  ;;  %v1628_v50 = vmul.f32 %v6652_v4, %v6652_v4 }
 0x2eb   : > { %v1425_v44 = vpop.xlane.xlu1 %1424  ;;  %v1555_v18 = vpop.xlane.xlu0 %1554  ;;  %v1819_v62 = vmul.f32 %v1787_v28, %v1755_v23  ;;  %v1789_v28 = vsub.f32 %v6396_v13, %v6620_v29 }
 0x2ec   : > { %v1689_v21 = vadd.f32 1e-05, %v1657_v19  ;;  %v6656_v45 = vmul.f32 0.0078125, %v1425_v44  ;;  %v1596_v7 = vmul.f32 0.0078125, %v1555_v18  ;;  %v1820_v6 = vmul.f32 %v1788_v42, %v1756_v10 }
 0x2ed   : > { %v1857_v48 = vadd.f32 %v6528_v15, %v1819_v62  ;;  %v1790_v42 = vsub.f32 %v6389_v46, %v6616_v14 }
 0x2ee   : > { %5049 = vrsqrt.f32 %v1689_v21  ;;  %v1627_v17 = vmul.f32 %v6656_v45, %v6656_v45  ;;  %v1660_v22 = vsub.f32 %v1596_v7, %v1628_v50 }
 0x2ef   : > { %v1553_v27 = vpop.xlane.xlu1 %1552  ;;  %v1431_v54 = vpop.xlane.xlu0 %1430  ;;  %v1881_v61 = vpack.c.bf16 %v1857_v48, %v1856_v55  ;;  %5051 = vrsqrt.f32 %v1690_v8  ;;  %v1858_v55 = vadd.f32 %v6528_v15, %v1820_v6 }
 0x2f0   : > { %v5046_v16 = vpop.eup %5045  ;;  %v1595_v52 = vmul.f32 0.0078125, %v1553_v27  ;;  %v6670_v19 = vmul.f32 0.0078125, %v1431_v54  ;;  %v1692_v8 = vadd.f32 1e-05, %v1660_v22 }
 0x2f1   : > { %2207 = vmatmul.mubr.bf16.gmra.mrb[44].mxu0 %v1881_v61  ;;  %2400 = vmatmul.mubr.bf16.gmra.mrb[44].mxu1 %v1881_v61  ;;  %v1757_v23 = vmul.f32 %v5046_v16, %v6511_v5  ;;  %v5048_v1 = vpop.eup %5047 }
 0x2f2   : > { %v1659_v53 = vsub.f32 %v1595_v52, %v1627_v17  ;;  %2216 = vmatprep.mubr.bf16.mxu0 %v5530_v30  ;;  %2409 = vmatprep.mubr.bf16.mxu1 %v5530_v30  ;;  %v1758_v10 = vmul.f32 %v5048_v1, %v6511_v5  ;;  %v1630_v50 = vmul.f32 %v6670_v19, %v6670_v19 }
 0x2f3   : > { %v1429_v44 = vpop.xlane.xlu1 %1428  ;;  %v1559_v18 = vpop.xlane.xlu0 %1558  ;;  %v1821_v62 = vmul.f32 %v1789_v28, %v1757_v23  ;;  %v1791_v28 = vsub.f32 %v6410_v39, %v6638_v38 }
 0x2f4   : > { %v1691_v21 = vadd.f32 1e-05, %v1659_v53  ;;  %v6674_v7 = vmul.f32 0.0078125, %v1429_v44  ;;  %v1598_v29 = vmul.f32 0.0078125, %v1559_v18  ;;  %v1822_v6 = vmul.f32 %v1790_v42, %v1758_v10 }
 0x2f5   : > { %v1859_v48 = vadd.f32 %v6528_v15, %v1821_v62  ;;  %v1792_v42 = vsub.f32 %v6404_v51, %v6634_v12 }
 0x2f6   : > { %5053 = vrsqrt.f32 %v1691_v21  ;;  %v1629_v17 = vmul.f32 %v6674_v7, %v6674_v7  ;;  %v1662_v22 = vsub.f32 %v1598_v29, %v1630_v50 }
 0x2f7   : > { %v1557_v27 = vpop.xlane.xlu1 %1556  ;;  %v1435_v54 = vpop.xlane.xlu0 %1434  ;;  %v1882_v61 = vpack.c.bf16 %v1859_v48, %v1858_v55  ;;  %5055 = vrsqrt.f32 %v1692_v8  ;;  %v1860_v55 = vadd.f32 %v6528_v15, %v1822_v6 }
 0x2f8   : > { %v5050_v16 = vpop.eup %5049  ;;  %v1597_v52 = vmul.f32 0.0078125, %v1557_v27  ;;  %v6688_v53 = vmul.f32 0.0078125, %v1435_v54  ;;  %v1694_v8 = vadd.f32 1e-05, %v1662_v22 }
 0x2f9   : > { %2217 = vmatmul.mubr.bf16.gmra.mrb[48].mxu0 %v1882_v61  ;;  %2410 = vmatmul.mubr.bf16.gmra.mrb[48].mxu1 %v1882_v61  ;;  %v1759_v23 = vmul.f32 %v5050_v16, %v6511_v5  ;;  %v5052_v1 = vpop.eup %5051 }
 0x2fa   : > { %v1661_v14 = vsub.f32 %v1597_v52, %v1629_v17  ;;  %2226 = vmatprep.mubr.bf16.mxu0 %v5530_v30  ;;  %2419 = vmatprep.mubr.bf16.mxu1 %v5530_v30  ;;  %v1760_v10 = vmul.f32 %v5052_v1, %v6511_v5  ;;  %v1632_v50 = vmul.f32 %v6688_v53, %v6688_v53 }
 0x2fb   : > { %v1433_v44 = vpop.xlane.xlu1 %1432  ;;  %v1563_v18 = vpop.xlane.xlu0 %1562  ;;  %v1823_v62 = vmul.f32 %v1791_v28, %v1759_v23  ;;  %v1793_v28 = vsub.f32 %v6424_v2, %v6656_v45 }
 0x2fc   : > { %v1693_v21 = vadd.f32 1e-05, %v1661_v14  ;;  %v6692_v29 = vmul.f32 0.0078125, %v1433_v44  ;;  %v1600_v38 = vmul.f32 0.0078125, %v1563_v18  ;;  %v1824_v6 = vmul.f32 %v1792_v42, %v1760_v10 }
 0x2fd   : > { %v1861_v48 = vadd.f32 %v6528_v15, %v1823_v62  ;;  %v1794_v42 = vsub.f32 %v6417_v24, %v6652_v4 }
 0x2fe   : > { %5057 = vrsqrt.f32 %v1693_v21  ;;  %v1631_v17 = vmul.f32 %v6692_v29, %v6692_v29  ;;  %v1664_v22 = vsub.f32 %v1600_v38, %v1632_v50 }
 0x2ff   : > { %v1561_v27 = vpop.xlane.xlu1 %1560  ;;  %v1439_v54 = vpop.xlane.xlu0 %1438  ;;  %v1883_v61 = vpack.c.bf16 %v1861_v48, %v1860_v55  ;;  %5059 = vrsqrt.f32 %v1694_v8  ;;  %v1862_v55 = vadd.f32 %v6528_v15, %v1824_v6 }
 0x300   : > { %v5054_v16 = vpop.eup %5053  ;;  %v1599_v52 = vmul.f32 0.0078125, %v1561_v27  ;;  %v6706_v14 = vmul.f32 0.0078125, %v1439_v54  ;;  %v1696_v8 = vadd.f32 1e-05, %v1664_v22 }
 0x301   : > { %2227 = vmatmul.mubr.bf16.gmra.mrb[52].mxu0 %v1883_v61  ;;  %2420 = vmatmul.mubr.bf16.gmra.mrb[52].mxu1 %v1883_v61  ;;  %v1761_v23 = vmul.f32 %v5054_v16, %v6511_v5  ;;  %v5056_v1 = vpop.eup %5055 }
 0x302   : > { %v1663_v12 = vsub.f32 %v1599_v52, %v1631_v17  ;;  %2236 = vmatprep.mubr.bf16.mxu0 %v5530_v30  ;;  %2429 = vmatprep.mubr.bf16.mxu1 %v5530_v30  ;;  %v1762_v10 = vmul.f32 %v5056_v1, %v6511_v5  ;;  %v1634_v50 = vmul.f32 %v6706_v14, %v6706_v14 }
 0x303   : > { %v1437_v44 = vpop.xlane.xlu1 %1436  ;;  %v1567_v18 = vpop.xlane.xlu0 %1566  ;;  %v1825_v62 = vmul.f32 %v1793_v28, %v1761_v23  ;;  %v1795_v28 = vsub.f32 %v6438_v59, %v6674_v7 }
 0x304   : > { %v1695_v21 = vadd.f32 1e-05, %v1663_v12  ;;  %v6710_v38 = vmul.f32 0.0078125, %v1437_v44  ;;  %v1602_v45 = vmul.f32 0.0078125, %v1567_v18  ;;  %v1826_v6 = vmul.f32 %v1794_v42, %v1762_v10 }
 0x305   : > { %v1863_v48 = vadd.f32 %v6528_v15, %v1825_v62  ;;  %v1796_v42 = vsub.f32 %v6431_v58, %v6670_v19 }
 0x306   : > { %5061 = vrsqrt.f32 %v1695_v21  ;;  %v1633_v17 = vmul.f32 %v6710_v38, %v6710_v38  ;;  %v1666_v22 = vsub.f32 %v1602_v45, %v1634_v50 }
 0x307   : > { %v1565_v27 = vpop.xlane.xlu1 %1564  ;;  %v1443_v54 = vpop.xlane.xlu0 %1442  ;;  %v1884_v61 = vpack.c.bf16 %v1863_v48, %v1862_v55  ;;  %5063 = vrsqrt.f32 %v1696_v8  ;;  %v1864_v55 = vadd.f32 %v6528_v15, %v1826_v6 }
 0x308   : > { %v5058_v16 = vpop.eup %5057  ;;  %v1601_v52 = vmul.f32 0.0078125, %v1565_v27  ;;  %v6724_v12 = vmul.f32 0.0078125, %v1443_v54  ;;  %v1698_v8 = vadd.f32 1e-05, %v1666_v22 }
 0x309   : > { %2237 = vmatmul.mubr.bf16.gmra.mrb[56].mxu0 %v1884_v61  ;;  %2430 = vmatmul.mubr.bf16.gmra.mrb[56].mxu1 %v1884_v61  ;;  %v1763_v23 = vmul.f32 %v5058_v16, %v6511_v5  ;;  %v5060_v1 = vpop.eup %5059 }
 0x30a   : > { %v1665_v4 = vsub.f32 %v1601_v52, %v1633_v17  ;;  %2246 = vmatprep.mubr.bf16.mxu0 %v5530_v30  ;;  %2439 = vmatprep.mubr.bf16.mxu1 %v5530_v30  ;;  %v1764_v10 = vmul.f32 %v5060_v1, %v6511_v5  ;;  %v1636_v50 = vmul.f32 %v6724_v12, %v6724_v12 }
 0x30b   : > { %v1441_v44 = vpop.xlane.xlu1 %1440  ;;  %v1571_v18 = vpop.xlane.xlu0 %1570  ;;  %v1827_v62 = vmul.f32 %v1795_v28, %v1763_v23  ;;  %v1797_v52 = vsub.f32 %v6452_v49, %v6692_v29 }
 0x30c   : > { %v1697_v21 = vadd.f32 1e-05, %v1665_v4  ;;  %v6728_v45 = vmul.f32 0.0078125, %v1441_v44  ;;  %v1604_v7 = vmul.f32 0.0078125, %v1571_v18  ;;  %v1828_v23 = vmul.f32 %v1796_v42, %v1764_v10 }
 0x30d   : > { %v1865_v48 = vadd.f32 %v6528_v15, %v1827_v62 }
 0x30e   : > { %5065 = vrsqrt.f32 %v1697_v21  ;;  %v1635_v16 = vmul.f32 %v6728_v45, %v6728_v45  ;;  %v1668_v17 = vsub.f32 %v1604_v7, %v1636_v50  ;;  %v1798_v7 = vsub.f32 %v6445_v63, %v6688_v53 }
 0x30f   : > { %v1569_v27 = vpop.xlane.xlu1 %1568  ;;  %v1885_v54 = vpack.c.bf16 %v1865_v48, %v1864_v55  ;;  %5067 = vrsqrt.f32 %v1698_v8  ;;  %v1866_v8 = vadd.f32 %v6528_v15, %v1828_v23 }
 0x310   : > { %v5062_v61 = vpop.eup %5061  ;;  %v1603_v22 = vmul.f32 0.0078125, %v1569_v27  ;;  %v1700_v44 = vadd.f32 1e-05, %v1668_v17  ;;  %v1799_v27 = vsub.f32 %v6466_v37, %v6710_v38  ;;  %v1800_v38 = vsub.f32 %v6459_v26, %v6706_v14 }
 0x311   : > { %2247 = vmatmul.mubr.bf16.gmra.mrb[60].mxu0 %v1885_v54  ;;  %2440 = vmatmul.mubr.bf16.gmra.mrb[60].mxu1 %v1885_v54  ;;  %v1765_v28 = vmul.f32 %v5062_v61, %v6511_v5  ;;  %v5064_v6 = vpop.eup %5063 }
 0x312   : > { %v1667_v1 = vsub.f32 %v1603_v22, %v1635_v16  ;;  %2256 = vmatprep.mubr.bf16.mxu0 %v5530_v30  ;;  %2449 = vmatprep.mubr.bf16.mxu1 %v5530_v30  ;;  %v1766_v21 = vmul.f32 %v5064_v6, %v6511_v5 }
 0x313   : > { %v1445_v19 = vpop.xlane.xlu1 %1444  ;;  %v1829_v4 = vmul.f32 %v1797_v52, %v1765_v28 }
 0x314   : > { %v1699_v18 = vadd.f32 1e-05, %v1667_v1  ;;  %v1477_v62 = vmul.f32 0.0078125, %v1445_v19  ;;  %v1830_v61 = vmul.f32 %v1798_v7, %v1766_v21  ;;  %v1801_v19 = vsub.f32 %v6480_v60, %v6728_v45 }
 0x315   : > { %v1867_v29 = vadd.f32 %v6528_v15, %v1829_v4  ;;  %v1802_v45 = vsub.f32 %v6473_v43, %v6724_v12 }
 0x316   : > { %5069 = vrsqrt.f32 %v1699_v18  ;;  %v1637_v50 = vmul.f32 %v1477_v62, %v1477_v62  ;;  %v1868_v52 = vadd.f32 %v6528_v15, %v1830_v61  ;;  %v4940_v61 = vld [vmem:[#allocation7 + $0x30] sm:$0xff]  }
 0x317   : > { %v1573_v55 = vpop.xlane.xlu1 %1572  ;;  %v1886_v48 = vpack.c.bf16 %v1867_v29, %v1866_v8  ;;  %5071 = vrsqrt.f32 %v1700_v44 }
 0x318   : > { %v5066_v10 = vpop.eup %5065  ;;  %v1605_v42 = vmul.f32 0.0078125, %v1573_v55 }
 0x319   : > { %2257 = vmatmul.mubr.bf16.gmra.mrb[64].mxu0 %v1886_v48  ;;  %2450 = vmatmul.mubr.bf16.gmra.mrb[64].mxu1 %v1886_v48  ;;  %v1767_v54 = vmul.f32 %v5066_v10, %v6511_v5  ;;  %v5068_v16 = vpop.eup %5067  ;;  %v1803_v48 = vsub.f32 %v6489_v57, %v1477_v62 }
 0x31a   : > { %v1669_v17 = vsub.f32 %v1605_v42, %v1637_v50  ;;  %2266 = vmatprep.mubr.bf16.mxu0 %v5530_v30  ;;  %2459 = vmatprep.mubr.bf16.mxu1 %v5530_v30  ;;  %v1768_v23 = vmul.f32 %v5068_v16, %v6511_v5  ;;  %v4939_v42 = vld [vmem:[#allocation7 + $0x70] sm:$0xff]  }
 0x31b   : > { %v1831_v53 = vmul.f32 %v1799_v27, %v1767_v54  ;;  %v4941_v27 = vld [vmem:[#allocation7 + $0xf0] sm:$0xff]   ;;  %4576 = vmatprep.subr.bf16.mxu0 %v4939_v42 }
 0x31c   : > { %v1701_v22 = vadd.f32 1e-05, %v1669_v17  ;;  %v1832_v44 = vmul.f32 %v1800_v38, %v1768_v23  ;;  %v4942_v16 = vld [vmem:[#allocation7 + $0xb0] sm:$0xff]   ;;  %4688 = vmatprep.subr.bf16.mxu1 %v4941_v27  ;;  %4577 = vmatpush3.bf16.msra.mxu0 %v4940_v61 }
 0x31d   : > { %v1869_v28 = vadd.f32 %v6528_v15, %v1831_v53  ;;  %4689 = vmatpush3.bf16.msra.mxu1 %v4942_v16  ;;  %v4945_v53 = vld [vmem:[#allocation7 + $0xf8] sm:$0xff]  }
 0x31e   : > { %5073 = vrsqrt.f32 %v1701_v22  ;;  %v1870_v29 = vadd.f32 %v6528_v15, %v1832_v44  ;;  %v4944_v22 = vld [vmem:[#allocation7 + $0x38] sm:$0xff]   ;;  %4690 = vmatprep.subr.bf16.mxu1 %v4945_v53 }
 0x31f   : > { %v1887_v6 = vpack.c.bf16 %v1869_v28, %v1868_v52  ;;  %v1924_v52 = vlaneseq }
 0x320   : > { %v5070_v1 = vpop.eup %5069 }
 0x321   : > { %2267 = vmatmul.mubr.bf16.gmra.mrb[68].mxu0 %v1887_v6  ;;  %2460 = vmatmul.mubr.bf16.gmra.mrb[68].mxu1 %v1887_v6  ;;  %v1769_v4 = vmul.f32 %v5070_v1, %v6511_v5  ;;  %v5072_v18 = vpop.eup %5071  ;;  %v1925_v28 = vshrl.u32 %v1924_v52, 7 }
 0x322   : > { %2276 = vmatprep.mubr.bf16.mxu0 %v5530_v30  ;;  %2469 = vmatprep.mubr.bf16.mxu1 %v5530_v30  ;;  %v1770_v21 = vmul.f32 %v5072_v18, %v6511_v5 }
 0x323   : > { %v1833_v8 = vmul.f32 %v1801_v19, %v1769_v4  ;;  %v1926_v23 = vsub.s32 0, %v1925_v28  ;;  %v1934_v38 = vsub.s32 2, %v1925_v28  ;;  %v1930_v6 = vsub.s32 1, %v1925_v28 }
 0x324   : > { %v1834_v50 = vmul.f32 %v1802_v45, %v1770_v21  ;;  %v1938_v1 = vsub.s32 3, %v1925_v28 }
 0x325   : > { %v1871_v14 = vadd.f32 %v6528_v15, %v1833_v8 }
 0x326   : > { %v1872_v12 = vadd.f32 %v6528_v15, %v1834_v50 }
 0x327   : > { %v1888_v7 = vpack.c.bf16 %v1871_v14, %v1870_v29 }
 0x328   : > { %v5074_v55 = vpop.eup %5073 }
 0x329   : > { %2277 = vmatmul.mubr.bf16.gmra.mrb[72].mxu0 %v1888_v7  ;;  %2470 = vmatmul.mubr.bf16.gmra.mrb[72].mxu1 %v1888_v7  ;;  %v1771_v10 = vmul.f32 %v5074_v55, %v6511_v5  ;;  %v4943_v5 = vld [vmem:[#allocation7 + $0x78] sm:$0xff]  }
 0x32a   : > { %2286 = vmatprep.mubr.bf16.mxu0 %v5530_v30  ;;  %2479 = vmatprep.mubr.bf16.mxu1 %v5530_v30  ;;  %v4946_v30 = vld [vmem:[#allocation7 + $0xb8] sm:$0xff]  }
 0x32b   : > { %v1835_v54 = vmul.f32 %v1803_v48, %v1771_v10  ;;  %4578 = vmatprep.subr.bf16.mxu0 %v4943_v5  ;;  %4691 = vmatpush3.bf16.msra.mxu1 %v4946_v30 }
 0x32c   : > { %4579 = vmatpush3.bf16.msra.mxu0 %v4944_v22 }
 0x32d   : > { %v1873_v62 = vadd.f32 %v6528_v15, %v1835_v54  ;;  %v1922_v15 = vld [vmem:[%s8747_s8] sm:$0xf] }
 0x32e   : > { %v6778_v19 = vrot.slane %v1922_v15, %v1926_v23  ;;  %v6780_v4 = vrot.slane %v1922_v15, %v1934_v38  ;;  %v6782_v44 = vrot.slane %v1922_v15, %v1930_v6  ;;  %v6784_v18 = vrot.slane %v1922_v15, %v1938_v1 }
 0x32f   : > { %v1889_v17 = vpack.c.bf16 %v1873_v62, %v1872_v12 }
 0x331   : > { %2287 = vmatmul.mubr.bf16.gmra.mrb[76].mxu0 %v1889_v17  ;;  %2480 = vmatmul.mubr.bf16.gmra.mrb[76].mxu1 %v1889_v17 }
 0x38c   : > { %v2138_v8 = vpop.f32.mrb[16].mxu0  ;;  %v2331_v29 = vpop.f32.mrb[16].mxu1 }
 0x38d   : > { %v6787_v14 = vadd.f32 %v2138_v8, %v6778_v19  ;;  %v6790_v21 = vadd.f32 %v2331_v29, %v6780_v4  ;;  %v2140_v45 = vpop.f32.mrb[17].mxu0  ;;  %v2333_v7 = vpop.f32.mrb[17].mxu1 }
 0x38e   : > { %v6793_v55 = vadd.f32 %v2140_v45, %v6782_v44  ;;  %v6796_v48 = vadd.f32 %v2333_v7, %v6784_v18  ;;  %v2142_v10 = vpop.f32.mrb[18].mxu0  ;;  %v2335_v50 = vpop.f32.mrb[18].mxu1 }
 0x38f   : > { %v2490_v42 = vmul.f32 %v6787_v14, %v6787_v14  ;;  %v2492_v27 = vmul.f32 %v6790_v21, %v6790_v21  ;;  %v6803_v54 = vadd.f32 %v2142_v10, %v6778_v19  ;;  %v6806_v61 = vadd.f32 %v2335_v50, %v6780_v4  ;;  %v2144_v16 = vpop.f32.mrb[19].mxu0  ;;  %v2337_v12 = vpop.f32.mrb[19].mxu1 }
 0x390   : > { %v2491_v62 = vmul.f32 %v6793_v55, %v6793_v55  ;;  %v2493_v17 = vmul.f32 %v6796_v48, %v6796_v48  ;;  %v6813_v5 = vadd.f32 %v2144_v16, %v6782_v44  ;;  %v6816_v53 = vadd.f32 %v2337_v12, %v6784_v18 }
 0x391   : > { %v2618_v22 = vmul.f32 %v2490_v42, %v6787_v14  ;;  %v2620_v30 = vmul.f32 %v2492_v27, %v6790_v21  ;;  %v2494_v52 = vmul.f32 %v6803_v54, %v6803_v54  ;;  %v2496_v28 = vmul.f32 %v6806_v61, %v6806_v61 }
 0x392   : > { %v2619_v23 = vmul.f32 %v2491_v62, %v6793_v55  ;;  %v2621_v38 = vmul.f32 %v2493_v17, %v6796_v48  ;;  %v2495_v15 = vmul.f32 %v6813_v5, %v6813_v5  ;;  %v2497_v6 = vmul.f32 %v6816_v53, %v6816_v53 }
 0x393   : > { %v2746_v1 = vmul.f32 0.044715, %v2618_v22  ;;  %v2748_v8 = vmul.f32 0.044715, %v2620_v30  ;;  %v2622_v29 = vmul.f32 %v2494_v52, %v6803_v54  ;;  %v2624_v45 = vmul.f32 %v2496_v28, %v6806_v61 }
 0x394   : > { %v2747_v7 = vmul.f32 0.044715, %v2619_v23  ;;  %v2749_v10 = vmul.f32 0.044715, %v2621_v38  ;;  %v2623_v50 = vmul.f32 %v2495_v15, %v6813_v5  ;;  %v2625_v42 = vmul.f32 %v2497_v6, %v6816_v53  ;;  %v2148_v27 = vpop.f32.mrb[20].mxu0  ;;  %v2341_v16 = vpop.f32.mrb[20].mxu1 }
 0x395   : > { %v2874_v12 = vadd.f32 %v2746_v1, %v6787_v14  ;;  %v2876_v62 = vadd.f32 %v2748_v8, %v6790_v21  ;;  %v2750_v17 = vmul.f32 0.044715, %v2622_v29  ;;  %v2752_v57 = vmul.f32 0.044715, %v2624_v45  ;;  %v2150_v22 = vpop.f32.mrb[21].mxu0  ;;  %v2343_v30 = vpop.f32.mrb[21].mxu1 }
 0x396   : > { %v2875_v52 = vadd.f32 %v2747_v7, %v6793_v55  ;;  %v2877_v28 = vadd.f32 %v2749_v10, %v6796_v48  ;;  %v2751_v23 = vmul.f32 0.044715, %v2623_v50  ;;  %v2753_v38 = vmul.f32 0.044715, %v2625_v42  ;;  %v2152_v43 = vpop.f32.mrb[22].mxu0  ;;  %v2345_v15 = vpop.f32.mrb[22].mxu1 }
 0x397   : > { %v3002_v60 = vmul.f32 0.7978846, %v2874_v12  ;;  %v3004_v6 = vmul.f32 0.7978846, %v2876_v62  ;;  %v2878_v26 = vadd.f32 %v2750_v17, %v6803_v54  ;;  %v2880_v1 = vadd.f32 %v2752_v57, %v6806_v61  ;;  %v2154_v37 = vpop.f32.mrb[23].mxu0  ;;  %v2347_v8 = vpop.f32.mrb[23].mxu1 }
 0x398   : > { %v3003_v29 = vmul.f32 0.7978846, %v2875_v52  ;;  %v3005_v45 = vmul.f32 0.7978846, %v2877_v28  ;;  %v2879_v63 = vadd.f32 %v2751_v23, %v6813_v5  ;;  %v2881_v7 = vadd.f32 %v2753_v38, %v6816_v53 }
 0x399   : > { %5075 = vtanh.f32 %v3002_v60  ;;  %v3006_v10 = vmul.f32 0.7978846, %v2878_v26  ;;  %v3008_v50 = vmul.f32 0.7978846, %v2880_v1  ;;  %v6843_v42 = vadd.f32 %v2148_v27, %v6778_v19 }
 0x39a   : > { %5077 = vtanh.f32 %v3004_v6  ;;  %v3007_v12 = vmul.f32 0.7978846, %v2879_v63  ;;  %v3009_v62 = vmul.f32 0.7978846, %v2881_v7  ;;  %v6846_v17 = vadd.f32 %v2341_v16, %v6780_v4 }
 0x39b   : > { %8922 = vst [vmem:[#allocation46_spill] sm:$0xff] %v6843_v42  ;;  %5079 = vtanh.f32 %v3003_v29  ;;  %v2498_v57 = vmul.f32 %v6843_v42, %v6843_v42  ;;  %v6851_v52 = vadd.f32 %v2150_v22, %v6782_v44  ;;  %v6854_v60 = vadd.f32 %v2343_v30, %v6784_v18 }
 0x39c   : > { %8923 = vst [vmem:[#allocation47_spill] sm:$0xff] %v6846_v17  ;;  %5081 = vtanh.f32 %v3005_v45  ;;  %v2500_v26 = vmul.f32 %v6846_v17, %v6846_v17  ;;  %v6859_v63 = vadd.f32 %v2152_v43, %v6778_v19  ;;  %v6862_v27 = vadd.f32 %v2345_v15, %v6780_v4  ;;  %v6864_v16 = vpop.f32.mrb[24].mxu0  ;;  %v6866_v28 = vpop.f32.mrb[24].mxu1 }
 0x39d   : > { %8924 = vst [vmem:[#allocation48_spill] sm:$0xff] %v6854_v60  ;;  %5083 = vtanh.f32 %v3006_v10  ;;  %v2626_v22 = vmul.f32 %v2498_v57, %v6843_v42  ;;  %v2499_v30 = vmul.f32 %v6851_v52, %v6851_v52  ;;  %v2501_v23 = vmul.f32 %v6854_v60, %v6854_v60  ;;  %v6873_v38 = vpop.f32.mrb[25].mxu0  ;;  %v6875_v43 = vpop.f32.mrb[25].mxu1 }
 0x39e   : > { %8925 = vst [vmem:[#allocation49_spill] sm:$0xff] %v6859_v63  ;;  %8926 = vst [vmem:[#allocation50_spill] sm:$0xff] %v6862_v27  ;;  %5085 = vtanh.f32 %v3008_v50  ;;  %v2628_v15 = vmul.f32 %v2500_v26, %v6846_v17  ;;  %v2502_v6 = vmul.f32 %v6859_v63, %v6859_v63  ;;  %v2504_v1 = vmul.f32 %v6862_v27, %v6862_v27  ;;  %v6882_v29 = vpop.f32.mrb[26].mxu0  ;;  %v6884_v45 = vpop.f32.mrb[26].mxu1 }
 0x39f   : > { %5087 = vtanh.f32 %v3007_v12  ;;  %v2754_v7 = vmul.f32 0.044715, %v2626_v22  ;;  %v2627_v10 = vmul.f32 %v2499_v30, %v6851_v52  ;;  %v2629_v57 = vmul.f32 %v2501_v23, %v6854_v60  ;;  %v6888_v49 = vpop.f32.mrb[27].mxu0  ;;  %v6890_v50 = vpop.f32.mrb[27].mxu1 }
 0x3a0   : > { %5089 = vtanh.f32 %v3009_v62  ;;  %v2756_v26 = vmul.f32 0.044715, %v2628_v15  ;;  %v2630_v58 = vmul.f32 %v2502_v6, %v6859_v63  ;;  %v2632_v59 = vmul.f32 %v2504_v1, %v6862_v27 }
 0x3a1   : > { %v2882_v24 = vadd.f32 %v2754_v7, %v6843_v42  ;;  %v2755_v2 = vmul.f32 0.044715, %v2627_v10  ;;  %v2757_v51 = vmul.f32 0.044715, %v2629_v57  ;;  %v6896_v12 = vadd.f32 %v2154_v37, %v6782_v44 }
 0x3a2   : > { %v2884_v22 = vadd.f32 %v2756_v26, %v6846_v17  ;;  %v2758_v30 = vmul.f32 0.044715, %v2630_v58  ;;  %v2760_v23 = vmul.f32 0.044715, %v2632_v59  ;;  %v6900_v39 = vadd.f32 %v2347_v8, %v6784_v18 }
 0x3a3   : > { %8927 = vst [vmem:[#allocation51_spill] sm:$0xff] %v6896_v12  ;;  %v5076_v62 = vpop.eup %5075  ;;  %v3010_v15 = vmul.f32 0.7978846, %v2882_v24  ;;  %v2883_v6 = vadd.f32 %v2755_v2, %v6851_v52  ;;  %v2885_v1 = vadd.f32 %v2757_v51, %v6854_v60  ;;  %v2503_v7 = vmul.f32 %v6896_v12, %v6896_v12 }
 0x3a4   : > { %8928 = vst [vmem:[#allocation52_spill] sm:$0xff] %v6900_v39  ;;  %v5078_v10 = vpop.eup %5077  ;;  %v3258_v57 = vadd.f32 1.0, %v5076_v62  ;;  %v3012_v37 = vmul.f32 0.7978846, %v2884_v22  ;;  %v2886_v46 = vadd.f32 %v2758_v30, %v6859_v63  ;;  %v2888_v58 = vadd.f32 %v2760_v23, %v6862_v27  ;;  %v6908_v59 = vpop.f32.mrb[28].mxu0 }
 0x3a5   : > { %v6910_v8 = vpop.f32.mrb[28].mxu1  ;;  %v6912_v26 = vpop.eup %5079  ;;  %v3260_v24 = vadd.f32 1.0, %v5078_v10  ;;  %5091 = vtanh.f32 %v3010_v15  ;;  %v3011_v2 = vmul.f32 0.7978846, %v2883_v6  ;;  %v3013_v51 = vmul.f32 0.7978846, %v2885_v1 }
 0x3a6   : > { %v6914_v13 = vpop.f32.mrb[29].mxu0  ;;  %v6916_v31 = vpop.eup %5081  ;;  %v3386_v62 = vmul.f32 0.5, %v3258_v57  ;;  %5093 = vtanh.f32 %v3012_v37  ;;  %v3014_v22 = vmul.f32 0.7978846, %v2886_v46  ;;  %v3016_v30 = vmul.f32 0.7978846, %v2888_v58 }
 0x3a7   : > { %v6918_v33 = vpop.f32.mrb[29].mxu1  ;;  %v5084_v23 = vpop.eup %5083  ;;  %v3388_v11 = vmul.f32 0.5, %v3260_v24  ;;  %5095 = vtanh.f32 %v3011_v2  ;;  %v2631_v20 = vmul.f32 %v2503_v7, %v6896_v12  ;;  %v2505_v15 = vmul.f32 %v6900_v39, %v6900_v39 }
 0x3a8   : > { %v6923_v6 = vpop.f32.mrb[30].mxu0  ;;  %v6925_v1 = vpop.f32.mrb[30].mxu1  ;;  %v6928_v57 = vmul.f32 %v3386_v62, %v6787_v14  ;;  %v3262_v46 = vadd.f32 1.0, %v5084_v23  ;;  %5097 = vtanh.f32 %v3013_v51  ;;  %v6932_v37 = vadd.f32 %v6864_v16, %v6778_v19 }
 0x3a9   : > { %v5086_v10 = vpop.eup %5085  ;;  %v6934_v58 = vpop.f32.mrb[31].mxu0  ;;  %v6941_v2 = vmul.f32 %v3388_v11, %v6790_v21  ;;  %5099 = vtanh.f32 %v3014_v22  ;;  %v2759_v35 = vmul.f32 0.044715, %v2631_v20  ;;  %v2633_v51 = vmul.f32 %v2505_v15, %v6900_v39 }
 0x3aa   : > { %8929 = vst [vmem:[#allocation53_spill] sm:$0xff] %v6932_v37  ;;  %v6936_v7 = vpop.f32.mrb[31].mxu1  ;;  %v6938_v24 = vpop.eup %5087  ;;  %v3264_v3 = vadd.f32 1.0, %v5086_v10  ;;  %v3390_v62 = vmul.f32 0.5, %v3262_v46  ;;  %5101 = vtanh.f32 %v3016_v30  ;;  %v2506_v16 = vmul.f32 %v6932_v37, %v6932_v37 }
 0x3ab   : > { %v6943_v14 = vpop.eup %5089  ;;  %v2887_v56 = vadd.f32 %v2759_v35, %v6896_v12  ;;  %v6951_v47 = vadd.f32 %v6866_v28, %v6780_v4  ;;  %v6955_v11 = vadd.f32 %v6873_v38, %v6782_v44  ;;  %v2761_v21 = vmul.f32 0.044715, %v2633_v51 }
 0x3ac   : > { %v3392_v23 = vmul.f32 0.5, %v3264_v3  ;;  %v6958_v20 = vmul.f32 %v3390_v62, %v6803_v54  ;;  %v2634_v22 = vmul.f32 %v2506_v16, %v6932_v37  ;;  %v6963_v30 = vadd.f32 %v6875_v43, %v6784_v18  ;;  %v6965_v3 = vpop.f32.mrb[32].mxu0  ;;  %v6967_v35 = vpop.f32.mrb[32].mxu1 }
 0x3ad   : > { %8930 = vst [vmem:[#allocation54_spill] sm:$0xff] %v6951_v47  ;;  %8931 = vst [vmem:[#allocation55_spill] sm:$0xff] %v6955_v11  ;;  %v3015_v15 = vmul.f32 0.7978846, %v2887_v56  ;;  %v2508_v38 = vmul.f32 %v6951_v47, %v6951_v47  ;;  %v2507_v54 = vmul.f32 %v6955_v11, %v6955_v11  ;;  %v6976_v10 = vpop.f32.mrb[33].mxu0  ;;  %v6978_v46 = vpop.f32.mrb[33].mxu1  ;;  %v2889_v62 = vadd.f32 %v2761_v21, %v6900_v39 }
 0x3ae   : > { %8932 = vst [vmem:[#allocation56_spill] sm:$0xff] %v6963_v30  ;;  %v6970_v28 = vmul.f32 %v3392_v23, %v6806_v61  ;;  %v2762_v51 = vmul.f32 0.044715, %v2634_v22  ;;  %v2509_v61 = vmul.f32 %v6963_v30, %v6963_v30  ;;  %v6985_v56 = vpop.f32.mrb[34].mxu0  ;;  %v6987_v16 = vpop.f32.mrb[34].mxu1  ;;  %v7005_v25 = vadd.f32 %v6882_v29, %v6778_v19 }
 0x3af   : > { %v6989_v23 = vpop.eup %5091  ;;  %5103 = vtanh.f32 %v3015_v15  ;;  %v2636_v0 = vmul.f32 %v2508_v38, %v6951_v47  ;;  %v2635_v43 = vmul.f32 %v2507_v54, %v6955_v11  ;;  %v6995_v40 = vpop.f32.mrb[35].mxu0  ;;  %v3017_v9 = vmul.f32 0.7978846, %v2889_v62 }
 0x3b0   : > { %v6997_v21 = vpop.f32.mrb[35].mxu1  ;;  %v6999_v22 = vpop.eup %5093  ;;  %v2890_v34 = vadd.f32 %v2762_v51, %v6932_v37  ;;  %v2637_v41 = vmul.f32 %v2509_v61, %v6963_v30  ;;  %8934 = vst [vmem:[#allocation58_spill] sm:$0xff] %v7005_v25  ;;  %v7011_v54 = vadd.f32 %v6884_v45, %v6780_v4  ;;  %v7015_v32 = vadd.f32 %v6888_v49, %v6782_v44 }
 0x3b1   : > { %8933 = vst [vmem:[#allocation57_spill] sm:$0xff] %v6999_v22  ;;  %v7007_v15 = vpop.eup %5095  ;;  %v2764_v38 = vmul.f32 0.044715, %v2636_v0  ;;  %v2763_v36 = vmul.f32 0.044715, %v2635_v43  ;;  %5105 = vtanh.f32 %v3017_v9  ;;  %v2510_v29 = vmul.f32 %v7005_v25, %v7005_v25 }
 0x3b2   : > { %8935 = vst [vmem:[#allocation59_spill] sm:$0xff] %v7011_v54  ;;  %8936 = vst [vmem:[#allocation60_spill] sm:$0xff] %v7015_v32  ;;  %v7017_v62 = vpop.eup %5097  ;;  %v3018_v51 = vmul.f32 0.7978846, %v2890_v34  ;;  %v2765_v61 = vmul.f32 0.044715, %v2637_v41  ;;  %v2512_v45 = vmul.f32 %v7011_v54, %v7011_v54  ;;  %v2511_v49 = vmul.f32 %v7015_v32, %v7015_v32 }
 0x3b3   : > { %v7021_v37 = vpop.eup %5099  ;;  %v2892_v0 = vadd.f32 %v2764_v38, %v6951_v47  ;;  %v2891_v43 = vadd.f32 %v2763_v36, %v6955_v11  ;;  %v2638_v34 = vmul.f32 %v2510_v29, %v7005_v25  ;;  %v7035_v9 = vadd.f32 %v6890_v50, %v6784_v18 }
 0x3b4   : > { %8937 = vst [vmem:[#allocation61_spill] sm:$0xff] %v7021_v37  ;;  %v7029_v27 = vpop.eup %5101  ;;  %5107 = vtanh.f32 %v3018_v51  ;;  %v2893_v41 = vadd.f32 %v2765_v61, %v6963_v30  ;;  %v7037_v38 = vpop.f32.mrb[36].mxu0  ;;  %v2640_v17 = vmul.f32 %v2512_v45, %v7011_v54  ;;  %v2639_v63 = vmul.f32 %v2511_v49, %v7015_v32 }
 0x3b5   : > { %8938 = vst [vmem:[#allocation62_spill] sm:$0xff] %v7029_v27  ;;  %8939 = vst [vmem:[#allocation63_spill] sm:$0xff] %v7035_v9  ;;  %v7039_v36 = vpop.f32.mrb[36].mxu1  ;;  %v3020_v47 = vmul.f32 0.7978846, %v2892_v0  ;;  %v7043_v42 = vpop.f32.mrb[37].mxu0  ;;  %v2513_v50 = vmul.f32 %v7035_v9, %v7035_v9  ;;  %v7051_v30 = vadd.f32 %v6908_v59, %v6778_v19  ;;  %v7059_v49 = vadd.f32 %v6910_v8, %v6780_v4 }
 0x3b6   : > { %v3019_v11 = vmul.f32 0.7978846, %v2891_v43  ;;  %v7045_v51 = vpop.f32.mrb[37].mxu1  ;;  %v3021_v61 = vmul.f32 0.7978846, %v2893_v41  ;;  %v7053_v27 = vpop.f32.mrb[38].mxu0 }
 0x3b7   : > { %v2766_v29 = vmul.f32 0.044715, %v2638_v34  ;;  %8940 = vst [vmem:[#allocation64_spill] sm:$0xff] %v7051_v30  ;;  %v7055_v0 = vpop.f32.mrb[38].mxu1  ;;  %5109 = vtanh.f32 %v3020_v47  ;;  %v2768_v43 = vmul.f32 0.044715, %v2640_v17  ;;  %v2641_v59 = vmul.f32 %v2513_v50, %v7035_v9 }
 0x3b8   : > { %v2767_v45 = vmul.f32 0.044715, %v2639_v63  ;;  %8941 = vst [vmem:[#allocation65_spill] sm:$0xff] %v7059_v49  ;;  %v7061_v41 = vpop.f32.mrb[39].mxu0  ;;  %v7063_v34 = vpop.f32.mrb[39].mxu1  ;;  %5111 = vtanh.f32 %v3019_v11  ;;  %v2514_v39 = vmul.f32 %v7051_v30, %v7051_v30  ;;  %v2516_v63 = vmul.f32 %v7059_v49, %v7059_v49 }
 0x3b9   : > { %v2894_v22 = vadd.f32 %v2766_v29, %v7005_v25  ;;  %v7069_v37 = vpop.eup %5103  ;;  %5113 = vtanh.f32 %v3021_v61  ;;  %v2896_v47 = vadd.f32 %v2768_v43, %v7011_v54  ;;  %v2769_v60 = vmul.f32 0.044715, %v2641_v59 }
 0x3ba   : > { %v2895_v17 = vadd.f32 %v2767_v45, %v7015_v32  ;;  %v2642_v11 = vmul.f32 %v2514_v39, %v7051_v30  ;;  %v7078_v29 = vadd.f32 %v6914_v13, %v6782_v44  ;;  %v2644_v12 = vmul.f32 %v2516_v63, %v7059_v49 }
 0x3bb   : > { %v3022_v8 = vmul.f32 0.7978846, %v2894_v22  ;;  %v3024_v50 = vmul.f32 0.7978846, %v2896_v47  ;;  %v7083_v61 = vadd.f32 %v6918_v33, %v6784_v18  ;;  %v7085_v43 = vpop.eup %5105  ;;  %v2897_v22 = vadd.f32 %v2769_v60, %v7035_v9 }
 0x3bc   : > { %8942 = vst [vmem:[#allocation66_spill] sm:$0xff] %v7078_v29  ;;  %v3023_v25 = vmul.f32 0.7978846, %v2895_v17  ;;  %v2770_v45 = vmul.f32 0.044715, %v2642_v11  ;;  %v2515_v39 = vmul.f32 %v7078_v29, %v7078_v29  ;;  %v7090_v59 = vpop.f32.mrb[40].mxu0  ;;  %v7098_v33 = vadd.f32 %v6923_v6, %v6778_v19 }
 0x3bd   : > { %8943 = vst [vmem:[#allocation67_spill] sm:$0xff] %v7083_v61  ;;  %5115 = vtanh.f32 %v3022_v8  ;;  %v7092_v13 = vpop.f32.mrb[40].mxu1  ;;  %v2772_v47 = vmul.f32 0.044715, %v2644_v12  ;;  %v2517_v17 = vmul.f32 %v7083_v61, %v7083_v61  ;;  %v7100_v63 = vpop.f32.mrb[41].mxu0 }
 0x3be   : > { %5117 = vtanh.f32 %v3024_v50  ;;  %8944 = vst [vmem:[#allocation68_spill] sm:$0xff] %v7098_v33  ;;  %8945 = vst [vmem:[#allocation69_spill] sm:$0xff] %v7100_v63  ;;  %v7102_v60 = vpop.f32.mrb[41].mxu1  ;;  %v7104_v8 = vpop.eup %5107  ;;  %v3025_v11 = vmul.f32 0.7978846, %v2897_v22  ;;  %v2898_v54 = vadd.f32 %v2770_v45, %v7051_v30  ;;  %v2643_v50 = vmul.f32 %v2515_v39, %v7078_v29 }
 0x3bf   : > { %8946 = vst [vmem:[#allocation70_spill] sm:$0xff] %v7104_v8  ;;  %5119 = vtanh.f32 %v3023_v25  ;;  %v7108_v12 = vpop.f32.mrb[42].mxu0  ;;  %v7110_v9 = vpop.f32.mrb[42].mxu1  ;;  %v2900_v32 = vadd.f32 %v2772_v47, %v7059_v49  ;;  %v2645_v6 = vmul.f32 %v2517_v17, %v7083_v61  ;;  %v2518_v63 = vmul.f32 %v7098_v33, %v7098_v33 }
 0x3c0   : > { %8947 = vst [vmem:[#allocation71_spill] sm:$0xff] %v7108_v12  ;;  %8948 = vst [vmem:[#allocation72_spill] sm:$0xff] %v7110_v9  ;;  %v7118_v8 = vadd.f32 %v6925_v1, %v6780_v4  ;;  %v7120_v25 = vpop.f32.mrb[43].mxu0  ;;  %v7122_v22 = vpop.f32.mrb[43].mxu1  ;;  %5121 = vtanh.f32 %v3025_v11  ;;  %v3026_v45 = vmul.f32 0.7978846, %v2898_v54  ;;  %v7126_v30 = vadd.f32 %v6934_v58, %v6782_v44 }
 0x3c1   : > { %v2771_v39 = vmul.f32 0.044715, %v2643_v50  ;;  %v7128_v47 = vpop.eup %5109  ;;  %v3028_v17 = vmul.f32 0.7978846, %v2900_v32  ;;  %v2773_v49 = vmul.f32 0.044715, %v2645_v6  ;;  %v2646_v9 = vmul.f32 %v2518_v63, %v7098_v33 }
 0x3c2   : > { %8949 = vst [vmem:[#allocation73_spill] sm:$0xff] %v7118_v8  ;;  %8950 = vst [vmem:[#allocation74_spill] sm:$0xff] %v7126_v30  ;;  %v2520_v1 = vmul.f32 %v7118_v8, %v7118_v8  ;;  %v7133_v12 = vpop.eup %5111  ;;  %5123 = vtanh.f32 %v3026_v45  ;;  %v2519_v54 = vmul.f32 %v7126_v30, %v7126_v30  ;;  %v7140_v58 = vadd.f32 %v6936_v7, %v6784_v18 }
 0x3c3   : > { %8951 = vst [vmem:[#allocation75_spill] sm:$0xff] %v7128_v47  ;;  %8952 = vst [vmem:[#allocation76_spill] sm:$0xff] %v7133_v12  ;;  %v2899_v11 = vadd.f32 %v2771_v39, %v7078_v29  ;;  %v7142_v50 = vpop.eup %5113  ;;  %5125 = vtanh.f32 %v3028_v17  ;;  %v2901_v32 = vadd.f32 %v2773_v49, %v7083_v61  ;;  %v2774_v63 = vmul.f32 0.044715, %v2646_v9 }
 0x3c4   : > { %8953 = vst [vmem:[#allocation77_spill] sm:$0xff] %v7140_v58  ;;  %v2648_v6 = vmul.f32 %v2520_v1, %v7118_v8  ;;  %v2647_v45 = vmul.f32 %v2519_v54, %v7126_v30  ;;  %v2521_v39 = vmul.f32 %v7140_v58, %v7140_v58  ;;  %v7151_v29 = vadd.f32 %v6965_v3, %v6778_v19  ;;  %v7153_v7 = vpop.f32.mrb[44].mxu0  ;;  %v7155_v12 = vpop.f32.mrb[44].mxu1 }
 0x3c5   : > { %v3027_v47 = vmul.f32 0.7978846, %v2899_v11  ;;  %8955 = vst [vmem:[#allocation79_spill] sm:$0xff] %v7153_v7  ;;  %8956 = vst [vmem:[#allocation80_spill] sm:$0xff] %v7155_v12  ;;  %v3029_v17 = vmul.f32 0.7978846, %v2901_v32  ;;  %v2902_v49 = vadd.f32 %v2774_v63, %v7098_v33  ;;  %v7160_v1 = vadd.f32 %v6967_v35, %v6780_v4 }
 0x3c6   : > { %8954 = vst [vmem:[#allocation78_spill] sm:$0xff] %v7151_v29  ;;  %v2776_v9 = vmul.f32 0.044715, %v2648_v6  ;;  %v7162_v11 = vpop.f32.mrb[45].mxu0  ;;  %v7164_v54 = vpop.f32.mrb[45].mxu1  ;;  %v2649_v7 = vmul.f32 %v2521_v39, %v7140_v58  ;;  %v2522_v32 = vmul.f32 %v7151_v29, %v7151_v29 }
 0x3c7   : > { %8957 = vst [vmem:[#allocation81_spill] sm:$0xff] %v7160_v1  ;;  %8958 = vst [vmem:[#allocation82_spill] sm:$0xff] %v7162_v11  ;;  %v7166_v61 = vpop.eup %5115  ;;  %5127 = vtanh.f32 %v3027_v47  ;;  %v2775_v3 = vmul.f32 0.044715, %v2647_v45  ;;  %v7171_v12 = vpop.f32.mrb[46].mxu0 }
 0x3c8   : > { %8959 = vst [vmem:[#allocation83_spill] sm:$0xff] %v7164_v54  ;;  %8960 = vst [vmem:[#allocation84_spill] sm:$0xff] %v7171_v12  ;;  %v7173_v63 = vpop.f32.mrb[46].mxu1  ;;  %v7175_v6 = vpop.eup %5117  ;;  %5129 = vtanh.f32 %v3029_v17  ;;  %v3030_v35 = vmul.f32 0.7978846, %v2902_v49  ;;  %v2904_v33 = vadd.f32 %v2776_v9, %v7118_v8  ;;  %v2524_v54 = vmul.f32 %v7160_v1, %v7160_v1 }
 0x3c9   : > { %8961 = vst [vmem:[#allocation85_spill] sm:$0xff] %v7173_v63  ;;  %v7180_v47 = vpop.f32.mrb[47].mxu0  ;;  %v7182_v45 = vpop.f32.mrb[47].mxu1  ;;  %v2903_v11 = vadd.f32 %v2775_v3, %v7126_v30  ;;  %v2777_v12 = vmul.f32 0.044715, %v2649_v7  ;;  %v2650_v63 = vmul.f32 %v2522_v32, %v7151_v29  ;;  %v7190_v17 = vadd.f32 %v6976_v10, %v6782_v44 }
 0x3ca   : > { %8962 = vst [vmem:[#allocation86_spill] sm:$0xff] %v7180_v47  ;;  %8963 = vst [vmem:[#allocation87_spill] sm:$0xff] %v7182_v45  ;;  %v7184_v39 = vpop.eup %5119  ;;  %5131 = vtanh.f32 %v3030_v35  ;;  %v3032_v49 = vmul.f32 0.7978846, %v2904_v33  ;;  %v2652_v9 = vmul.f32 %v2524_v54, %v7160_v1  ;;  %v7195_v8 = vadd.f32 %v6978_v46, %v6784_v18 }
 0x3cb   : > { %8964 = vst [vmem:[#allocation88_spill] sm:$0xff] %v7190_v17  ;;  %v7197_v45 = vpop.eup %5121  ;;  %v3031_v47 = vmul.f32 0.7978846, %v2903_v11  ;;  %v2905_v3 = vadd.f32 %v2777_v12, %v7140_v58  ;;  %v2778_v7 = vmul.f32 0.044715, %v2650_v63  ;;  %v2523_v32 = vmul.f32 %v7190_v17, %v7190_v17 }
 0x3cc   : > { %8965 = vst [vmem:[#allocation89_spill] sm:$0xff] %v7195_v8  ;;  %5133 = vtanh.f32 %v3032_v49  ;;  %v2780_v10 = vmul.f32 0.044715, %v2652_v9  ;;  %v2525_v33 = vmul.f32 %v7195_v8, %v7195_v8  ;;  %v7206_v54 = vadd.f32 %v6985_v56, %v6778_v19  ;;  %v7208_v46 = vpop.eup %5123  ;;  %v7212_v63 = vpop.f32.mrb[48].mxu0 }
 0x3cd   : > { %8967 = vst [vmem:[#allocation91_spill] sm:$0xff] %v7208_v46  ;;  %5135 = vtanh.f32 %v3031_v47  ;;  %v3033_v35 = vmul.f32 0.7978846, %v2905_v3  ;;  %v2906_v11 = vadd.f32 %v2778_v7, %v7151_v29  ;;  %v2651_v12 = vmul.f32 %v2523_v32, %v7190_v17  ;;  %8968 = vst [vmem:[#allocation92_spill] sm:$0xff] %v7212_v63  ;;  %v7214_v58 = vpop.f32.mrb[48].mxu1  ;;  %v7216_v49 = vpop.eup %5125 }
 0x3ce   : > { %8966 = vst [vmem:[#allocation90_spill] sm:$0xff] %v7206_v54  ;;  %8969 = vst [vmem:[#allocation93_spill] sm:$0xff] %v7214_v58  ;;  %v2908_v9 = vadd.f32 %v2780_v10, %v7160_v1  ;;  %v2653_v30 = vmul.f32 %v2525_v33, %v7195_v8  ;;  %v2526_v56 = vmul.f32 %v7206_v54, %v7206_v54  ;;  %v7226_v3 = vpop.f32.mrb[49].mxu0  ;;  %v7228_v7 = vpop.f32.mrb[49].mxu1 }
 0x3cf   : > { %8970 = vst [vmem:[#allocation94_spill] sm:$0xff] %v7216_v49  ;;  %v7224_v47 = vadd.f32 %v6987_v16, %v6780_v4  ;;  %8972 = vst [vmem:[#allocation96_spill] sm:$0xff] %v7226_v3  ;;  %5137 = vtanh.f32 %v3033_v35  ;;  %v3034_v32 = vmul.f32 0.7978846, %v2906_v11  ;;  %v2779_v29 = vmul.f32 0.044715, %v2651_v12 }
 0x3d0   : > { %8973 = vst [vmem:[#allocation97_spill] sm:$0xff] %v7228_v7  ;;  %v7232_v58 = vadd.f32 %v6995_v40, %v6782_v44  ;;  %v7234_v10 = vpop.f32.mrb[50].mxu0  ;;  %v7236_v33 = vpop.f32.mrb[50].mxu1  ;;  %v3036_v1 = vmul.f32 0.7978846, %v2908_v9  ;;  %v2654_v16 = vmul.f32 %v2526_v56, %v7206_v54 }
 0x3d1   : > { %8971 = vst [vmem:[#allocation95_spill] sm:$0xff] %v7224_v47  ;;  %8974 = vst [vmem:[#allocation98_spill] sm:$0xff] %v7234_v10  ;;  %v2781_v63 = vmul.f32 0.044715, %v2653_v30  ;;  %v2528_v3 = vmul.f32 %v7224_v47, %v7224_v47  ;;  %v7241_v49 = vpop.f32.mrb[51].mxu0  ;;  %v7243_v35 = vpop.f32.mrb[51].mxu1  ;;  %5139 = vtanh.f32 %v3034_v32  ;;  %v2907_v40 = vadd.f32 %v2779_v29, %v7190_v17 }
 0x3d2   : > { %8975 = vst [vmem:[#allocation99_spill] sm:$0xff] %v7236_v33  ;;  %8976 = vst [vmem:[#allocation100_spill] sm:$0xff] %v7241_v49  ;;  %v7245_v11 = vpop.eup %5127  ;;  %v2527_v12 = vmul.f32 %v7232_v58, %v7232_v58  ;;  %v7252_v30 = vadd.f32 %v6997_v21, %v6784_v18  ;;  %5141 = vtanh.f32 %v3036_v1  ;;  %v2782_v49 = vmul.f32 0.044715, %v2654_v16 }
 0x3d3   : > { %8977 = vst [vmem:[#allocation101_spill] sm:$0xff] %v7243_v35  ;;  %v7254_v9 = vpop.eup %5129  ;;  %v2909_v56 = vadd.f32 %v2781_v63, %v7195_v8  ;;  %v2656_v35 = vmul.f32 %v2528_v3, %v7224_v47  ;;  %v3035_v33 = vmul.f32 0.7978846, %v2907_v40  ;;  %v3259_v17 = vadd.f32 1.0, %v6912_v26 }
 0x3d4   : > { %v2655_v32 = vmul.f32 %v2527_v12, %v7232_v58  ;;  %v2529_v29 = vmul.f32 %v7252_v30, %v7252_v30  ;;  %v7262_v10 = vpop.eup %5131  ;;  %v2910_v7 = vadd.f32 %v2782_v49, %v7206_v54  ;;  %v3263_v1 = vadd.f32 1.0, %v6938_v24  ;;  %v7267_v40 = vpop.f32.mrb[52].mxu0 }
 0x3d5   : > { %8978 = vst [vmem:[#allocation102_spill] sm:$0xff] %v7262_v10  ;;  %v3037_v21 = vmul.f32 0.7978846, %v2909_v56  ;;  %v2784_v46 = vmul.f32 0.044715, %v2656_v35  ;;  %5143 = vtanh.f32 %v3035_v33  ;;  %v3387_v16 = vmul.f32 0.5, %v3259_v17 }
 0x3d6   : > { %v2783_v63 = vmul.f32 0.044715, %v2655_v32  ;;  %v2657_v3 = vmul.f32 %v2529_v29, %v7252_v30  ;;  %v7269_v12 = vpop.f32.mrb[52].mxu1  ;;  %v7271_v8 = vpop.eup %5133  ;;  %v3038_v26 = vmul.f32 0.7978846, %v2910_v7  ;;  %v3391_v10 = vmul.f32 0.5, %v3263_v1 }
 0x3d7   : > { %5145 = vtanh.f32 %v3037_v21  ;;  %v2912_v56 = vadd.f32 %v2784_v46, %v7224_v47  ;;  %v7274_v49 = vpop.f32.mrb[53].mxu0  ;;  %v7276_v35 = vpop.f32.mrb[53].mxu1  ;;  %v3515_v32 = vmul.f32 %v3387_v16, %v6793_v55  ;;  %v3261_v29 = vadd.f32 1.0, %v6916_v31 }
 0x3d8   : > { %8979 = vst [vmem:[#allocation103_spill] sm:$0xff] %v7276_v35  ;;  %v7278_v24 = vpop.eup %5135  ;;  %v2911_v33 = vadd.f32 %v2783_v63, %v7232_v58  ;;  %v2785_v17 = vmul.f32 0.044715, %v2657_v3  ;;  %v7283_v54 = vpop.f32.mrb[54].mxu0  ;;  %5147 = vtanh.f32 %v3038_v26  ;;  %v3519_v7 = vmul.f32 %v3391_v10, %v6813_v5 }
 0x3d9   : > { %v7285_v21 = vpop.f32.mrb[54].mxu1  ;;  %v3040_v46 = vmul.f32 0.7978846, %v2912_v56  ;;  %v3265_v1 = vadd.f32 1.0, %v6943_v14  ;;  %v7289_v35 = vpop.f32.mrb[55].mxu0  ;;  %v3389_v31 = vmul.f32 0.5, %v3261_v29  ;;  %v7298_v16 = vadd.f32 %v7037_v38, %v6778_v19 }
 0x3da   : > { %8980 = vst [vmem:[#allocation104_spill] sm:$0xff] %v7289_v35  ;;  %v7291_v47 = vpop.f32.mrb[55].mxu1  ;;  %v7293_v63 = vpop.eup %5137  ;;  %v3039_v3 = vmul.f32 0.7978846, %v2911_v33  ;;  %v2913_v55 = vadd.f32 %v2785_v17, %v7252_v30  ;;  %v3643_v26 = vpack.c.bf16 %v3519_v7, %v3515_v32  ;;  %v7302_v5 = vadd.f32 %v7039_v36, %v6780_v4 }
 0x3db   : > { %8981 = vst [vmem:[#allocation105_spill] sm:$0xff] %v7291_v47  ;;  %8982 = vst [vmem:[#allocation106_spill] sm:$0xff] %v7298_v16  ;;  %5149 = vtanh.f32 %v3040_v46  ;;  %v3393_v56 = vmul.f32 0.5, %v3265_v1  ;;  %v7304_v14 = vpop.eup %5139  ;;  %v3517_v33 = vmul.f32 %v3389_v31, %v6796_v48  ;;  %v2530_v17 = vmul.f32 %v7298_v16, %v7298_v16 }
 0x3dc   : > { %8983 = vst [vmem:[#allocation107_spill] sm:$0xff] %v7302_v5  ;;  %5151 = vtanh.f32 %v3039_v3  ;;  %v3041_v10 = vmul.f32 0.7978846, %v2913_v55  ;;  %v7309_v29 = vpop.eup %5141  ;;  %4001 = vmatprep.mubr.bf16.mxu0 %v3643_v26  ;;  %v2532_v32 = vmul.f32 %v7302_v5, %v7302_v5  ;;  %v7316_v36 = vadd.f32 %v7043_v42, %v6782_v44  ;;  %v7334_v42 = vpop.f32.mrb[56].mxu0 }
 0x3dd   : > { %v3521_v38 = vmul.f32 %v3393_v56, %v6816_v53  ;;  %v7320_v46 = vadd.f32 %v7045_v51, %v6784_v18  ;;  %v8985_v48 = vpack.c.bf16 %v6958_v20, %v6928_v57  ;;  %v2658_v7 = vmul.f32 %v2530_v17, %v7298_v16  ;;  %8988 = vst [vmem:[#allocation111_spill] sm:$0xff] %v7334_v42  ;;  %v7336_v3 = vpop.f32.mrb[56].mxu1  ;;  %v7343_v31 = vpop.f32.mrb[57].mxu0 }
 0x3de   : > { %5153 = vtanh.f32 %v3041_v10  ;;  %v7328_v53 = vadd.f32 %v7053_v27, %v6778_v19  ;;  %v7332_v1 = vadd.f32 %v7055_v0, %v6780_v4  ;;  %8989 = vst [vmem:[#allocation112_spill] sm:$0xff] %v7336_v3  ;;  %v2660_v55 = vmul.f32 %v2532_v32, %v7302_v5  ;;  %8990 = vst [vmem:[#allocation113_spill] sm:$0xff] %v7343_v31  ;;  %v7345_v27 = vpop.f32.mrb[57].mxu1  ;;  %v7357_v17 = vpop.f32.mrb[58].mxu0 }
 0x3df   : > { %8984 = vst [vmem:[#allocation108_spill] sm:$0xff] %v7320_v46  ;;  %4002 = vmatmul.mubr.bf16.vlgmr.msra.gmra.mrb[80].mxu0 %v8985_v48  ;;  %v3645_v51 = vpack.c.bf16 %v3521_v38, %v3517_v33  ;;  %v2531_v57 = vmul.f32 %v7316_v36, %v7316_v36  ;;  %v2533_v20 = vmul.f32 %v7320_v46, %v7320_v46  ;;  %8991 = vst [vmem:[#allocation114_spill] sm:$0xff] %v7345_v27  ;;  %v7347_v26 = vpop.eup %5143  ;;  %v7359_v38 = vpop.f32.mrb[58].mxu1 }
 0x3e0   : > { %8986 = vst [vmem:[#allocation109_spill] sm:$0xff] %v7328_v53  ;;  %8987 = vst [vmem:[#allocation110_spill] sm:$0xff] %v7332_v1  ;;  %v2786_v0 = vmul.f32 0.044715, %v2658_v7  ;;  %v2534_v56 = vmul.f32 %v7328_v53, %v7328_v53  ;;  %v2536_v10 = vmul.f32 %v7332_v1, %v7332_v1  ;;  %v7355_v33 = vadd.f32 %v7061_v41, %v6782_v44  ;;  %v7369_v3 = vpop.f32.mrb[59].mxu0  ;;  %v7371_v41 = vpop.f32.mrb[59].mxu1 }
 0x3e1   : > { %8992 = vst [vmem:[#allocation115_spill] sm:$0xff] %v7357_v17  ;;  %8993 = vst [vmem:[#allocation116_spill] sm:$0xff] %v7359_v38  ;;  %v7361_v32 = vpop.eup %5145  ;;  %4162 = vmatprep.mubr.bf16.mxu1 %v3645_v51  ;;  %v2788_v48 = vmul.f32 0.044715, %v2660_v55  ;;  %v2659_v7 = vmul.f32 %v2531_v57, %v7316_v36  ;;  %v2661_v27 = vmul.f32 %v2533_v20, %v7320_v46 }
 0x3e2   : > { %v7367_v31 = vadd.f32 %v7063_v34, %v6784_v18  ;;  %8995 = vst [vmem:[#allocation118_spill] sm:$0xff] %v7369_v3  ;;  %8996 = vst [vmem:[#allocation119_spill] sm:$0xff] %v7371_v41  ;;  %v8997_v17 = vpack.c.bf16 %v6970_v28, %v6941_v2  ;;  %v2914_v38 = vadd.f32 %v2786_v0, %v7298_v16  ;;  %v7381_v20 = vpop.eup %5147 }
 0x3e3   : > { %v2662_v51 = vmul.f32 %v2534_v56, %v7328_v53  ;;  %v2664_v55 = vmul.f32 %v2536_v10, %v7332_v1  ;;  %v2535_v57 = vmul.f32 %v7355_v33, %v7355_v33  ;;  %v2916_v34 = vadd.f32 %v2788_v48, %v7302_v5 }
 0x3e4   : > { %8994 = vst [vmem:[#allocation117_spill] sm:$0xff] %v7367_v31  ;;  %4163 = vmatmul.mubr.bf16.vlgmr.msra.gmra.mrb[80].mxu1 %v8997_v17  ;;  %v2787_v3 = vmul.f32 0.044715, %v2659_v7  ;;  %v2789_v42 = vmul.f32 0.044715, %v2661_v27  ;;  %v2537_v41 = vmul.f32 %v7367_v31, %v7367_v31 }
 0x3e5   : > { %v3042_v2 = vmul.f32 0.7978846, %v2914_v38  ;;  %v2790_v28 = vmul.f32 0.044715, %v2662_v51  ;;  %v2792_v17 = vmul.f32 0.044715, %v2664_v55  ;;  %v2663_v0 = vmul.f32 %v2535_v57, %v7355_v33  ;;  %v7387_v56 = vpop.eup %5149 }
 0x3e6   : > { %v3044_v10 = vmul.f32 0.7978846, %v2916_v34  ;;  %v2915_v16 = vadd.f32 %v2787_v3, %v7316_v36  ;;  %v2917_v47 = vadd.f32 %v2789_v42, %v7320_v46  ;;  %v2665_v35 = vmul.f32 %v2537_v41, %v7367_v31  ;;  %v7392_v48 = vpop.eup %5151  ;;  %v7396_v51 = vpop.f32.mrb[60].mxu0 }
 0x3e7   : > { %5155 = vtanh.f32 %v3042_v2  ;;  %v2918_v27 = vadd.f32 %v2790_v28, %v7328_v53  ;;  %v2920_v38 = vadd.f32 %v2792_v17, %v7332_v1  ;;  %v2791_v7 = vmul.f32 0.044715, %v2663_v0  ;;  %8998 = vst [vmem:[#allocation120_spill] sm:$0xff] %v7396_v51  ;;  %v7398_v55 = vpop.f32.mrb[60].mxu1  ;;  %v7404_v28 = vpop.f32.mrb[61].mxu0  ;;  %v9011_v51 = vld [vmem:[#allocation62_spill] sm:$0xff] }
 0x3e8   : > { %8999 = vst [vmem:[#allocation121_spill] sm:$0xff] %v7398_v55  ;;  %5157 = vtanh.f32 %v3044_v10  ;;  %v3043_v57 = vmul.f32 0.7978846, %v2915_v16  ;;  %v3045_v34 = vmul.f32 0.7978846, %v2917_v47  ;;  %v7400_v5 = vpop.eup %5153  ;;  %v3267_v2 = vadd.f32 1.0, %v7007_v15 }
 0x3e9   : > { %v2793_v3 = vmul.f32 0.044715, %v2665_v35  ;;  %v3046_v42 = vmul.f32 0.7978846, %v2918_v27  ;;  %v3048_v41 = vmul.f32 0.7978846, %v2920_v38  ;;  %v2919_v46 = vadd.f32 %v2791_v7, %v7355_v33 }
 0x3ea   : > { %9000 = vst [vmem:[#allocation122_spill] sm:$0xff] %v7404_v28  ;;  %5159 = vtanh.f32 %v3043_v57  ;;  %v3271_v0 = vadd.f32 1.0, %v7069_v37  ;;  %v3269_v10 = vadd.f32 1.0, %v7017_v62  ;;  %v7409_v16 = vpop.f32.mrb[61].mxu1  ;;  %v7411_v47 = vpop.f32.mrb[62].mxu0  ;;  %v3395_v27 = vmul.f32 0.5, %v3267_v2 }
 0x3eb   : > { %v2921_v17 = vadd.f32 %v2793_v3, %v7367_v31  ;;  %9001 = vst [vmem:[#allocation123_spill] sm:$0xff] %v7409_v16  ;;  %9002 = vst [vmem:[#allocation124_spill] sm:$0xff] %v7411_v47  ;;  %5161 = vtanh.f32 %v3045_v34  ;;  %v3047_v35 = vmul.f32 0.7978846, %v2919_v46  ;;  %v3273_v38 = vadd.f32 1.0, %v7085_v43  ;;  %v7414_v7 = vpop.f32.mrb[62].mxu1 }
 0x3ec   : > { %9003 = vst [vmem:[#allocation125_spill] sm:$0xff] %v7414_v7  ;;  %v7416_v15 = vpop.f32.mrb[63].mxu0  ;;  %5163 = vtanh.f32 %v3046_v42  ;;  %v3399_v3 = vmul.f32 0.5, %v3271_v0  ;;  %v3397_v28 = vmul.f32 0.5, %v3269_v10  ;;  %v7418_v37 = vpop.f32.mrb[63].mxu1  ;;  %v3523_v62 = vmul.f32 %v3395_v27, %v6851_v52  ;;  %v9006_v46 = vld [vmem:[#allocation51_spill] sm:$0xff] }
 0x3ed   : > { %9004 = vst [vmem:[#allocation126_spill] sm:$0xff] %v7416_v15  ;;  %v3049_v57 = vmul.f32 0.7978846, %v2921_v17  ;;  %9005 = vst [vmem:[#allocation127_spill] sm:$0xff] %v7418_v37  ;;  %5165 = vtanh.f32 %v3048_v41  ;;  %v3401_v16 = vmul.f32 0.5, %v3273_v38  ;;  %v3266_v34 = vadd.f32 1.0, %v6989_v23 }
 0x3ee   : > { %5167 = vtanh.f32 %v3047_v35  ;;  %v3527_v2 = vmul.f32 %v3399_v3, %v9006_v46  ;;  %v9007_v43 = vld [vmem:[#allocation48_spill] sm:$0xff]  ;;  %v9008_v7 = vld [vmem:[#allocation61_spill] sm:$0xff]  ;;  %v3272_v52 = vadd.f32 1.0, %v9011_v51  ;;  %v7430_v23 = vadd.f32 %v7090_v59, %v6778_v19 }
 0x3ef   : > { %v3525_v47 = vmul.f32 %v3397_v28, %v9007_v43  ;;  %v3270_v55 = vadd.f32 1.0, %v9008_v7  ;;  %5169 = vtanh.f32 %v3049_v57  ;;  %v9009_v42 = vld [vmem:[#allocation52_spill] sm:$0xff]  ;;  %v3394_v0 = vmul.f32 0.5, %v3266_v34  ;;  %v9010_v10 = vld [vmem:[#allocation57_spill] sm:$0xff]  ;;  %v9013_v28 = vld [vmem:[#allocation46_spill] sm:$0xff] }
 0x3f0   : > { %v3529_v17 = vmul.f32 %v3401_v16, %v9009_v42  ;;  %v3268_v15 = vadd.f32 1.0, %v9010_v10  ;;  %v3647_v37 = vpack.c.bf16 %v3527_v2, %v3523_v62  ;;  %9012 = vst [vmem:[#allocation51_spill] sm:$0xff] %v7430_v23  ;;  %v7437_v16 = vadd.f32 %v7092_v13, %v6780_v4  ;;  %v9016_v62 = vld [vmem:[#allocation69_spill] sm:$0xff] }
 0x3f1   : > { %v3398_v41 = vmul.f32 0.5, %v3270_v55  ;;  %v7432_v35 = vpop.eup %5155  ;;  %v3522_v38 = vmul.f32 %v3394_v0, %v9013_v28  ;;  %v9015_v55 = vld [vmem:[#allocation49_spill] sm:$0xff]  ;;  %v3400_v51 = vmul.f32 0.5, %v3272_v52  ;;  %v2538_v59 = vmul.f32 %v7430_v23, %v7430_v23 }
 0x3f2   : > { %v3649_v27 = vpack.c.bf16 %v3529_v17, %v3525_v47  ;;  %v3396_v7 = vmul.f32 0.5, %v3268_v15  ;;  %9014 = vst [vmem:[#allocation48_spill] sm:$0xff] %v7437_v16  ;;  %v7439_v57 = vpop.eup %5157  ;;  %4009 = vmatprep.mubr.bf16.mxu0 %v3647_v37  ;;  %v7446_v34 = vadd.f32 %v9016_v62, %v6782_v44  ;;  %v9018_v47 = vld [vmem:[#allocation47_spill] sm:$0xff]  ;;  %v2540_v13 = vmul.f32 %v7437_v16, %v7437_v16  ;;  %v9022_v17 = vld [vmem:[#allocation50_spill] sm:$0xff] }
 0x3f3   : > { %v3526_v3 = vmul.f32 %v3398_v41, %v9015_v55  ;;  %v7453_v46 = vadd.f32 %v7102_v60, %v6784_v18  ;;  %v9020_v37 = vld [vmem:[#allocation71_spill] sm:$0xff]  ;;  %v3528_v0 = vmul.f32 %v3400_v51, %v9022_v17  ;;  %v2666_v10 = vmul.f32 %v2538_v59, %v7430_v23  ;;  %v7476_v55 = vpop.f32.mrb[64].mxu0 }
 0x3f4   : > { %9017 = vst [vmem:[#allocation61_spill] sm:$0xff] %v7446_v34  ;;  %4170 = vmatprep.mubr.bf16.mxu1 %v3649_v27  ;;  %v3524_v15 = vmul.f32 %v3396_v7, %v9018_v47  ;;  %v7457_v2 = vadd.f32 %v9020_v37, %v6778_v19  ;;  %v7459_v43 = vpop.eup %5159  ;;  %v2539_v41 = vmul.f32 %v7446_v34, %v7446_v34  ;;  %v9023_v7 = vld [vmem:[#allocation72_spill] sm:$0xff]  ;;  %9025 = vst [vmem:[#allocation46_spill] sm:$0xff] %v7476_v55 }
 0x3f5   : > { %9019 = vst [vmem:[#allocation52_spill] sm:$0xff] %v7453_v46  ;;  %v3646_v42 = vpack.c.bf16 %v3526_v3, %v3522_v38  ;;  %v7465_v52 = vpop.eup %5161  ;;  %v2668_v27 = vmul.f32 %v2540_v13, %v7437_v16  ;;  %v2541_v60 = vmul.f32 %v7453_v46, %v7453_v46  ;;  %v7474_v38 = vadd.f32 %v9023_v7, %v6780_v4 }
 0x3f6   : > { %9021 = vst [vmem:[#allocation57_spill] sm:$0xff] %v7457_v2  ;;  %v2542_v28 = vmul.f32 %v7457_v2, %v7457_v2  ;;  %v7478_v3 = vpop.eup %5163  ;;  %v3648_v51 = vpack.c.bf16 %v3528_v0, %v3524_v15  ;;  %v2794_v59 = vmul.f32 0.044715, %v2666_v10  ;;  %v2667_v62 = vmul.f32 %v2539_v41, %v7446_v34 }
 0x3f7   : > { %9024 = vst [vmem:[#allocation62_spill] sm:$0xff] %v7474_v38  ;;  %4010 = vmatmul.mubr.bf16.gmra.mrb[84].mxu0 %v3646_v42  ;;  %v7483_v47 = vadd.f32 %v7120_v25, %v6782_v44  ;;  %v7485_v13 = vpop.eup %5165  ;;  %v2796_v37 = vmul.f32 0.044715, %v2668_v27  ;;  %v2669_v17 = vmul.f32 %v2541_v60, %v7453_v46  ;;  %v2544_v55 = vmul.f32 %v7474_v38, %v7474_v38 }
 0x3f8   : > { %9027 = vst [vmem:[#allocation69_spill] sm:$0xff] %v7485_v13  ;;  %v2670_v7 = vmul.f32 %v2542_v28, %v7457_v2  ;;  %v7491_v1 = vpop.eup %5167  ;;  %4171 = vmatmul.mubr.bf16.gmra.mrb[84].mxu1 %v3648_v51  ;;  %v2922_v15 = vadd.f32 %v2794_v59, %v7430_v23  ;;  %v2795_v42 = vmul.f32 0.044715, %v2667_v62  ;;  %v7498_v0 = vadd.f32 %v7122_v22, %v6784_v18  ;;  %v7508_v23 = vpop.f32.mrb[64].mxu1 }
 0x3f9   : > { %9026 = vst [vmem:[#allocation49_spill] sm:$0xff] %v7483_v47  ;;  %v2543_v25 = vmul.f32 %v7483_v47, %v7483_v47  ;;  %v7500_v10 = vpop.eup %5169  ;;  %v2924_v41 = vadd.f32 %v2796_v37, %v7437_v16  ;;  %v2797_v27 = vmul.f32 0.044715, %v2669_v17  ;;  %v2672_v28 = vmul.f32 %v2544_v55, %v7474_v38  ;;  %9029 = vst [vmem:[#allocation71_spill] sm:$0xff] %v7508_v23  ;;  %v7512_v17 = vpop.f32.mrb[65].mxu0 }
 0x3fa   : > { %9028 = vst [vmem:[#allocation47_spill] sm:$0xff] %v7498_v0  ;;  %v2798_v60 = vmul.f32 0.044715, %v2670_v7  ;;  %v3050_v53 = vmul.f32 0.7978846, %v2922_v15  ;;  %v2923_v51 = vadd.f32 %v2795_v42, %v7446_v34  ;;  %v2545_v62 = vmul.f32 %v7498_v0, %v7498_v0  ;;  %9030 = vst [vmem:[#allocation50_spill] sm:$0xff] %v7512_v17 }
 0x3fb   : > { %v2671_v59 = vmul.f32 %v2543_v25, %v7483_v47  ;;  %v3052_v22 = vmul.f32 0.7978846, %v2924_v41  ;;  %v2925_v31 = vadd.f32 %v2797_v27, %v7453_v46  ;;  %v2800_v37 = vmul.f32 0.044715, %v2672_v28  ;;  %v7515_v42 = vpop.f32.mrb[65].mxu1  ;;  %v7518_v41 = vpop.f32.mrb[66].mxu0 }
 0x3fc   : > { %v2926_v13 = vadd.f32 %v2798_v60, %v7457_v2  ;;  %5171 = vtanh.f32 %v3050_v53  ;;  %v3051_v55 = vmul.f32 0.7978846, %v2923_v51  ;;  %v2673_v15 = vmul.f32 %v2545_v62, %v7498_v0  ;;  %9031 = vst [vmem:[#allocation72_spill] sm:$0xff] %v7515_v42  ;;  %9032 = vst [vmem:[#allocation128_spill] sm:$0xff] %v7518_v41  ;;  %v9033_v28 = vld [vmem:[#allocation76_spill] sm:$0xff]  ;;  %v7522_v53 = vpop.f32.mrb[66].mxu1 }
 0x3fd   : > { %v2799_v7 = vmul.f32 0.044715, %v2671_v59  ;;  %5173 = vtanh.f32 %v3052_v22  ;;  %v3053_v25 = vmul.f32 0.7978846, %v2925_v31  ;;  %v2928_v23 = vadd.f32 %v2800_v37, %v7474_v38  ;;  %9034 = vst [vmem:[#allocation76_spill] sm:$0xff] %v7522_v53  ;;  %v7526_v31 = vpop.f32.mrb[67].mxu0 }
 0x3fe   : > { %v3054_v16 = vmul.f32 0.7978846, %v2926_v13  ;;  %5175 = vtanh.f32 %v3051_v55  ;;  %v2801_v60 = vmul.f32 0.044715, %v2673_v15  ;;  %v3275_v17 = vadd.f32 1.0, %v9033_v28  ;;  %9035 = vst [vmem:[#allocation129_spill] sm:$0xff] %v7526_v31 }
 0x3ff   : > { %v2927_v27 = vadd.f32 %v2799_v7, %v7483_v47  ;;  %5177 = vtanh.f32 %v3053_v25  ;;  %v3056_v51 = vmul.f32 0.7978846, %v2928_v23  ;;  %v3279_v59 = vadd.f32 1.0, %v7184_v39  ;;  %v7529_v55 = vpop.f32.mrb[67].mxu1  ;;  %v9037_v25 = vld [vmem:[#allocation55_spill] sm:$0xff]  ;;  %v9038_v53 = vld [vmem:[#allocation70_spill] sm:$0xff] }
 0x400   : > { %v3277_v62 = vadd.f32 1.0, %v7142_v50  ;;  %5179 = vtanh.f32 %v3054_v16  ;;  %v2929_v22 = vadd.f32 %v2801_v60, %v7498_v0  ;;  %v3403_v37 = vmul.f32 0.5, %v3275_v17  ;;  %9036 = vst [vmem:[#allocation130_spill] sm:$0xff] %v7529_v55  ;;  %v9039_v41 = vld [vmem:[#allocation60_spill] sm:$0xff] }
 0x401   : > { %v3055_v13 = vmul.f32 0.7978846, %v2927_v27  ;;  %5181 = vtanh.f32 %v3056_v51  ;;  %v3407_v7 = vmul.f32 0.5, %v3279_v59  ;;  %v3281_v15 = vadd.f32 1.0, %v7197_v45  ;;  %v9040_v27 = vld [vmem:[#allocation56_spill] sm:$0xff]  ;;  %v9041_v51 = vld [vmem:[#allocation75_spill] sm:$0xff] }
 0x402   : > { %v3405_v28 = vmul.f32 0.5, %v3277_v62  ;;  %v3057_v23 = vmul.f32 0.7978846, %v2929_v22  ;;  %v3531_v39 = vmul.f32 %v3403_v37, %v9037_v25  ;;  %v3274_v50 = vadd.f32 1.0, %v9038_v53  ;;  %v9043_v37 = vld [vmem:[#allocation79_spill] sm:$0xff] }
 0x403   : > { %5183 = vtanh.f32 %v3055_v13  ;;  %v3535_v31 = vmul.f32 %v3407_v7, %v9039_v41  ;;  %v3409_v16 = vmul.f32 0.5, %v3281_v15  ;;  %v3278_v17 = vadd.f32 1.0, %v7166_v61  ;;  %v9042_v13 = vld [vmem:[#allocation63_spill] sm:$0xff]  ;;  %v9046_v7 = vld [vmem:[#allocation53_spill] sm:$0xff] }
 0x404   : > { %v3533_v42 = vmul.f32 %v3405_v28, %v9040_v27  ;;  %5185 = vtanh.f32 %v3057_v23  ;;  %v3402_v60 = vmul.f32 0.5, %v3274_v50  ;;  %v3276_v59 = vadd.f32 1.0, %v9041_v51  ;;  %v9047_v23 = vld [vmem:[#allocation80_spill] sm:$0xff]  ;;  %v9051_v27 = vld [vmem:[#allocation82_spill] sm:$0xff] }
 0x405   : > { %v3280_v45 = vadd.f32 1.0, %v7175_v6  ;;  %v3651_v62 = vpack.c.bf16 %v3535_v31, %v3531_v39  ;;  %v3537_v22 = vmul.f32 %v3409_v16, %v9042_v13  ;;  %v3406_v55 = vmul.f32 0.5, %v3278_v17  ;;  %v9050_v31 = vld [vmem:[#allocation58_spill] sm:$0xff] }
 0x406   : > { %v7542_v53 = vadd.f32 %v9043_v37, %v6778_v19  ;;  %v7544_v41 = vpop.eup %5171  ;;  %v3530_v15 = vmul.f32 %v3402_v60, %v9046_v7  ;;  %v3404_v28 = vmul.f32 0.5, %v3276_v59  ;;  %v7549_v25 = vadd.f32 %v9047_v23, %v6780_v4  ;;  %v9052_v51 = vld [vmem:[#allocation54_spill] sm:$0xff] }
 0x407   : > { %9045 = vst [vmem:[#allocation70_spill] sm:$0xff] %v7544_v41  ;;  %v3408_v61 = vmul.f32 0.5, %v3280_v45  ;;  %v7551_v50 = vpop.eup %5173  ;;  %4017 = vmatprep.mubr.bf16.mxu0 %v3651_v62  ;;  %v3653_v6 = vpack.c.bf16 %v3537_v22, %v3533_v42  ;;  %v3534_v39 = vmul.f32 %v3406_v55, %v9050_v31  ;;  %v7558_v17 = vadd.f32 %v9051_v27, %v6782_v44  ;;  %v9053_v45 = vld [vmem:[#allocation59_spill] sm:$0xff] }
 0x408   : > { %9044 = vst [vmem:[#allocation55_spill] sm:$0xff] %v7542_v53  ;;  %9048 = vst [vmem:[#allocation60_spill] sm:$0xff] %v7549_v25  ;;  %v2546_v16 = vmul.f32 %v7542_v53, %v7542_v53  ;;  %v7560_v60 = vpop.eup %5175  ;;  %v3532_v59 = vmul.f32 %v3404_v28, %v9052_v51  ;;  %v2548_v37 = vmul.f32 %v7549_v25, %v7549_v25  ;;  %v9054_v42 = vld [vmem:[#allocation83_spill] sm:$0xff]  ;;  %v9056_v28 = vld [vmem:[#allocation84_spill] sm:$0xff] }
 0x409   : > { %9049 = vst [vmem:[#allocation56_spill] sm:$0xff] %v7551_v50  ;;  %v3536_v13 = vmul.f32 %v3408_v61, %v9053_v45  ;;  %v7568_v62 = vadd.f32 %v9054_v42, %v6784_v18  ;;  %v7570_v55 = vpop.eup %5177  ;;  %4178 = vmatprep.mubr.bf16.mxu1 %v3653_v6  ;;  %v3650_v22 = vpack.c.bf16 %v3534_v39, %v3530_v15  ;;  %v9059_v6 = vld [vmem:[#allocation85_spill] sm:$0xff]  ;;  %v7588_v39 = vpop.f32.mrb[68].mxu0 }
 0x40a   : > { %v2674_v7 = vmul.f32 %v2546_v16, %v7542_v53  ;;  %v2547_v23 = vmul.f32 %v7558_v17, %v7558_v17  ;;  %v7577_v31 = vadd.f32 %v9056_v28, %v6778_v19  ;;  %v7579_v61 = vpop.eup %5179  ;;  %v2676_v51 = vmul.f32 %v2548_v37, %v7549_v25  ;;  %9061 = vst [vmem:[#allocation80_spill] sm:$0xff] %v7588_v39 }
 0x40b   : > { %9055 = vst [vmem:[#allocation75_spill] sm:$0xff] %v7568_v62  ;;  %9058 = vst [vmem:[#allocation79_spill] sm:$0xff] %v7579_v61  ;;  %v3652_v27 = vpack.c.bf16 %v3536_v13, %v3532_v59  ;;  %v2549_v45 = vmul.f32 %v7568_v62, %v7568_v62  ;;  %v7586_v15 = vadd.f32 %v9059_v6, %v6780_v4  ;;  %v7590_v16 = vpop.eup %5181  ;;  %4018 = vmatmul.mubr.bf16.gmra.mrb[88].mxu0 %v3650_v22  ;;  %v9063_v13 = vld [vmem:[#allocation86_spill] sm:$0xff]  ;;  %v9065_v22 = vld [vmem:[#allocation87_spill] sm:$0xff] }
 0x40c   : > { %9057 = vst [vmem:[#allocation63_spill] sm:$0xff] %v7577_v31  ;;  %9062 = vst [vmem:[#allocation58_spill] sm:$0xff] %v7590_v16  ;;  %v2802_v42 = vmul.f32 0.044715, %v2674_v7  ;;  %v2675_v28 = vmul.f32 %v2547_v23, %v7558_v17  ;;  %v2550_v59 = vmul.f32 %v7577_v31, %v7577_v31  ;;  %v7597_v37 = vadd.f32 %v9063_v13, %v6782_v44 }
 0x40d   : > { %9060 = vst [vmem:[#allocation53_spill] sm:$0xff] %v7586_v15  ;;  %v7599_v38 = vpop.eup %5183  ;;  %4179 = vmatmul.mubr.bf16.gmra.mrb[88].mxu1 %v3652_v27  ;;  %v2804_v6 = vmul.f32 0.044715, %v2676_v51  ;;  %v2677_v2 = vmul.f32 %v2549_v45, %v7568_v62  ;;  %v2552_v39 = vmul.f32 %v7586_v15, %v7586_v15  ;;  %v7606_v7 = vadd.f32 %v9065_v22, %v6784_v18 }
 0x40e   : > { %9064 = vst [vmem:[#allocation82_spill] sm:$0xff] %v7597_v37  ;;  %v2930_v23 = vadd.f32 %v2802_v42, %v7542_v53  ;;  %v2803_v0 = vmul.f32 0.044715, %v2675_v28  ;;  %v2678_v16 = vmul.f32 %v2550_v59, %v7577_v31  ;;  %v2551_v13 = vmul.f32 %v7597_v37, %v7597_v37  ;;  %v7612_v50 = vpop.eup %5185  ;;  %v7620_v59 = vpop.f32.mrb[68].mxu1 }
 0x40f   : > { %9066 = vst [vmem:[#allocation54_spill] sm:$0xff] %v7606_v7  ;;  %v2932_v27 = vadd.f32 %v2804_v6, %v7549_v25  ;;  %v2805_v51 = vmul.f32 0.044715, %v2677_v2  ;;  %v2680_v45 = vmul.f32 %v2552_v39, %v7586_v15  ;;  %v2553_v46 = vmul.f32 %v7606_v7, %v7606_v7  ;;  %9067 = vst [vmem:[#allocation59_spill] sm:$0xff] %v7620_v59  ;;  %v7624_v2 = vpop.f32.mrb[69].mxu0  ;;  %v7627_v34 = vpop.f32.mrb[69].mxu1 }
 0x410   : > { %v3058_v22 = vmul.f32 0.7978846, %v2930_v23  ;;  %v2931_v61 = vadd.f32 %v2803_v0, %v7558_v17  ;;  %v2806_v42 = vmul.f32 0.044715, %v2678_v16  ;;  %v2679_v28 = vmul.f32 %v2551_v13, %v7597_v37  ;;  %9068 = vst [vmem:[#allocation83_spill] sm:$0xff] %v7624_v2  ;;  %9069 = vst [vmem:[#allocation84_spill] sm:$0xff] %v7627_v34 }
 0x411   : > { %v3060_v53 = vmul.f32 0.7978846, %v2932_v27  ;;  %v2933_v47 = vadd.f32 %v2805_v51, %v7568_v62  ;;  %v2808_v41 = vmul.f32 0.044715, %v2680_v45  ;;  %v2681_v6 = vmul.f32 %v2553_v46, %v7606_v7  ;;  %v7630_v27 = vpop.f32.mrb[70].mxu0 }
 0x412   : > { %5187 = vtanh.f32 %v3058_v22  ;;  %v3059_v39 = vmul.f32 0.7978846, %v2931_v61  ;;  %v2934_v25 = vadd.f32 %v2806_v42, %v7577_v31  ;;  %v2807_v23 = vmul.f32 0.044715, %v2679_v28  ;;  %9070 = vst [vmem:[#allocation85_spill] sm:$0xff] %v7630_v27  ;;  %v7634_v22 = vpop.f32.mrb[70].mxu1 }
 0x413   : > { %5189 = vtanh.f32 %v3060_v53  ;;  %v3061_v0 = vmul.f32 0.7978846, %v2933_v47  ;;  %v2936_v16 = vadd.f32 %v2808_v41, %v7586_v15  ;;  %v2809_v13 = vmul.f32 0.044715, %v2681_v6  ;;  %9071 = vst [vmem:[#allocation86_spill] sm:$0xff] %v7634_v22  ;;  %v7638_v47 = vpop.f32.mrb[71].mxu0 }
 0x414   : > { %5191 = vtanh.f32 %v3059_v39  ;;  %v3062_v51 = vmul.f32 0.7978846, %v2934_v25  ;;  %v2935_v46 = vadd.f32 %v2807_v23, %v7597_v37  ;;  %v3283_v45 = vadd.f32 1.0, %v7245_v11  ;;  %9072 = vst [vmem:[#allocation87_spill] sm:$0xff] %v7638_v47  ;;  %v7641_v25 = vpop.f32.mrb[71].mxu1  ;;  %v9075_v22 = vld [vmem:[#allocation91_spill] sm:$0xff] }
 0x415   : > { %5193 = vtanh.f32 %v3061_v0  ;;  %v3064_v61 = vmul.f32 0.7978846, %v2936_v16  ;;  %v2937_v42 = vadd.f32 %v2809_v13, %v7606_v7  ;;  %v3287_v53 = vadd.f32 1.0, %v7278_v24  ;;  %9073 = vst [vmem:[#allocation131_spill] sm:$0xff] %v7641_v25  ;;  %v9074_v0 = vld [vmem:[#allocation66_spill] sm:$0xff] }
 0x416   : > { %5195 = vtanh.f32 %v3062_v51  ;;  %v3063_v41 = vmul.f32 0.7978846, %v2935_v46  ;;  %v3411_v28 = vmul.f32 0.5, %v3283_v45  ;;  %v3285_v6 = vadd.f32 1.0, %v7254_v9  ;;  %v9076_v47 = vld [vmem:[#allocation74_spill] sm:$0xff]  ;;  %v9078_v9 = vld [vmem:[#allocation67_spill] sm:$0xff] }
 0x417   : > { %5197 = vtanh.f32 %v3064_v61  ;;  %v3065_v39 = vmul.f32 0.7978846, %v2937_v42  ;;  %v3415_v11 = vmul.f32 0.5, %v3287_v53  ;;  %v3289_v23 = vadd.f32 1.0, %v7293_v63  ;;  %v9077_v45 = vld [vmem:[#allocation102_spill] sm:$0xff] }
 0x418   : > { %5199 = vtanh.f32 %v3063_v41  ;;  %v3539_v16 = vmul.f32 %v3411_v28, %v9074_v0  ;;  %v3413_v13 = vmul.f32 0.5, %v3285_v6  ;;  %v3282_v24 = vadd.f32 1.0, %v9075_v22  ;;  %v9079_v61 = vld [vmem:[#allocation94_spill] sm:$0xff]  ;;  %v9080_v41 = vld [vmem:[#allocation77_spill] sm:$0xff]  ;;  %v9081_v6 = vld [vmem:[#allocation92_spill] sm:$0xff] }
 0x419   : > { %5201 = vtanh.f32 %v3065_v39  ;;  %v3543_v51 = vmul.f32 %v3415_v11, %v9076_v47  ;;  %v3417_v46 = vmul.f32 0.5, %v3289_v23  ;;  %v3286_v27 = vadd.f32 1.0, %v9077_v45  ;;  %v9084_v47 = vld [vmem:[#allocation64_spill] sm:$0xff] }
 0x41a   : > { %v3541_v34 = vmul.f32 %v3413_v13, %v9078_v9  ;;  %v3410_v25 = vmul.f32 0.5, %v3282_v24  ;;  %v3284_v42 = vadd.f32 1.0, %v9079_v61  ;;  %v3288_v53 = vadd.f32 1.0, %v7271_v8  ;;  %v9085_v13 = vld [vmem:[#allocation93_spill] sm:$0xff] }
 0x41b   : > { %v3655_v63 = vpack.c.bf16 %v3543_v51, %v3539_v16  ;;  %v3545_v2 = vmul.f32 %v3417_v46, %v9080_v41  ;;  %v3414_v28 = vmul.f32 0.5, %v3286_v27  ;;  %v7654_v22 = vadd.f32 %v9081_v6, %v6778_v19  ;;  %v9088_v16 = vld [vmem:[#allocation68_spill] sm:$0xff]  ;;  %v9090_v61 = vld [vmem:[#allocation65_spill] sm:$0xff] }
 0x41c   : > { %v7656_v39 = vpop.eup %5187  ;;  %v3538_v11 = vmul.f32 %v3410_v25, %v9084_v47  ;;  %v3412_v23 = vmul.f32 0.5, %v3284_v42  ;;  %v3416_v0 = vmul.f32 0.5, %v3288_v53  ;;  %v7661_v24 = vadd.f32 %v9085_v13, %v6780_v4  ;;  %v9089_v46 = vld [vmem:[#allocation96_spill] sm:$0xff]  ;;  %v9091_v53 = vld [vmem:[#allocation73_spill] sm:$0xff] }
 0x41d   : > { %9082 = vst [vmem:[#allocation66_spill] sm:$0xff] %v7654_v22  ;;  %9083 = vst [vmem:[#allocation91_spill] sm:$0xff] %v7656_v39  ;;  %v7663_v45 = vpop.eup %5189  ;;  %4025 = vmatprep.mubr.bf16.mxu0 %v3655_v63  ;;  %v3657_v8 = vpack.c.bf16 %v3545_v2, %v3541_v34  ;;  %v3542_v27 = vmul.f32 %v3414_v28, %v9088_v16  ;;  %v2554_v51 = vmul.f32 %v7654_v22, %v7654_v22  ;;  %v9092_v34 = vld [vmem:[#allocation97_spill] sm:$0xff] }
 0x41e   : > { %9086 = vst [vmem:[#allocation74_spill] sm:$0xff] %v7661_v24  ;;  %9087 = vst [vmem:[#allocation102_spill] sm:$0xff] %v7663_v45  ;;  %v7670_v9 = vadd.f32 %v9089_v46, %v6782_v44  ;;  %v7672_v25 = vpop.eup %5191  ;;  %v3540_v42 = vmul.f32 %v3412_v23, %v9090_v61  ;;  %v3544_v41 = vmul.f32 %v3416_v0, %v9091_v53  ;;  %v9093_v23 = vld [vmem:[#allocation98_spill] sm:$0xff] }
 0x41f   : > { %v2556_v6 = vmul.f32 %v7661_v24, %v7661_v24  ;;  %v7680_v2 = vadd.f32 %v9092_v34, %v6784_v18  ;;  %v7682_v63 = vpop.eup %5193  ;;  %4186 = vmatprep.mubr.bf16.mxu1 %v3657_v8  ;;  %v3654_v28 = vpack.c.bf16 %v3542_v27, %v3538_v11  ;;  %v2682_v47 = vmul.f32 %v2554_v51, %v7654_v22  ;;  %v9095_v8 = vld [vmem:[#allocation99_spill] sm:$0xff]  ;;  %v7700_v27 = vpop.f32.mrb[72].mxu0 }
 0x420   : > { %v2555_v13 = vmul.f32 %v7670_v9, %v7670_v9  ;;  %v7689_v16 = vadd.f32 %v9093_v23, %v6778_v19  ;;  %v7691_v0 = vpop.eup %5195  ;;  %v3656_v46 = vpack.c.bf16 %v3544_v41, %v3540_v42  ;;  %v7698_v11 = vadd.f32 %v9095_v8, %v6780_v4  ;;  %9096 = vst [vmem:[#allocation94_spill] sm:$0xff] %v7700_v27  ;;  %v9098_v41 = vld [vmem:[#allocation100_spill] sm:$0xff] }
 0x421   : > { %9094 = vst [vmem:[#allocation67_spill] sm:$0xff] %v7691_v0  ;;  %v2684_v61 = vmul.f32 %v2556_v6, %v7661_v24  ;;  %v2557_v53 = vmul.f32 %v7680_v2, %v7680_v2  ;;  %v7702_v51 = vpop.eup %5197  ;;  %4026 = vmatmul.mubr.bf16.gmra.mrb[92].mxu0 %v3654_v28  ;;  %v2810_v34 = vmul.f32 0.044715, %v2682_v47  ;;  %v7709_v6 = vadd.f32 %v9098_v41, %v6782_v44  ;;  %v9099_v28 = vld [vmem:[#allocation101_spill] sm:$0xff] }
 0x422   : > { %9097 = vst [vmem:[#allocation77_spill] sm:$0xff] %v7702_v51  ;;  %v2683_v23 = vmul.f32 %v2555_v13, %v7670_v9  ;;  %v2558_v42 = vmul.f32 %v7689_v16, %v7689_v16  ;;  %v7711_v59 = vpop.eup %5199  ;;  %4187 = vmatmul.mubr.bf16.gmra.mrb[92].mxu1 %v3656_v46  ;;  %v2560_v27 = vmul.f32 %v7698_v11, %v7698_v11 }
 0x423   : > { %v2812_v8 = vmul.f32 0.044715, %v2684_v61  ;;  %v2685_v15 = vmul.f32 %v2557_v53, %v7680_v2  ;;  %v7718_v47 = vadd.f32 %v9099_v28, %v6784_v18  ;;  %v7720_v13 = vpop.eup %5201  ;;  %v2938_v31 = vadd.f32 %v2810_v34, %v7654_v22 }
 0x424   : > { %v2811_v7 = vmul.f32 0.044715, %v2683_v23  ;;  %v2686_v41 = vmul.f32 %v2558_v42, %v7689_v16  ;;  %v2559_v46 = vmul.f32 %v7709_v6, %v7709_v6  ;;  %v2688_v51 = vmul.f32 %v2560_v27, %v7698_v11  ;;  %v7732_v23 = vpop.f32.mrb[72].mxu1 }
 0x425   : > { %v2940_v61 = vadd.f32 %v2812_v8, %v7661_v24  ;;  %v2813_v53 = vmul.f32 0.044715, %v2685_v15  ;;  %v2561_v45 = vmul.f32 %v7718_v47, %v7718_v47  ;;  %v3066_v28 = vmul.f32 0.7978846, %v2938_v31  ;;  %9100 = vst [vmem:[#allocation92_spill] sm:$0xff] %v7732_v23  ;;  %v7736_v15 = vpop.f32.mrb[73].mxu0 }
 0x426   : > { %v2939_v62 = vadd.f32 %v2811_v7, %v7670_v9  ;;  %v2814_v0 = vmul.f32 0.044715, %v2686_v41  ;;  %v2687_v34 = vmul.f32 %v2559_v46, %v7709_v6  ;;  %v2816_v37 = vmul.f32 0.044715, %v2688_v51  ;;  %9101 = vst [vmem:[#allocation64_spill] sm:$0xff] %v7736_v15  ;;  %v7739_v39 = vpop.f32.mrb[73].mxu1 }
 0x427   : > { %v3068_v42 = vmul.f32 0.7978846, %v2940_v61  ;;  %v2941_v22 = vadd.f32 %v2813_v53, %v7680_v2  ;;  %v2689_v8 = vmul.f32 %v2561_v45, %v7718_v47  ;;  %5203 = vtanh.f32 %v3066_v28  ;;  %9102 = vst [vmem:[#allocation93_spill] sm:$0xff] %v7739_v39  ;;  %v7742_v61 = vpop.f32.mrb[74].mxu0  ;;  %v7746_v28 = vpop.f32.mrb[74].mxu1 }
 0x428   : > { %v3067_v27 = vmul.f32 0.7978846, %v2939_v62  ;;  %v2942_v24 = vadd.f32 %v2814_v0, %v7689_v16  ;;  %v2815_v31 = vmul.f32 0.044715, %v2687_v34  ;;  %v2944_v41 = vadd.f32 %v2816_v37, %v7698_v11  ;;  %9103 = vst [vmem:[#allocation68_spill] sm:$0xff] %v7742_v61  ;;  %9104 = vst [vmem:[#allocation96_spill] sm:$0xff] %v7746_v28 }
 0x429   : > { %5205 = vtanh.f32 %v3068_v42  ;;  %v3069_v7 = vmul.f32 0.7978846, %v2941_v22  ;;  %v2817_v46 = vmul.f32 0.044715, %v2689_v8  ;;  %v3291_v53 = vadd.f32 1.0, %v7347_v26  ;;  %v7750_v22 = vpop.f32.mrb[75].mxu0 }
 0x42a   : > { %5207 = vtanh.f32 %v3067_v27  ;;  %v3070_v51 = vmul.f32 0.7978846, %v2942_v24  ;;  %v2943_v45 = vadd.f32 %v2815_v31, %v7709_v6  ;;  %v3072_v62 = vmul.f32 0.7978846, %v2944_v41  ;;  %9105 = vst [vmem:[#allocation65_spill] sm:$0xff] %v7750_v22  ;;  %v7753_v24 = vpop.f32.mrb[75].mxu1 }
 0x42b   : > { %5209 = vtanh.f32 %v3069_v7  ;;  %v2945_v0 = vadd.f32 %v2817_v46, %v7718_v47  ;;  %v3295_v34 = vadd.f32 1.0, %v7392_v48  ;;  %v3419_v42 = vmul.f32 0.5, %v3291_v53  ;;  %9106 = vst [vmem:[#allocation73_spill] sm:$0xff] %v7753_v24  ;;  %v9107_v7 = vld [vmem:[#allocation88_spill] sm:$0xff] }
 0x42c   : > { %5211 = vtanh.f32 %v3070_v51  ;;  %v3071_v37 = vmul.f32 0.7978846, %v2943_v45  ;;  %v3293_v8 = vadd.f32 1.0, %v7361_v32  ;;  %v3297_v31 = vadd.f32 1.0, %v7400_v5  ;;  %v9108_v32 = vld [vmem:[#allocation89_spill] sm:$0xff] }
 0x42d   : > { %5213 = vtanh.f32 %v3072_v62  ;;  %v3073_v27 = vmul.f32 0.7978846, %v2945_v0  ;;  %v3423_v26 = vmul.f32 0.5, %v3295_v34  ;;  %v3547_v41 = vmul.f32 %v3419_v42, %v9107_v7 }
 0x42e   : > { %5215 = vtanh.f32 %v3071_v37  ;;  %v3421_v46 = vmul.f32 0.5, %v3293_v8  ;;  %v3290_v48 = vadd.f32 1.0, %v7304_v14  ;;  %v3425_v45 = vmul.f32 0.5, %v3297_v31 }
 0x42f   : > { %5217 = vtanh.f32 %v3073_v27  ;;  %v3551_v51 = vmul.f32 %v3423_v26, %v7232_v58  ;;  %v3294_v53 = vadd.f32 1.0, %v7381_v20  ;;  %v3292_v62 = vadd.f32 1.0, %v7309_v29  ;;  %v9110_v58 = vld [vmem:[#allocation78_spill] sm:$0xff] }
 0x430   : > { %v3549_v22 = vmul.f32 %v3421_v46, %v9108_v32  ;;  %v3418_v24 = vmul.f32 0.5, %v3290_v48  ;;  %v3296_v0 = vadd.f32 1.0, %v7387_v56  ;;  %v3553_v34 = vmul.f32 %v3425_v45, %v7252_v30  ;;  %v9112_v30 = vld [vmem:[#allocation90_spill] sm:$0xff]  ;;  %v9114_v48 = vld [vmem:[#allocation95_spill] sm:$0xff] }
 0x431   : > { %v3659_v5 = vpack.c.bf16 %v3551_v51, %v3547_v41  ;;  %v3422_v37 = vmul.f32 0.5, %v3294_v53  ;;  %v7766_v14 = vadd.f32 %v7267_v40, %v6778_v19  ;;  %v7768_v42 = vpop.eup %5203  ;;  %v3420_v20 = vmul.f32 0.5, %v3292_v62  ;;  %v9113_v41 = vld [vmem:[#allocation81_spill] sm:$0xff] }
 0x432   : > { %v3546_v8 = vmul.f32 %v3418_v24, %v9110_v58  ;;  %v3424_v27 = vmul.f32 0.5, %v3296_v0  ;;  %v7773_v26 = vadd.f32 %v7269_v12, %v6780_v4  ;;  %v3661_v56 = vpack.c.bf16 %v3553_v34, %v3549_v22  ;;  %v9115_v22 = vld [vmem:[#allocation103_spill] sm:$0xff] }
 0x433   : > { %9109 = vst [vmem:[#allocation97_spill] sm:$0xff] %v7766_v14  ;;  %v7775_v29 = vpop.eup %5205  ;;  %4033 = vmatprep.mubr.bf16.mxu0 %v3659_v5  ;;  %v3550_v31 = vmul.f32 %v3422_v37, %v9112_v30  ;;  %v2562_v40 = vmul.f32 %v7766_v14, %v7766_v14  ;;  %v7782_v7 = vadd.f32 %v7274_v49, %v6782_v44 }
 0x434   : > { %9111 = vst [vmem:[#allocation98_spill] sm:$0xff] %v7773_v26  ;;  %v7784_v24 = vpop.eup %5207  ;;  %v3548_v46 = vmul.f32 %v3420_v20, %v9113_v41  ;;  %v3552_v12 = vmul.f32 %v3424_v27, %v9114_v48  ;;  %v2564_v51 = vmul.f32 %v7773_v26, %v7773_v26  ;;  %v7792_v45 = vadd.f32 %v9115_v22, %v6784_v18  ;;  %v7812_v20 = vpop.f32.mrb[76].mxu0 }
 0x435   : > { %v7794_v53 = vpop.eup %5209  ;;  %4194 = vmatprep.mubr.bf16.mxu1 %v3661_v56  ;;  %v3658_v32 = vpack.c.bf16 %v3550_v31, %v3546_v8  ;;  %v2690_v49 = vmul.f32 %v2562_v40, %v7766_v14  ;;  %v2563_v62 = vmul.f32 %v7782_v7, %v7782_v7  ;;  %v7801_v0 = vadd.f32 %v7283_v54, %v6778_v19  ;;  %v9119_v31 = vld [vmem:[#allocation104_spill] sm:$0xff] }
 0x436   : > { %v7803_v5 = vpop.eup %5211  ;;  %v3660_v34 = vpack.c.bf16 %v3552_v12, %v3548_v46  ;;  %v2692_v37 = vmul.f32 %v2564_v51, %v7773_v26  ;;  %v2565_v58 = vmul.f32 %v7792_v45, %v7792_v45  ;;  %v7810_v8 = vadd.f32 %v7285_v21, %v6780_v4  ;;  %9118 = vst [vmem:[#allocation101_spill] sm:$0xff] %v7812_v20  ;;  %v9120_v12 = vld [vmem:[#allocation105_spill] sm:$0xff] }
 0x437   : > { %9116 = vst [vmem:[#allocation99_spill] sm:$0xff] %v7801_v0  ;;  %v7814_v27 = vpop.eup %5213  ;;  %4034 = vmatmul.mubr.bf16.gmra.mrb[96].mxu0 %v3658_v32  ;;  %v2818_v56 = vmul.f32 0.044715, %v2690_v49  ;;  %v2691_v54 = vmul.f32 %v2563_v62, %v7782_v7  ;;  %v2566_v30 = vmul.f32 %v7801_v0, %v7801_v0  ;;  %v7821_v40 = vadd.f32 %v9119_v31, %v6782_v44 }
 0x438   : > { %9117 = vst [vmem:[#allocation100_spill] sm:$0xff] %v7810_v8  ;;  %v7823_v41 = vpop.eup %5215  ;;  %4195 = vmatmul.mubr.bf16.gmra.mrb[96].mxu1 %v3660_v34  ;;  %v2820_v21 = vmul.f32 0.044715, %v2692_v37  ;;  %v2693_v46 = vmul.f32 %v2565_v58, %v7792_v45  ;;  %v2568_v48 = vmul.f32 %v7810_v8, %v7810_v8  ;;  %v7830_v51 = vadd.f32 %v9120_v12, %v6784_v18 }
 0x439   : > { %v7832_v22 = vpop.eup %5217  ;;  %v2946_v32 = vadd.f32 %v2818_v56, %v7766_v14  ;;  %v2819_v49 = vmul.f32 0.044715, %v2691_v54  ;;  %v2694_v62 = vmul.f32 %v2566_v30, %v7801_v0  ;;  %v2567_v34 = vmul.f32 %v7821_v40, %v7821_v40  ;;  %v7844_v54 = vpop.f32.mrb[76].mxu1 }
 0x43a   : > { %9121 = vst [vmem:[#allocation88_spill] sm:$0xff] %v7830_v51  ;;  %v2948_v37 = vadd.f32 %v2820_v21, %v7773_v26  ;;  %v2821_v58 = vmul.f32 0.044715, %v2693_v46  ;;  %v2696_v31 = vmul.f32 %v2568_v48, %v7810_v8  ;;  %v2569_v20 = vmul.f32 %v7830_v51, %v7830_v51  ;;  %9122 = vst [vmem:[#allocation89_spill] sm:$0xff] %v7844_v54  ;;  %v7848_v46 = vpop.f32.mrb[77].mxu0  ;;  %v7851_v23 = vpop.f32.mrb[77].mxu1 }
 0x43b   : > { %v3074_v12 = vmul.f32 0.7978846, %v2946_v32  ;;  %v2947_v28 = vadd.f32 %v2819_v49, %v7782_v7  ;;  %v2822_v61 = vmul.f32 0.044715, %v2694_v62  ;;  %v2695_v56 = vmul.f32 %v2567_v34, %v7821_v40  ;;  %9123 = vst [vmem:[#allocation78_spill] sm:$0xff] %v7848_v46  ;;  %9124 = vst [vmem:[#allocation90_spill] sm:$0xff] %v7851_v23 }
 0x43c   : > { %v3076_v30 = vmul.f32 0.7978846, %v2948_v37  ;;  %v2949_v39 = vadd.f32 %v2821_v58, %v7792_v45  ;;  %v2824_v15 = vmul.f32 0.044715, %v2696_v31  ;;  %v2697_v21 = vmul.f32 %v2569_v20, %v7830_v51  ;;  %v7854_v37 = vpop.f32.mrb[78].mxu0 }
 0x43d   : > { %5219 = vtanh.f32 %v3074_v12  ;;  %v3075_v48 = vmul.f32 0.7978846, %v2947_v28  ;;  %v2950_v26 = vadd.f32 %v2822_v61, %v7801_v0  ;;  %v2823_v32 = vmul.f32 0.044715, %v2695_v56  ;;  %9125 = vst [vmem:[#allocation81_spill] sm:$0xff] %v7854_v37  ;;  %v7858_v12 = vpop.f32.mrb[78].mxu1 }
 0x43e   : > { %5221 = vtanh.f32 %v3076_v30  ;;  %v3077_v49 = vmul.f32 0.7978846, %v2949_v39  ;;  %v2952_v62 = vadd.f32 %v2824_v15, %v7810_v8  ;;  %v2825_v34 = vmul.f32 0.044715, %v2697_v21  ;;  %9126 = vst [vmem:[#allocation95_spill] sm:$0xff] %v7858_v12  ;;  %v7862_v39 = vpop.f32.mrb[79].mxu0 }
 0x43f   : > { %5223 = vtanh.f32 %v3075_v48  ;;  %v3078_v58 = vmul.f32 0.7978846, %v2950_v26  ;;  %v2951_v20 = vadd.f32 %v2823_v32, %v7821_v40  ;;  %v3299_v31 = vadd.f32 1.0, %v7459_v43  ;;  %9127 = vst [vmem:[#allocation103_spill] sm:$0xff] %v7862_v39  ;;  %v7865_v26 = vpop.f32.mrb[79].mxu1 }
 0x440   : > { %5225 = vtanh.f32 %v3077_v49  ;;  %v3080_v61 = vmul.f32 0.7978846, %v2952_v62  ;;  %v2953_v28 = vadd.f32 %v2825_v34, %v7830_v51  ;;  %v3303_v56 = vadd.f32 1.0, %v7491_v1  ;;  %9128 = vst [vmem:[#allocation104_spill] sm:$0xff] %v7865_v26 }
 0x441   : > { %5227 = vtanh.f32 %v3078_v58  ;;  %v3079_v15 = vmul.f32 0.7978846, %v2951_v20  ;;  %v3427_v30 = vmul.f32 0.5, %v3299_v31  ;;  %v3301_v21 = vadd.f32 1.0, %v7465_v52  ;;  %v9129_v52 = vld [vmem:[#allocation108_spill] sm:$0xff] }
 0x442   : > { %5229 = vtanh.f32 %v3080_v61  ;;  %v3081_v48 = vmul.f32 0.7978846, %v2953_v28  ;;  %v3431_v43 = vmul.f32 0.5, %v3303_v56  ;;  %v3305_v32 = vadd.f32 1.0, %v7500_v10  ;;  %v9130_v28 = vld [vmem:[#allocation69_spill] sm:$0xff] }
 0x443   : > { %5231 = vtanh.f32 %v3079_v15  ;;  %v3555_v49 = vmul.f32 %v3427_v30, %v7316_v36  ;;  %v3429_v62 = vmul.f32 0.5, %v3301_v21  ;;  %v3298_v1 = vadd.f32 1.0, %v7432_v35  ;;  %v9131_v15 = vld [vmem:[#allocation117_spill] sm:$0xff]  ;;  %v9132_v30 = vld [vmem:[#allocation111_spill] sm:$0xff] }
 0x444   : > { %5233 = vtanh.f32 %v3081_v48  ;;  %v3559_v34 = vmul.f32 %v3431_v43, %v7355_v33  ;;  %v3433_v58 = vmul.f32 0.5, %v3305_v32  ;;  %v3302_v20 = vadd.f32 1.0, %v7478_v3  ;;  %v9134_v33 = vld [vmem:[#allocation106_spill] sm:$0xff]  ;;  %v9135_v32 = vld [vmem:[#allocation112_spill] sm:$0xff] }
 0x445   : > { %v3557_v31 = vmul.f32 %v3429_v62, %v9129_v52  ;;  %v3426_v26 = vmul.f32 0.5, %v3298_v1  ;;  %v3300_v61 = vadd.f32 1.0, %v7439_v57  ;;  %v3304_v56 = vadd.f32 1.0, %v9130_v28  ;;  %v9137_v1 = vld [vmem:[#allocation109_spill] sm:$0xff] }
 0x446   : > { %v3663_v10 = vpack.c.bf16 %v3559_v34, %v3555_v49  ;;  %v3561_v39 = vmul.f32 %v3433_v58, %v9131_v15  ;;  %v3430_v36 = vmul.f32 0.5, %v3302_v20  ;;  %v7878_v35 = vadd.f32 %v9132_v30, %v6778_v19  ;;  %v9138_v20 = vld [vmem:[#allocation113_spill] sm:$0xff] }
 0x447   : > { %v7880_v21 = vpop.eup %5219  ;;  %v3554_v48 = vmul.f32 %v3426_v26, %v9134_v33  ;;  %v3428_v3 = vmul.f32 0.5, %v3300_v61  ;;  %v3432_v43 = vmul.f32 0.5, %v3304_v56  ;;  %v7885_v62 = vadd.f32 %v9135_v32, %v6780_v4  ;;  %v9140_v61 = vld [vmem:[#allocation107_spill] sm:$0xff]  ;;  %v9141_v56 = vld [vmem:[#allocation110_spill] sm:$0xff] }
 0x448   : > { %9133 = vst [vmem:[#allocation105_spill] sm:$0xff] %v7878_v35  ;;  %v7887_v57 = vpop.eup %5221  ;;  %4041 = vmatprep.mubr.bf16.mxu0 %v3663_v10  ;;  %v3665_v49 = vpack.c.bf16 %v3561_v39, %v3557_v31  ;;  %v3558_v34 = vmul.f32 %v3430_v36, %v9137_v1  ;;  %v2570_v58 = vmul.f32 %v7878_v35, %v7878_v35  ;;  %v9142_v39 = vld [vmem:[#allocation114_spill] sm:$0xff] }
 0x449   : > { %9136 = vst [vmem:[#allocation108_spill] sm:$0xff] %v7885_v62  ;;  %v7894_v52 = vadd.f32 %v9138_v20, %v6782_v44  ;;  %v7896_v26 = vpop.eup %5223  ;;  %v3556_v28 = vmul.f32 %v3428_v3, %v9140_v61  ;;  %v3560_v15 = vmul.f32 %v3432_v43, %v9141_v56  ;;  %v2572_v30 = vmul.f32 %v7885_v62, %v7885_v62  ;;  %v9144_v3 = vld [vmem:[#allocation115_spill] sm:$0xff] }
 0x44a   : > { %v7904_v31 = vadd.f32 %v9142_v39, %v6784_v18  ;;  %v7906_v10 = vpop.eup %5225  ;;  %4202 = vmatprep.mubr.bf16.mxu1 %v3665_v49  ;;  %v3662_v36 = vpack.c.bf16 %v3558_v34, %v3554_v48  ;;  %v2698_v33 = vmul.f32 %v2570_v58, %v7878_v35  ;;  %v7913_v1 = vadd.f32 %v9144_v3, %v6778_v19  ;;  %v9146_v49 = vld [vmem:[#allocation116_spill] sm:$0xff] }
 0x44b   : > { %9139 = vst [vmem:[#allocation69_spill] sm:$0xff] %v7894_v52  ;;  %v2571_v32 = vmul.f32 %v7894_v52, %v7894_v52  ;;  %v7915_v43 = vpop.eup %5227  ;;  %v3664_v20 = vpack.c.bf16 %v3560_v15, %v3556_v28  ;;  %v2700_v61 = vmul.f32 %v2572_v30, %v7885_v62  ;;  %v7922_v48 = vadd.f32 %v9146_v49, %v6780_v4  ;;  %v9149_v28 = vld [vmem:[#allocation118_spill] sm:$0xff] }
 0x44c   : > { %9143 = vst [vmem:[#allocation117_spill] sm:$0xff] %v7904_v31  ;;  %9145 = vst [vmem:[#allocation111_spill] sm:$0xff] %v7913_v1  ;;  %v2573_v56 = vmul.f32 %v7904_v31, %v7904_v31  ;;  %v7924_v34 = vpop.eup %5229  ;;  %4042 = vmatmul.mubr.bf16.gmra.mrb[100].mxu0 %v3662_v36  ;;  %v2826_v58 = vmul.f32 0.044715, %v2698_v33  ;;  %v2574_v3 = vmul.f32 %v7913_v1, %v7913_v1  ;;  %v9151_v36 = vld [vmem:[#allocation119_spill] sm:$0xff] }
 0x44d   : > { %9147 = vst [vmem:[#allocation106_spill] sm:$0xff] %v7922_v48  ;;  %9148 = vst [vmem:[#allocation112_spill] sm:$0xff] %v7924_v34  ;;  %v2699_v39 = vmul.f32 %v2571_v32, %v7894_v52  ;;  %v7931_v15 = vadd.f32 %v9149_v28, %v6782_v44  ;;  %v7933_v30 = vpop.eup %5231  ;;  %4203 = vmatmul.mubr.bf16.gmra.mrb[100].mxu1 %v3664_v20  ;;  %v2828_v12 = vmul.f32 0.044715, %v2700_v61 }
 0x44e   : > { %v2701_v49 = vmul.f32 %v2573_v56, %v7904_v31  ;;  %v2576_v37 = vmul.f32 %v7922_v48, %v7922_v48  ;;  %v7940_v33 = vadd.f32 %v9151_v36, %v6784_v18  ;;  %v7942_v32 = vpop.eup %5233  ;;  %v2954_v23 = vadd.f32 %v2826_v58, %v7878_v35 }
 0x44f   : > { %9150 = vst [vmem:[#allocation109_spill] sm:$0xff] %v7931_v15  ;;  %v2827_v46 = vmul.f32 0.044715, %v2699_v39  ;;  %v2702_v28 = vmul.f32 %v2574_v3, %v7913_v1  ;;  %v2575_v20 = vmul.f32 %v7931_v15, %v7931_v15  ;;  %v2956_v61 = vadd.f32 %v2828_v12, %v7885_v62 }
 0x450   : > { %9152 = vst [vmem:[#allocation113_spill] sm:$0xff] %v7940_v33  ;;  %v2829_v56 = vmul.f32 0.044715, %v2701_v49  ;;  %v2704_v54 = vmul.f32 %v2576_v37, %v7922_v48  ;;  %v2577_v8 = vmul.f32 %v7940_v33, %v7940_v33  ;;  %v3082_v36 = vmul.f32 0.7978846, %v2954_v23 }
 0x451   : > { %v2955_v0 = vadd.f32 %v2827_v46, %v7894_v52  ;;  %v2830_v14 = vmul.f32 0.044715, %v2702_v28  ;;  %v2703_v58 = vmul.f32 %v2575_v20, %v7931_v15  ;;  %v3084_v39 = vmul.f32 0.7978846, %v2956_v61 }
 0x452   : > { %v2957_v3 = vadd.f32 %v2829_v56, %v7904_v31  ;;  %v2832_v35 = vmul.f32 0.044715, %v2704_v54  ;;  %v2705_v51 = vmul.f32 %v2577_v8, %v7940_v33  ;;  %5235 = vtanh.f32 %v3082_v36 }
 0x453   : > { %v3083_v12 = vmul.f32 0.7978846, %v2955_v0  ;;  %v2958_v49 = vadd.f32 %v2830_v14, %v7913_v1  ;;  %v2831_v37 = vmul.f32 0.044715, %v2703_v58  ;;  %5237 = vtanh.f32 %v3084_v39  ;;  %v9153_v58 = vld [vmem:[#allocation61_spill] sm:$0xff] }
 0x454   : > { %v3085_v62 = vmul.f32 0.7978846, %v2957_v3  ;;  %v2960_v23 = vadd.f32 %v2832_v35, %v7922_v48  ;;  %v2833_v34 = vmul.f32 0.044715, %v2705_v51  ;;  %v3307_v20 = vadd.f32 1.0, %v7560_v60 }
 0x455   : > { %5239 = vtanh.f32 %v3083_v12  ;;  %v3086_v46 = vmul.f32 0.7978846, %v2958_v49  ;;  %v2959_v28 = vadd.f32 %v2831_v37, %v7931_v15  ;;  %v3311_v0 = vadd.f32 1.0, %v7599_v38  ;;  %v9156_v49 = vld [vmem:[#allocation79_spill] sm:$0xff] }
 0x456   : > { %5241 = vtanh.f32 %v3085_v62  ;;  %v3088_v54 = vmul.f32 0.7978846, %v2960_v23  ;;  %v2961_v8 = vadd.f32 %v2833_v34, %v7940_v33  ;;  %v3435_v61 = vmul.f32 0.5, %v3307_v20  ;;  %v9154_v62 = vld [vmem:[#allocation70_spill] sm:$0xff]  ;;  %v9155_v34 = vld [vmem:[#allocation49_spill] sm:$0xff]  ;;  %v9157_v23 = vld [vmem:[#allocation52_spill] sm:$0xff] }
 0x457   : > { %5243 = vtanh.f32 %v3086_v46  ;;  %v3087_v14 = vmul.f32 0.7978846, %v2959_v28  ;;  %v3309_v56 = vadd.f32 1.0, %v7570_v55  ;;  %v3439_v51 = vmul.f32 0.5, %v3311_v0  ;;  %v9158_v28 = vld [vmem:[#allocation56_spill] sm:$0xff]  ;;  %v9160_v0 = vld [vmem:[#allocation47_spill] sm:$0xff] }
 0x458   : > { %5245 = vtanh.f32 %v3088_v54  ;;  %v3089_v35 = vmul.f32 0.7978846, %v2961_v8  ;;  %v3313_v36 = vadd.f32 1.0, %v7612_v50  ;;  %v3563_v39 = vmul.f32 %v3435_v61, %v9153_v58  ;;  %v9159_v54 = vld [vmem:[#allocation58_spill] sm:$0xff] }
 0x459   : > { %5247 = vtanh.f32 %v3087_v14  ;;  %v3437_v60 = vmul.f32 0.5, %v3309_v56  ;;  %v3306_v3 = vadd.f32 1.0, %v9154_v62  ;;  %v3567_v12 = vmul.f32 %v3439_v51, %v9155_v34  ;;  %v9161_v56 = vld [vmem:[#allocation120_spill] sm:$0xff]  ;;  %v9164_v51 = vld [vmem:[#allocation51_spill] sm:$0xff] }
 0x45a   : > { %5249 = vtanh.f32 %v3089_v35  ;;  %v3441_v38 = vmul.f32 0.5, %v3313_v36  ;;  %v3310_v37 = vadd.f32 1.0, %v9156_v49  ;;  %v3308_v20 = vadd.f32 1.0, %v9158_v28 }
 0x45b   : > { %v3565_v46 = vmul.f32 %v3437_v60, %v9157_v23  ;;  %v3434_v55 = vmul.f32 0.5, %v3306_v3  ;;  %v3312_v8 = vadd.f32 1.0, %v9159_v54  ;;  %v3667_v50 = vpack.c.bf16 %v3567_v12, %v3563_v39  ;;  %v9165_v60 = vld [vmem:[#allocation121_spill] sm:$0xff]  ;;  %v9169_v23 = vld [vmem:[#allocation122_spill] sm:$0xff] }
 0x45c   : > { %v3569_v14 = vmul.f32 %v3441_v38, %v9160_v0  ;;  %v3438_v61 = vmul.f32 0.5, %v3310_v37  ;;  %v7974_v58 = vadd.f32 %v9161_v56, %v6778_v19  ;;  %v7976_v35 = vpop.eup %5235  ;;  %v3436_v62 = vmul.f32 0.5, %v3308_v20  ;;  %v9168_v12 = vld [vmem:[#allocation57_spill] sm:$0xff]  ;;  %v9170_v20 = vld [vmem:[#allocation48_spill] sm:$0xff] }
 0x45d   : > { %9163 = vst [vmem:[#allocation110_spill] sm:$0xff] %v7976_v35  ;;  %v3562_v36 = vmul.f32 %v3434_v55, %v9164_v51  ;;  %v3440_v34 = vmul.f32 0.5, %v3312_v8  ;;  %v7981_v3 = vadd.f32 %v9165_v60, %v6780_v4  ;;  %v7983_v49 = vpop.eup %5237  ;;  %4049 = vmatprep.mubr.bf16.mxu0 %v3667_v50  ;;  %v7990_v28 = vadd.f32 %v9169_v23, %v6782_v44  ;;  %v9171_v8 = vld [vmem:[#allocation62_spill] sm:$0xff] }
 0x45e   : > { %9162 = vst [vmem:[#allocation107_spill] sm:$0xff] %v7974_v58  ;;  %9167 = vst [vmem:[#allocation115_spill] sm:$0xff] %v7983_v49  ;;  %v3669_v39 = vpack.c.bf16 %v3569_v14, %v3565_v46  ;;  %v3566_v38 = vmul.f32 %v3438_v61, %v9168_v12  ;;  %v2578_v37 = vmul.f32 %v7974_v58, %v7974_v58  ;;  %v9172_v46 = vld [vmem:[#allocation123_spill] sm:$0xff] }
 0x45f   : > { %9166 = vst [vmem:[#allocation114_spill] sm:$0xff] %v7981_v3  ;;  %v7992_v55 = vpop.eup %5239  ;;  %v3564_v54 = vmul.f32 %v3436_v62, %v9170_v20  ;;  %v3568_v0 = vmul.f32 %v3440_v34, %v9171_v8  ;;  %v2580_v56 = vmul.f32 %v7981_v3, %v7981_v3  ;;  %v8000_v50 = vadd.f32 %v9172_v46, %v6784_v18  ;;  %v9174_v62 = vld [vmem:[#allocation124_spill] sm:$0xff] }
 0x460   : > { %v8002_v14 = vpop.eup %5241  ;;  %4210 = vmatprep.mubr.bf16.mxu1 %v3669_v39  ;;  %v3666_v61 = vpack.c.bf16 %v3566_v38, %v3562_v36  ;;  %v2706_v51 = vmul.f32 %v2578_v37, %v7974_v58  ;;  %v2579_v60 = vmul.f32 %v7990_v28, %v7990_v28  ;;  %v8009_v12 = vadd.f32 %v9174_v62, %v6778_v19  ;;  %v9177_v39 = vld [vmem:[#allocation125_spill] sm:$0xff] }
 0x461   : > { %9173 = vst [vmem:[#allocation116_spill] sm:$0xff] %v8000_v50  ;;  %v8011_v34 = vpop.eup %5243  ;;  %v3668_v23 = vpack.c.bf16 %v3568_v0, %v3564_v54  ;;  %v2708_v20 = vmul.f32 %v2580_v56, %v7981_v3  ;;  %v2581_v8 = vmul.f32 %v8000_v50, %v8000_v50  ;;  %v8018_v36 = vadd.f32 %v9177_v39, %v6780_v4  ;;  %v9180_v54 = vld [vmem:[#allocation126_spill] sm:$0xff] }
 0x462   : > { %9175 = vst [vmem:[#allocation118_spill] sm:$0xff] %v8009_v12  ;;  %9176 = vst [vmem:[#allocation119_spill] sm:$0xff] %v8011_v34  ;;  %v8020_v38 = vpop.eup %5245  ;;  %4050 = vmatmul.mubr.bf16.gmra.mrb[104].mxu0 %v3666_v61  ;;  %v2834_v37 = vmul.f32 0.044715, %v2706_v51  ;;  %v2707_v46 = vmul.f32 %v2579_v60, %v7990_v28  ;;  %v2582_v62 = vmul.f32 %v8009_v12, %v8009_v12  ;;  %v9182_v61 = vld [vmem:[#allocation127_spill] sm:$0xff] }
 0x463   : > { %9178 = vst [vmem:[#allocation61_spill] sm:$0xff] %v8018_v36  ;;  %9179 = vst [vmem:[#allocation70_spill] sm:$0xff] %v8020_v38  ;;  %v8027_v0 = vadd.f32 %v9180_v54, %v6782_v44  ;;  %v8029_v56 = vpop.eup %5247  ;;  %4211 = vmatmul.mubr.bf16.gmra.mrb[104].mxu1 %v3668_v23  ;;  %v2836_v48 = vmul.f32 0.044715, %v2708_v20  ;;  %v2709_v39 = vmul.f32 %v2581_v8, %v8000_v50 }
 0x464   : > { %v2584_v1 = vmul.f32 %v8018_v36, %v8018_v36  ;;  %v8036_v51 = vadd.f32 %v9182_v61, %v6784_v18  ;;  %v8038_v60 = vpop.eup %5249  ;;  %v2962_v33 = vadd.f32 %v2834_v37, %v7974_v58  ;;  %v2835_v38 = vmul.f32 0.044715, %v2707_v46 }
 0x465   : > { %9181 = vst [vmem:[#allocation49_spill] sm:$0xff] %v8027_v0  ;;  %v2710_v54 = vmul.f32 %v2582_v62, %v8009_v12  ;;  %v2583_v23 = vmul.f32 %v8027_v0, %v8027_v0  ;;  %v2964_v20 = vadd.f32 %v2836_v48, %v7981_v3  ;;  %v2837_v8 = vmul.f32 0.044715, %v2709_v39 }
 0x466   : > { %9183 = vst [vmem:[#allocation79_spill] sm:$0xff] %v8036_v51  ;;  %v2712_v49 = vmul.f32 %v2584_v1, %v8018_v36  ;;  %v2585_v31 = vmul.f32 %v8036_v51, %v8036_v51  ;;  %v3090_v61 = vmul.f32 0.7978846, %v2962_v33  ;;  %v2963_v34 = vadd.f32 %v2835_v38, %v7990_v28 }
 0x467   : > { %v2838_v15 = vmul.f32 0.044715, %v2710_v54  ;;  %v2711_v37 = vmul.f32 %v2583_v23, %v8027_v0  ;;  %v3092_v46 = vmul.f32 0.7978846, %v2964_v20  ;;  %v2965_v62 = vadd.f32 %v2837_v8, %v8000_v50 }
 0x468   : > { %v2840_v58 = vmul.f32 0.044715, %v2712_v49  ;;  %v2713_v35 = vmul.f32 %v2585_v31, %v8036_v51  ;;  %5251 = vtanh.f32 %v3090_v61  ;;  %v3091_v48 = vmul.f32 0.7978846, %v2963_v34 }
 0x469   : > { %v2966_v39 = vadd.f32 %v2838_v15, %v8009_v12  ;;  %v2839_v1 = vmul.f32 0.044715, %v2711_v37  ;;  %5253 = vtanh.f32 %v3092_v46  ;;  %v3093_v3 = vmul.f32 0.7978846, %v2965_v62 }
 0x46a   : > { %v2968_v33 = vadd.f32 %v2840_v58, %v8018_v36  ;;  %v2841_v52 = vmul.f32 0.044715, %v2713_v35  ;;  %5255 = vtanh.f32 %v3091_v48  ;;  %v3315_v23 = vadd.f32 1.0, %v7672_v25  ;;  %v9186_v48 = vld [vmem:[#allocation67_spill] sm:$0xff] }
 0x46b   : > { %v3094_v38 = vmul.f32 0.7978846, %v2966_v39  ;;  %v2967_v54 = vadd.f32 %v2839_v1, %v8027_v0  ;;  %5257 = vtanh.f32 %v3093_v3  ;;  %v3319_v34 = vadd.f32 1.0, %v7711_v59  ;;  %v9184_v3 = vld [vmem:[#allocation91_spill] sm:$0xff] }
 0x46c   : > { %v3096_v49 = vmul.f32 0.7978846, %v2968_v33  ;;  %v2969_v31 = vadd.f32 %v2841_v52, %v8036_v51  ;;  %v3443_v20 = vmul.f32 0.5, %v3315_v23  ;;  %v3317_v8 = vadd.f32 1.0, %v7682_v63  ;;  %v9185_v52 = vld [vmem:[#allocation82_spill] sm:$0xff]  ;;  %v9187_v1 = vld [vmem:[#allocation75_spill] sm:$0xff] }
 0x46d   : > { %5259 = vtanh.f32 %v3094_v38  ;;  %v3095_v15 = vmul.f32 0.7978846, %v2967_v54  ;;  %v3447_v35 = vmul.f32 0.5, %v3319_v34  ;;  %v3321_v61 = vadd.f32 1.0, %v7720_v13  ;;  %v9188_v38 = vld [vmem:[#allocation102_spill] sm:$0xff]  ;;  %v9189_v23 = vld [vmem:[#allocation77_spill] sm:$0xff] }
 0x46e   : > { %5261 = vtanh.f32 %v3096_v49  ;;  %v3097_v58 = vmul.f32 0.7978846, %v2969_v31  ;;  %v3571_v37 = vmul.f32 %v3443_v20, %v7558_v17  ;;  %v3445_v25 = vmul.f32 0.5, %v3317_v8  ;;  %v9190_v31 = vld [vmem:[#allocation54_spill] sm:$0xff] }
 0x46f   : > { %5263 = vtanh.f32 %v3095_v15  ;;  %v3314_v46 = vadd.f32 1.0, %v9184_v3  ;;  %v3575_v62 = vmul.f32 %v3447_v35, %v9185_v52  ;;  %v3449_v59 = vmul.f32 0.5, %v3321_v61  ;;  %v9191_v15 = vld [vmem:[#allocation46_spill] sm:$0xff] }
 0x470   : > { %5265 = vtanh.f32 %v3097_v58  ;;  %v3318_v39 = vadd.f32 1.0, %v9186_v48  ;;  %v3573_v33 = vmul.f32 %v3445_v25, %v9187_v1  ;;  %v3316_v54 = vadd.f32 1.0, %v9188_v38  ;;  %v9194_v58 = vld [vmem:[#allocation55_spill] sm:$0xff]  ;;  %v9200_v38 = vld [vmem:[#allocation60_spill] sm:$0xff] }
 0x471   : > { %v3442_v63 = vmul.f32 0.5, %v3314_v46  ;;  %v3320_v49 = vadd.f32 1.0, %v9189_v23  ;;  %v3671_v13 = vpack.c.bf16 %v3575_v62, %v3571_v37  ;;  %v3577_v34 = vmul.f32 %v3449_v59, %v9190_v31  ;;  %v9195_v25 = vld [vmem:[#allocation71_spill] sm:$0xff]  ;;  %v9201_v23 = vld [vmem:[#allocation53_spill] sm:$0xff] }
 0x472   : > { %v3446_v17 = vmul.f32 0.5, %v3318_v39  ;;  %v8070_v20 = vadd.f32 %v9191_v15, %v6778_v19  ;;  %v8072_v8 = vpop.eup %5251  ;;  %v3444_v61 = vmul.f32 0.5, %v3316_v54  ;;  %v8077_v46 = vadd.f32 %v9195_v25, %v6780_v4  ;;  %v9198_v62 = vld [vmem:[#allocation63_spill] sm:$0xff]  ;;  %v9199_v39 = vld [vmem:[#allocation50_spill] sm:$0xff] }
 0x473   : > { %9193 = vst [vmem:[#allocation56_spill] sm:$0xff] %v8072_v8  ;;  %v3570_v35 = vmul.f32 %v3442_v63, %v9194_v58  ;;  %v3448_v3 = vmul.f32 0.5, %v3320_v49  ;;  %v8079_v52 = vpop.eup %5253  ;;  %4057 = vmatprep.mubr.bf16.mxu0 %v3671_v13  ;;  %v3673_v37 = vpack.c.bf16 %v3577_v34, %v3573_v33  ;;  %v8086_v1 = vadd.f32 %v9199_v39, %v6782_v44  ;;  %v9202_v33 = vld [vmem:[#allocation72_spill] sm:$0xff] }
 0x474   : > { %9192 = vst [vmem:[#allocation52_spill] sm:$0xff] %v8070_v20  ;;  %9196 = vst [vmem:[#allocation58_spill] sm:$0xff] %v8077_v46  ;;  %v3574_v59 = vmul.f32 %v3446_v17, %v9198_v62  ;;  %v2586_v48 = vmul.f32 %v8070_v20, %v8070_v20  ;;  %v8088_v63 = vpop.eup %5255  ;;  %v3572_v54 = vmul.f32 %v3444_v61, %v9200_v38  ;;  %v9203_v61 = vld [vmem:[#allocation128_spill] sm:$0xff] }
 0x475   : > { %9197 = vst [vmem:[#allocation47_spill] sm:$0xff] %v8079_v52  ;;  %v3576_v49 = vmul.f32 %v3448_v3, %v9201_v23  ;;  %v2588_v31 = vmul.f32 %v8077_v46, %v8077_v46  ;;  %v8096_v13 = vadd.f32 %v9202_v33, %v6784_v18  ;;  %v8098_v34 = vpop.eup %5257  ;;  %4218 = vmatprep.mubr.bf16.mxu1 %v3673_v37  ;;  %v9205_v37 = vld [vmem:[#allocation76_spill] sm:$0xff] }
 0x476   : > { %v3670_v17 = vpack.c.bf16 %v3574_v59, %v3570_v35  ;;  %v2714_v15 = vmul.f32 %v2586_v48, %v8070_v20  ;;  %v2587_v58 = vmul.f32 %v8086_v1, %v8086_v1  ;;  %v8105_v25 = vadd.f32 %v9203_v61, %v6778_v19 }
 0x477   : > { %v8107_v3 = vpop.eup %5259  ;;  %v3672_v62 = vpack.c.bf16 %v3576_v49, %v3572_v54  ;;  %v2716_v39 = vmul.f32 %v2588_v31, %v8077_v46  ;;  %v2589_v38 = vmul.f32 %v8096_v13, %v8096_v13  ;;  %v8114_v35 = vadd.f32 %v9205_v37, %v6780_v4  ;;  %v9207_v54 = vld [vmem:[#allocation129_spill] sm:$0xff] }
 0x478   : > { %9204 = vst [vmem:[#allocation120_spill] sm:$0xff] %v8107_v3  ;;  %v8116_v59 = vpop.eup %5261  ;;  %4058 = vmatmul.mubr.bf16.gmra.mrb[108].mxu0 %v3670_v17  ;;  %v2842_v48 = vmul.f32 0.044715, %v2714_v15  ;;  %v2715_v23 = vmul.f32 %v2587_v58, %v8086_v1  ;;  %v2590_v33 = vmul.f32 %v8105_v25, %v8105_v25  ;;  %v8123_v49 = vadd.f32 %v9207_v54, %v6782_v44  ;;  %v9208_v17 = vld [vmem:[#allocation130_spill] sm:$0xff] }
 0x479   : > { %9206 = vst [vmem:[#allocation51_spill] sm:$0xff] %v8116_v59  ;;  %v8125_v31 = vpop.eup %5263  ;;  %4219 = vmatmul.mubr.bf16.gmra.mrb[108].mxu1 %v3672_v62  ;;  %v2844_v61 = vmul.f32 0.044715, %v2716_v39  ;;  %v2717_v37 = vmul.f32 %v2589_v38, %v8096_v13  ;;  %v2592_v36 = vmul.f32 %v8114_v35, %v8114_v35  ;;  %v8132_v15 = vadd.f32 %v9208_v17, %v6784_v18 }
 0x47a   : > { %v8134_v58 = vpop.eup %5265  ;;  %v2970_v12 = vadd.f32 %v2842_v48, %v8070_v20  ;;  %v2843_v51 = vmul.f32 0.044715, %v2715_v23  ;;  %v2718_v54 = vmul.f32 %v2590_v33, %v8105_v25  ;;  %v2591_v62 = vmul.f32 %v8123_v49, %v8123_v49 }
 0x47b   : > { %v2972_v39 = vadd.f32 %v2844_v61, %v8077_v46  ;;  %v2845_v38 = vmul.f32 0.044715, %v2717_v37  ;;  %v2720_v59 = vmul.f32 %v2592_v36, %v8114_v35  ;;  %v2593_v52 = vmul.f32 %v8132_v15, %v8132_v15 }
 0x47c   : > { %v3098_v17 = vmul.f32 0.7978846, %v2970_v12  ;;  %v2971_v50 = vadd.f32 %v2843_v51, %v8086_v1  ;;  %v2846_v3 = vmul.f32 0.044715, %v2718_v54  ;;  %v2719_v48 = vmul.f32 %v2591_v62, %v8123_v49 }
 0x47d   : > { %v3100_v23 = vmul.f32 0.7978846, %v2972_v39  ;;  %v2973_v33 = vadd.f32 %v2845_v38, %v8096_v13  ;;  %v2848_v20 = vmul.f32 0.044715, %v2720_v59  ;;  %v2721_v0 = vmul.f32 %v2593_v52, %v8132_v15 }
 0x47e   : > { %5267 = vtanh.f32 %v3098_v17  ;;  %v3099_v61 = vmul.f32 0.7978846, %v2971_v50  ;;  %v2974_v37 = vadd.f32 %v2846_v3, %v8105_v25  ;;  %v2847_v36 = vmul.f32 0.044715, %v2719_v48 }
 0x47f   : > { %5269 = vtanh.f32 %v3100_v23  ;;  %v3101_v46 = vmul.f32 0.7978846, %v2973_v33  ;;  %v2976_v12 = vadd.f32 %v2848_v20, %v8114_v35  ;;  %v2849_v8 = vmul.f32 0.044715, %v2721_v0 }
 0x480   : > { %5271 = vtanh.f32 %v3099_v61  ;;  %v3102_v51 = vmul.f32 0.7978846, %v2974_v37  ;;  %v2975_v54 = vadd.f32 %v2847_v36, %v8123_v49  ;;  %v3323_v62 = vadd.f32 1.0, %v7784_v24 }
 0x481   : > { %5273 = vtanh.f32 %v3101_v46  ;;  %v3104_v59 = vmul.f32 0.7978846, %v2976_v12  ;;  %v2977_v52 = vadd.f32 %v2849_v8, %v8132_v15  ;;  %v3327_v50 = vadd.f32 1.0, %v7823_v41  ;;  %v9209_v12 = vld [vmem:[#allocation80_spill] sm:$0xff] }
 0x482   : > { %5275 = vtanh.f32 %v3102_v51  ;;  %v3103_v3 = vmul.f32 0.7978846, %v2975_v54  ;;  %v3451_v39 = vmul.f32 0.5, %v3323_v62  ;;  %v3325_v38 = vadd.f32 1.0, %v7794_v53 }
 0x483   : > { %5277 = vtanh.f32 %v3104_v59  ;;  %v3105_v20 = vmul.f32 0.7978846, %v2977_v52  ;;  %v3455_v0 = vmul.f32 0.5, %v3327_v50  ;;  %v3329_v17 = vadd.f32 1.0, %v7832_v22  ;;  %v9214_v50 = vld [vmem:[#allocation83_spill] sm:$0xff] }
 0x484   : > { %5279 = vtanh.f32 %v3103_v3  ;;  %v3579_v48 = vmul.f32 %v3451_v39, %v7670_v9  ;;  %v3453_v24 = vmul.f32 0.5, %v3325_v38  ;;  %v3322_v46 = vadd.f32 1.0, %v7768_v42  ;;  %v9215_v38 = vld [vmem:[#allocation74_spill] sm:$0xff] }
 0x485   : > { %5281 = vtanh.f32 %v3105_v20  ;;  %v3583_v8 = vmul.f32 %v3455_v0, %v7709_v6  ;;  %v3457_v41 = vmul.f32 0.5, %v3329_v17  ;;  %v3326_v23 = vadd.f32 1.0, %v7803_v5  ;;  %v9211_v6 = vld [vmem:[#allocation66_spill] sm:$0xff] }
 0x486   : > { %v3581_v33 = vmul.f32 %v3453_v24, %v7680_v2  ;;  %v3450_v53 = vmul.f32 0.5, %v3322_v46  ;;  %v3324_v61 = vadd.f32 1.0, %v7775_v29  ;;  %v3328_v37 = vadd.f32 1.0, %v7814_v27  ;;  %v9212_v2 = vld [vmem:[#allocation59_spill] sm:$0xff] }
 0x487   : > { %v3675_v22 = vpack.c.bf16 %v3583_v8, %v3579_v48  ;;  %v3585_v36 = vmul.f32 %v3457_v41, %v7718_v47  ;;  %v3454_v9 = vmul.f32 0.5, %v3326_v23  ;;  %v8166_v42 = vadd.f32 %v9209_v12, %v6778_v19  ;;  %v9216_v48 = vld [vmem:[#allocation84_spill] sm:$0xff]  ;;  %v9217_v23 = vld [vmem:[#allocation85_spill] sm:$0xff] }
 0x488   : > { %v8168_v51 = vpop.eup %5267  ;;  %v3578_v54 = vmul.f32 %v3450_v53, %v9211_v6  ;;  %v3452_v5 = vmul.f32 0.5, %v3324_v61  ;;  %v3456_v62 = vmul.f32 0.5, %v3328_v37  ;;  %v8173_v59 = vadd.f32 %v9212_v2, %v6780_v4 }
 0x489   : > { %9210 = vst [vmem:[#allocation121_spill] sm:$0xff] %v8166_v42  ;;  %v8175_v29 = vpop.eup %5269  ;;  %4065 = vmatprep.mubr.bf16.mxu0 %v3675_v22  ;;  %v3677_v27 = vpack.c.bf16 %v3585_v36, %v3581_v33  ;;  %v3582_v47 = vmul.f32 %v3454_v9, %v7689_v16  ;;  %v2594_v52 = vmul.f32 %v8166_v42, %v8166_v42  ;;  %v9219_v22 = vld [vmem:[#allocation86_spill] sm:$0xff] }
 0x48a   : > { %9213 = vst [vmem:[#allocation57_spill] sm:$0xff] %v8173_v59  ;;  %v8182_v3 = vadd.f32 %v9214_v50, %v6782_v44  ;;  %v8184_v39 = vpop.eup %5271  ;;  %v3580_v20 = vmul.f32 %v3452_v5, %v9215_v38  ;;  %v3584_v0 = vmul.f32 %v3456_v62, %v7698_v11  ;;  %v2596_v17 = vmul.f32 %v8173_v59, %v8173_v59  ;;  %v9221_v5 = vld [vmem:[#allocation87_spill] sm:$0xff] }
 0x48b   : > { %v8192_v24 = vadd.f32 %v9216_v48, %v6784_v18  ;;  %v8194_v16 = vpop.eup %5273  ;;  %4226 = vmatprep.mubr.bf16.mxu1 %v3677_v27  ;;  %v3674_v46 = vpack.c.bf16 %v3582_v47, %v3578_v54  ;;  %v2722_v8 = vmul.f32 %v2594_v52, %v8166_v42  ;;  %v8201_v33 = vadd.f32 %v9217_v23, %v6778_v19  ;;  %v9222_v50 = vld [vmem:[#allocation131_spill] sm:$0xff] }
 0x48c   : > { %v2595_v41 = vmul.f32 %v8182_v3, %v8182_v3  ;;  %v8203_v11 = vpop.eup %5275  ;;  %v3676_v53 = vpack.c.bf16 %v3584_v0, %v3580_v20  ;;  %v2724_v61 = vmul.f32 %v2596_v17, %v8173_v59  ;;  %v8210_v36 = vadd.f32 %v9219_v22, %v6780_v4 }
 0x48d   : > { %9218 = vst [vmem:[#allocation122_spill] sm:$0xff] %v8201_v33  ;;  %v2597_v37 = vmul.f32 %v8192_v24, %v8192_v24  ;;  %v8212_v9 = vpop.eup %5277  ;;  %4066 = vmatmul.mubr.bf16.gmra.mrb[112].mxu0 %v3674_v46  ;;  %v2850_v12 = vmul.f32 0.044715, %v2722_v8  ;;  %v2598_v54 = vmul.f32 %v8201_v33, %v8201_v33  ;;  %v8219_v62 = vadd.f32 %v9221_v5, %v6782_v44 }
 0x48e   : > { %9220 = vst [vmem:[#allocation48_spill] sm:$0xff] %v8210_v36  ;;  %v2723_v6 = vmul.f32 %v2595_v41, %v8182_v3  ;;  %v8221_v2 = vpop.eup %5279  ;;  %4227 = vmatmul.mubr.bf16.gmra.mrb[112].mxu1 %v3676_v53  ;;  %v2852_v27 = vmul.f32 0.044715, %v2724_v61  ;;  %v2600_v52 = vmul.f32 %v8210_v36, %v8210_v36  ;;  %v8228_v38 = vadd.f32 %v9222_v50, %v6784_v18 }
 0x48f   : > { %v2725_v47 = vmul.f32 %v2597_v37, %v8192_v24  ;;  %v8230_v20 = vpop.eup %5281  ;;  %v2978_v0 = vadd.f32 %v2850_v12, %v8166_v42  ;;  %v2726_v48 = vmul.f32 %v2598_v54, %v8201_v33  ;;  %v2599_v46 = vmul.f32 %v8219_v62, %v8219_v62 }
 0x490   : > { %9223 = vst [vmem:[#allocation62_spill] sm:$0xff] %v8228_v38  ;;  %v2851_v17 = vmul.f32 0.044715, %v2723_v6  ;;  %v2980_v8 = vadd.f32 %v2852_v27, %v8173_v59  ;;  %v2728_v23 = vmul.f32 %v2600_v52, %v8210_v36  ;;  %v2601_v53 = vmul.f32 %v8228_v38, %v8228_v38 }
 0x491   : > { %v2853_v41 = vmul.f32 0.044715, %v2725_v47  ;;  %v3106_v61 = vmul.f32 0.7978846, %v2978_v0  ;;  %v2854_v22 = vmul.f32 0.044715, %v2726_v48  ;;  %v2727_v12 = vmul.f32 %v2599_v46, %v8219_v62 }
 0x492   : > { %v2979_v37 = vadd.f32 %v2851_v17, %v8182_v3  ;;  %v3108_v6 = vmul.f32 0.7978846, %v2980_v8  ;;  %v2856_v5 = vmul.f32 0.044715, %v2728_v23  ;;  %v2729_v50 = vmul.f32 %v2601_v53, %v8228_v38 }
 0x493   : > { %v2981_v54 = vadd.f32 %v2853_v41, %v8192_v24  ;;  %5283 = vtanh.f32 %v3106_v61  ;;  %v2982_v47 = vadd.f32 %v2854_v22, %v8201_v33  ;;  %v2855_v52 = vmul.f32 0.044715, %v2727_v12 }
 0x494   : > { %v3107_v27 = vmul.f32 0.7978846, %v2979_v37  ;;  %5285 = vtanh.f32 %v3108_v6  ;;  %v2984_v0 = vadd.f32 %v2856_v5, %v8210_v36  ;;  %v2857_v42 = vmul.f32 0.044715, %v2729_v50 }
 0x495   : > { %v3109_v59 = vmul.f32 0.7978846, %v2981_v54  ;;  %v3110_v17 = vmul.f32 0.7978846, %v2982_v47  ;;  %v2983_v48 = vadd.f32 %v2855_v52, %v8219_v62  ;;  %v3331_v46 = vadd.f32 1.0, %v7896_v26  ;;  %v9224_v47 = vld [vmem:[#allocation112_spill] sm:$0xff] }
 0x496   : > { %5287 = vtanh.f32 %v3107_v27  ;;  %v3112_v8 = vmul.f32 0.7978846, %v2984_v0  ;;  %v2985_v41 = vadd.f32 %v2857_v42, %v8228_v38  ;;  %v3335_v23 = vadd.f32 1.0, %v7933_v30  ;;  %v9225_v0 = vld [vmem:[#allocation88_spill] sm:$0xff] }
 0x497   : > { %5289 = vtanh.f32 %v3109_v59  ;;  %v3111_v53 = vmul.f32 0.7978846, %v2983_v48  ;;  %v3459_v61 = vmul.f32 0.5, %v3331_v46  ;;  %v3333_v37 = vadd.f32 1.0, %v7906_v10  ;;  %v9226_v48 = vld [vmem:[#allocation94_spill] sm:$0xff] }
 0x498   : > { %5291 = vtanh.f32 %v3110_v17  ;;  %v3113_v22 = vmul.f32 0.7978846, %v2985_v41  ;;  %v3463_v12 = vmul.f32 0.5, %v3335_v23  ;;  %v3337_v6 = vadd.f32 1.0, %v7942_v32 }
 0x499   : > { %5293 = vtanh.f32 %v3112_v8  ;;  %v3587_v54 = vmul.f32 %v3459_v61, %v7782_v7  ;;  %v3461_v26 = vmul.f32 0.5, %v3333_v37  ;;  %v3330_v59 = vadd.f32 1.0, %v7880_v21  ;;  %v9231_v61 = vld [vmem:[#allocation99_spill] sm:$0xff] }
 0x49a   : > { %5295 = vtanh.f32 %v3111_v53  ;;  %v3591_v42 = vmul.f32 %v3463_v12, %v7821_v40  ;;  %v3465_v30 = vmul.f32 0.5, %v3337_v6  ;;  %v3334_v5 = vadd.f32 1.0, %v7915_v43  ;;  %v9228_v40 = vld [vmem:[#allocation97_spill] sm:$0xff]  ;;  %v9232_v12 = vld [vmem:[#allocation64_spill] sm:$0xff] }
 0x49b   : > { %5297 = vtanh.f32 %v3113_v22  ;;  %v3589_v50 = vmul.f32 %v3461_v26, %v7792_v45  ;;  %v3458_v10 = vmul.f32 0.5, %v3330_v59  ;;  %v3332_v27 = vadd.f32 1.0, %v7887_v57  ;;  %v9229_v45 = vld [vmem:[#allocation92_spill] sm:$0xff]  ;;  %v9233_v26 = vld [vmem:[#allocation98_spill] sm:$0xff] }
 0x49c   : > { %v3336_v52 = vadd.f32 1.0, %v9224_v47  ;;  %v3679_v32 = vpack.c.bf16 %v3591_v42, %v3587_v54  ;;  %v3593_v17 = vmul.f32 %v3465_v30, %v9225_v0  ;;  %v3462_v7 = vmul.f32 0.5, %v3334_v5  ;;  %v9234_v42 = vld [vmem:[#allocation100_spill] sm:$0xff] }
 0x49d   : > { %v8262_v21 = vadd.f32 %v9226_v48, %v6778_v19  ;;  %v8264_v46 = vpop.eup %5283  ;;  %v3586_v8 = vmul.f32 %v3458_v10, %v9228_v40  ;;  %v3460_v43 = vmul.f32 0.5, %v3332_v27  ;;  %v8269_v23 = vadd.f32 %v9229_v45, %v6780_v4  ;;  %v9237_v0 = vld [vmem:[#allocation68_spill] sm:$0xff] }
 0x49e   : > { %v3464_v41 = vmul.f32 0.5, %v3336_v52  ;;  %v8271_v57 = vpop.eup %5285  ;;  %4073 = vmatprep.mubr.bf16.mxu0 %v3679_v32  ;;  %v3681_v53 = vpack.c.bf16 %v3593_v17, %v3589_v50  ;;  %v3590_v37 = vmul.f32 %v3462_v7, %v9231_v61  ;;  %v8278_v6 = vadd.f32 %v9232_v12, %v6782_v44  ;;  %v9235_v50 = vld [vmem:[#allocation93_spill] sm:$0xff] }
 0x49f   : > { %9227 = vst [vmem:[#allocation123_spill] sm:$0xff] %v8262_v21  ;;  %9230 = vst [vmem:[#allocation124_spill] sm:$0xff] %v8269_v23  ;;  %v2602_v22 = vmul.f32 %v8262_v21, %v8262_v21  ;;  %v3588_v59 = vmul.f32 %v3460_v43, %v9233_v26  ;;  %v2604_v5 = vmul.f32 %v8269_v23, %v8269_v23 }
 0x4a0   : > { %v8280_v54 = vpop.eup %5287  ;;  %v3592_v30 = vmul.f32 %v3464_v41, %v9234_v42  ;;  %v8288_v10 = vadd.f32 %v9235_v50, %v6784_v18  ;;  %4234 = vmatprep.mubr.bf16.mxu1 %v3681_v53  ;;  %v3678_v47 = vpack.c.bf16 %v3590_v37, %v3586_v8  ;;  %v2603_v32 = vmul.f32 %v8278_v6, %v8278_v6  ;;  %v9239_v41 = vld [vmem:[#allocation96_spill] sm:$0xff] }
 0x4a1   : > { %v8290_v27 = vpop.eup %5289  ;;  %v2730_v52 = vmul.f32 %v2602_v22, %v8262_v21  ;;  %v8297_v17 = vadd.f32 %v9237_v0, %v6778_v19  ;;  %v2732_v40 = vmul.f32 %v2604_v5, %v8269_v23  ;;  %v8306_v8 = vadd.f32 %v9239_v41, %v6780_v4  ;;  %v9242_v22 = vld [vmem:[#allocation65_spill] sm:$0xff] }
 0x4a2   : > { %9236 = vst [vmem:[#allocation125_spill] sm:$0xff] %v8288_v10  ;;  %v8299_v7 = vpop.eup %5291  ;;  %v3680_v48 = vpack.c.bf16 %v3592_v30, %v3588_v59  ;;  %v2605_v43 = vmul.f32 %v8288_v10, %v8288_v10  ;;  %4074 = vmatmul.mubr.bf16.gmra.mrb[116].mxu0 %v3678_v47  ;;  %v2731_v61 = vmul.f32 %v2603_v32, %v8278_v6  ;;  %v9243_v5 = vld [vmem:[#allocation73_spill] sm:$0xff] }
 0x4a3   : > { %9238 = vst [vmem:[#allocation126_spill] sm:$0xff] %v8297_v17  ;;  %9240 = vst [vmem:[#allocation127_spill] sm:$0xff] %v8306_v8  ;;  %v8308_v45 = vpop.eup %5293  ;;  %v2858_v53 = vmul.f32 0.044715, %v2730_v52  ;;  %v2606_v37 = vmul.f32 %v8297_v17, %v8297_v17  ;;  %v8315_v12 = vadd.f32 %v9242_v22, %v6782_v44  ;;  %v2860_v59 = vmul.f32 0.044715, %v2732_v40 }
 0x4a4   : > { %9241 = vst [vmem:[#allocation91_spill] sm:$0xff] %v8308_v45  ;;  %v8317_v26 = vpop.eup %5295  ;;  %4235 = vmatmul.mubr.bf16.gmra.mrb[116].mxu1 %v3680_v48  ;;  %v2733_v42 = vmul.f32 %v2605_v43, %v8288_v10  ;;  %v2608_v30 = vmul.f32 %v8306_v8, %v8306_v8  ;;  %v8324_v50 = vadd.f32 %v9243_v5, %v6784_v18  ;;  %v2859_v32 = vmul.f32 0.044715, %v2731_v61 }
 0x4a5   : > { %v8326_v47 = vpop.eup %5297  ;;  %v2986_v52 = vadd.f32 %v2858_v53, %v8262_v21  ;;  %v2734_v0 = vmul.f32 %v2606_v37, %v8297_v17  ;;  %v2607_v48 = vmul.f32 %v8315_v12, %v8315_v12  ;;  %v2988_v40 = vadd.f32 %v2860_v59, %v8269_v23 }
 0x4a6   : > { %9244 = vst [vmem:[#allocation82_spill] sm:$0xff] %v8324_v50  ;;  %v2861_v43 = vmul.f32 0.044715, %v2733_v42  ;;  %v2736_v41 = vmul.f32 %v2608_v30, %v8306_v8  ;;  %v2609_v22 = vmul.f32 %v8324_v50, %v8324_v50  ;;  %v2987_v36 = vadd.f32 %v2859_v32, %v8278_v6 }
 0x4a7   : > { %v3114_v5 = vmul.f32 0.7978846, %v2986_v52  ;;  %v2862_v33 = vmul.f32 0.044715, %v2734_v0  ;;  %v2735_v53 = vmul.f32 %v2607_v48, %v8315_v12  ;;  %v3116_v61 = vmul.f32 0.7978846, %v2988_v40 }
 0x4a8   : > { %v2989_v37 = vadd.f32 %v2861_v43, %v8288_v10  ;;  %v2864_v21 = vmul.f32 0.044715, %v2736_v41  ;;  %v2737_v38 = vmul.f32 %v2609_v22, %v8324_v50  ;;  %v3115_v59 = vmul.f32 0.7978846, %v2987_v36 }
 0x4a9   : > { %5299 = vtanh.f32 %v3114_v5  ;;  %v2990_v42 = vadd.f32 %v2862_v33, %v8297_v17  ;;  %v2863_v30 = vmul.f32 0.044715, %v2735_v53  ;;  %v3339_v48 = vadd.f32 1.0, %v7992_v55  ;;  %v9245_v53 = vld [vmem:[#allocation69_spill] sm:$0xff] }
 0x4aa   : > { %5301 = vtanh.f32 %v3116_v61  ;;  %v3117_v23 = vmul.f32 0.7978846, %v2989_v37  ;;  %v2992_v52 = vadd.f32 %v2864_v21, %v8306_v8  ;;  %v2865_v45 = vmul.f32 0.044715, %v2737_v38 }
 0x4ab   : > { %5303 = vtanh.f32 %v3115_v59  ;;  %v3118_v32 = vmul.f32 0.7978846, %v2990_v42  ;;  %v2991_v0 = vadd.f32 %v2863_v30, %v8315_v12  ;;  %v3343_v36 = vadd.f32 1.0, %v8029_v56  ;;  %v9248_v42 = vld [vmem:[#allocation119_spill] sm:$0xff] }
 0x4ac   : > { %5305 = vtanh.f32 %v3117_v23  ;;  %v3120_v40 = vmul.f32 0.7978846, %v2992_v52  ;;  %v2993_v43 = vadd.f32 %v2865_v45, %v8324_v50  ;;  %v3467_v41 = vmul.f32 0.5, %v3339_v48  ;;  %v9246_v23 = vld [vmem:[#allocation110_spill] sm:$0xff]  ;;  %v9247_v45 = vld [vmem:[#allocation109_spill] sm:$0xff] }
 0x4ad   : > { %5307 = vtanh.f32 %v3118_v32  ;;  %v3119_v33 = vmul.f32 0.7978846, %v2991_v0  ;;  %v3341_v22 = vadd.f32 1.0, %v8002_v14  ;;  %v3471_v38 = vmul.f32 0.5, %v3343_v36  ;;  %v9249_v52 = vld [vmem:[#allocation117_spill] sm:$0xff]  ;;  %v9250_v0 = vld [vmem:[#allocation115_spill] sm:$0xff] }
 0x4ae   : > { %5309 = vtanh.f32 %v3120_v40  ;;  %v3121_v21 = vmul.f32 0.7978846, %v2993_v43  ;;  %v3345_v5 = vadd.f32 1.0, %v8038_v60  ;;  %v3595_v61 = vmul.f32 %v3467_v41, %v9245_v53  ;;  %v9251_v40 = vld [vmem:[#allocation70_spill] sm:$0xff]  ;;  %v9252_v36 = vld [vmem:[#allocation113_spill] sm:$0xff] }
 0x4af   : > { %5311 = vtanh.f32 %v3119_v33  ;;  %v3469_v55 = vmul.f32 0.5, %v3341_v22  ;;  %v3338_v37 = vadd.f32 1.0, %v9246_v23  ;;  %v3599_v59 = vmul.f32 %v3471_v38, %v9247_v45  ;;  %v9253_v22 = vld [vmem:[#allocation101_spill] sm:$0xff] }
 0x4b0   : > { %5313 = vtanh.f32 %v3121_v21  ;;  %v3473_v56 = vmul.f32 0.5, %v3345_v5  ;;  %v3342_v30 = vadd.f32 1.0, %v9248_v42  ;;  %v3340_v48 = vadd.f32 1.0, %v9250_v0  ;;  %v9255_v38 = vld [vmem:[#allocation105_spill] sm:$0xff] }
 0x4b1   : > { %v3597_v32 = vmul.f32 %v3469_v55, %v9249_v52  ;;  %v3466_v14 = vmul.f32 0.5, %v3338_v37  ;;  %v3344_v43 = vadd.f32 1.0, %v9251_v40  ;;  %v3683_v60 = vpack.c.bf16 %v3599_v59, %v3595_v61  ;;  %v9256_v55 = vld [vmem:[#allocation89_spill] sm:$0xff]  ;;  %v9259_v59 = vld [vmem:[#allocation111_spill] sm:$0xff]  ;;  %v9260_v52 = vld [vmem:[#allocation78_spill] sm:$0xff] }
 0x4b2   : > { %v3601_v33 = vmul.f32 %v3473_v56, %v9252_v36  ;;  %v3470_v41 = vmul.f32 0.5, %v3342_v30  ;;  %v8358_v53 = vadd.f32 %v9253_v22, %v6778_v19  ;;  %v3468_v23 = vmul.f32 0.5, %v3340_v48  ;;  %v9261_v48 = vld [vmem:[#allocation108_spill] sm:$0xff] }
 0x4b3   : > { %v8360_v21 = vpop.eup %5299  ;;  %v3594_v5 = vmul.f32 %v3466_v14, %v9255_v38  ;;  %v3472_v45 = vmul.f32 0.5, %v3344_v43  ;;  %v8365_v37 = vadd.f32 %v9256_v55, %v6780_v4  ;;  %4081 = vmatprep.mubr.bf16.mxu0 %v3683_v60  ;;  %v8374_v0 = vadd.f32 %v9260_v52, %v6782_v44  ;;  %v9262_v43 = vld [vmem:[#allocation106_spill] sm:$0xff] }
 0x4b4   : > { %9254 = vst [vmem:[#allocation67_spill] sm:$0xff] %v8358_v53  ;;  %v8367_v42 = vpop.eup %5301  ;;  %v3685_v61 = vpack.c.bf16 %v3601_v33, %v3597_v32  ;;  %v3598_v56 = vmul.f32 %v3470_v41, %v9259_v59  ;;  %v2610_v30 = vmul.f32 %v8358_v53, %v8358_v53  ;;  %v3596_v40 = vmul.f32 %v3468_v23, %v9261_v48  ;;  %v9263_v32 = vld [vmem:[#allocation90_spill] sm:$0xff]  ;;  %v9264_v23 = vld [vmem:[#allocation81_spill] sm:$0xff] }
 0x4b5   : > { %9257 = vst [vmem:[#allocation75_spill] sm:$0xff] %v8365_v37  ;;  %9258 = vst [vmem:[#allocation102_spill] sm:$0xff] %v8367_v42  ;;  %v8376_v14 = vpop.eup %5303  ;;  %v3600_v36 = vmul.f32 %v3472_v45, %v9262_v43  ;;  %v2612_v22 = vmul.f32 %v8365_v37, %v8365_v37  ;;  %v8384_v60 = vadd.f32 %v9263_v32, %v6784_v18 }
 0x4b6   : > { %v8386_v33 = vpop.eup %5305  ;;  %4242 = vmatprep.mubr.bf16.mxu1 %v3685_v61  ;;  %v3682_v41 = vpack.c.bf16 %v3598_v56, %v3594_v5  ;;  %v2738_v38 = vmul.f32 %v2610_v30, %v8358_v53  ;;  %v2611_v55 = vmul.f32 %v8374_v0, %v8374_v0  ;;  %v8393_v59 = vadd.f32 %v9264_v23, %v6778_v19  ;;  %v9265_v61 = vld [vmem:[#allocation95_spill] sm:$0xff]  ;;  %v8404_v56 = vpop.f32.mrb[80].mxu0 }
 0x4b7   : > { %v8395_v45 = vpop.eup %5307  ;;  %v3684_v52 = vpack.c.bf16 %v3600_v36, %v3596_v40  ;;  %v2740_v48 = vmul.f32 %v2612_v22, %v8365_v37  ;;  %v2613_v43 = vmul.f32 %v8384_v60, %v8384_v60  ;;  %v8402_v5 = vadd.f32 %v9265_v61, %v6780_v4  ;;  %9266 = vst [vmem:[#allocation77_spill] sm:$0xff] %v8404_v56  ;;  %v9268_v36 = vld [vmem:[#allocation103_spill] sm:$0xff]  ;;  %v8415_v23 = vpop.f32.mrb[81].mxu0 }
 0x4b8   : > { %v8406_v30 = vpop.eup %5309  ;;  %4082 = vmatmul.mubr.bf16.gmra.mrb[120].mxu0 %v3682_v41  ;;  %v2866_v32 = vmul.f32 0.044715, %v2738_v38  ;;  %v2739_v19 = vmul.f32 %v2611_v55, %v8374_v0  ;;  %v2614_v40 = vmul.f32 %v8393_v59, %v8393_v59  ;;  %v8413_v22 = vadd.f32 %v9268_v36, %v6782_v44  ;;  %9269 = vst [vmem:[#allocation46_spill] sm:$0xff] %v8415_v23  ;;  %v9270_v38 = vld [vmem:[#allocation104_spill] sm:$0xff]  ;;  %v8426_v56 = vpop.f32.mrb[82].mxu0 }
 0x4b9   : > { %9267 = vst [vmem:[#allocation54_spill] sm:$0xff] %v8406_v30  ;;  %v8417_v8 = vpop.eup %5311  ;;  %4243 = vmatmul.mubr.bf16.gmra.mrb[120].mxu1 %v3684_v52  ;;  %v2868_v4 = vmul.f32 0.044715, %v2740_v48  ;;  %v2741_v61 = vmul.f32 %v2613_v43, %v8384_v60  ;;  %v2616_v41 = vmul.f32 %v8402_v5, %v8402_v5  ;;  %v8424_v55 = vadd.f32 %v9270_v38, %v6784_v18  ;;  %v8434_v48 = vpop.f32.mrb[83].mxu0 }
 0x4ba   : > { %9271 = vst [vmem:[#allocation55_spill] sm:$0xff] %v8426_v56  ;;  %v8428_v17 = vpop.eup %5313  ;;  %v2994_v44 = vadd.f32 %v2866_v32, %v8358_v53  ;;  %v2867_v36 = vmul.f32 0.044715, %v2739_v19  ;;  %v2742_v23 = vmul.f32 %v2614_v40, %v8393_v59  ;;  %v2615_v52 = vmul.f32 %v8413_v22, %v8413_v22  ;;  %9272 = vst [vmem:[#allocation71_spill] sm:$0xff] %v8434_v48  ;;  %v8440_v56 = vpop.f32.mrb[80].mxu1 }
 0x4bb   : > { %v2996_v43 = vadd.f32 %v2868_v4, %v8365_v37  ;;  %v2869_v50 = vmul.f32 0.044715, %v2741_v61  ;;  %v2744_v18 = vmul.f32 %v2616_v41, %v8402_v5  ;;  %v2617_v38 = vmul.f32 %v8424_v55, %v8424_v55  ;;  %9273 = vst [vmem:[#allocation63_spill] sm:$0xff] %v8440_v56  ;;  %v8444_v53 = vpop.f32.mrb[81].mxu1 }
 0x4bc   : > { %v3122_v30 = vmul.f32 0.7978846, %v2994_v44  ;;  %v2995_v32 = vadd.f32 %v2867_v36, %v8374_v0  ;;  %v2870_v19 = vmul.f32 0.044715, %v2742_v23  ;;  %v2743_v40 = vmul.f32 %v2615_v52, %v8413_v22  ;;  %v8448_v41 = vpop.f32.mrb[82].mxu1 }
 0x4bd   : > { %v3124_v42 = vmul.f32 0.7978846, %v2996_v43  ;;  %v2997_v48 = vadd.f32 %v2869_v50, %v8384_v60  ;;  %v2872_v4 = vmul.f32 0.044715, %v2744_v18  ;;  %v2745_v61 = vmul.f32 %v2617_v38, %v8424_v55  ;;  %9274 = vst [vmem:[#allocation50_spill] sm:$0xff] %v8448_v41  ;;  %v8451_v10 = vpop.f32.mrb[83].mxu1 }
 0x4be   : > { %5315 = vtanh.f32 %v3122_v30  ;;  %v3123_v37 = vmul.f32 0.7978846, %v2995_v32  ;;  %v2998_v56 = vadd.f32 %v2870_v19, %v8393_v59  ;;  %v2871_v44 = vmul.f32 0.044715, %v2743_v40  ;;  %9275 = vst [vmem:[#allocation60_spill] sm:$0xff] %v8451_v10 }
 0x4bf   : > { %5317 = vtanh.f32 %v3124_v42  ;;  %v3125_v23 = vmul.f32 0.7978846, %v2997_v48  ;;  %v3000_v36 = vadd.f32 %v2872_v4, %v8402_v5  ;;  %v2873_v52 = vmul.f32 0.044715, %v2745_v61  ;;  %v9276_v61 = vld [vmem:[#allocation56_spill] sm:$0xff] }
 0x4c0   : > { %5319 = vtanh.f32 %v3123_v37  ;;  %v3126_v43 = vmul.f32 0.7978846, %v2998_v56  ;;  %v2999_v50 = vadd.f32 %v2871_v44, %v8413_v22  ;;  %v3347_v18 = vadd.f32 1.0, %v8088_v63 }
 0x4c1   : > { %5321 = vtanh.f32 %v3125_v23  ;;  %v3128_v38 = vmul.f32 0.7978846, %v3000_v36  ;;  %v3001_v30 = vadd.f32 %v2873_v52, %v8424_v55  ;;  %v3351_v32 = vadd.f32 1.0, %v8125_v31  ;;  %v9277_v23 = vld [vmem:[#allocation49_spill] sm:$0xff]  ;;  %v9278_v52 = vld [vmem:[#allocation120_spill] sm:$0xff] }
 0x4c2   : > { %5323 = vtanh.f32 %v3126_v43  ;;  %v3127_v19 = vmul.f32 0.7978846, %v2999_v50  ;;  %v3475_v40 = vmul.f32 0.5, %v3347_v18  ;;  %v3349_v42 = vadd.f32 1.0, %v8098_v34  ;;  %v9279_v50 = vld [vmem:[#allocation116_spill] sm:$0xff] }
 0x4c3   : > { %5325 = vtanh.f32 %v3128_v38  ;;  %v3129_v48 = vmul.f32 0.7978846, %v3001_v30  ;;  %v3479_v4 = vmul.f32 0.5, %v3351_v32  ;;  %v3353_v37 = vadd.f32 1.0, %v8134_v58  ;;  %v9280_v38 = vld [vmem:[#allocation47_spill] sm:$0xff] }
 0x4c4   : > { %5327 = vtanh.f32 %v3127_v19  ;;  %v3603_v56 = vmul.f32 %v3475_v40, %v7990_v28  ;;  %v3477_v63 = vmul.f32 0.5, %v3349_v42  ;;  %v3346_v44 = vadd.f32 1.0, %v9276_v61  ;;  %v9281_v32 = vld [vmem:[#allocation51_spill] sm:$0xff] }
 0x4c5   : > { %5329 = vtanh.f32 %v3129_v48  ;;  %v3607_v36 = vmul.f32 %v3479_v4, %v9277_v23  ;;  %v3481_v31 = vmul.f32 0.5, %v3353_v37  ;;  %v3350_v43 = vadd.f32 1.0, %v9278_v52  ;;  %v9282_v19 = vld [vmem:[#allocation79_spill] sm:$0xff]  ;;  %v9284_v52 = vld [vmem:[#allocation118_spill] sm:$0xff] }
 0x4c6   : > { %v3605_v18 = vmul.f32 %v3477_v63, %v9279_v50  ;;  %v3474_v34 = vmul.f32 0.5, %v3346_v44  ;;  %v3348_v30 = vadd.f32 1.0, %v9280_v38  ;;  %v3352_v10 = vadd.f32 1.0, %v9281_v32  ;;  %v9283_v48 = vld [vmem:[#allocation107_spill] sm:$0xff]  ;;  %v9286_v38 = vld [vmem:[#allocation61_spill] sm:$0xff] }
 0x4c7   : > { %v3687_v58 = vpack.c.bf16 %v3607_v36, %v3603_v56  ;;  %v3609_v41 = vmul.f32 %v3481_v31, %v9282_v19  ;;  %v3478_v28 = vmul.f32 0.5, %v3350_v43  ;;  %v3355_v40 = vadd.f32 1.0, %v8184_v39  ;;  %v9285_v39 = vld [vmem:[#allocation114_spill] sm:$0xff] }
 0x4c8   : > { %v8469_v42 = vpop.eup %5315  ;;  %v3602_v4 = vmul.f32 %v3474_v34, %v9283_v48  ;;  %v3476_v37 = vmul.f32 0.5, %v3348_v30  ;;  %v3480_v61 = vmul.f32 0.5, %v3352_v10  ;;  %v3359_v23 = vadd.f32 1.0, %v8221_v2 }
 0x4c9   : > { %v8473_v63 = vpop.eup %5317  ;;  %4089 = vmatprep.mubr.bf16.mxu0 %v3687_v58  ;;  %v3689_v44 = vpack.c.bf16 %v3609_v41, %v3605_v18  ;;  %v3606_v50 = vmul.f32 %v3478_v28, %v9284_v52  ;;  %v3483_v56 = vmul.f32 0.5, %v3355_v40  ;;  %v3357_v36 = vadd.f32 1.0, %v8194_v16 }
 0x4ca   : > { %v8477_v31 = vpop.eup %5319  ;;  %v3604_v43 = vmul.f32 %v3476_v37, %v9285_v39  ;;  %v3608_v32 = vmul.f32 %v3480_v61, %v9286_v38  ;;  %v3487_v34 = vmul.f32 0.5, %v3359_v23  ;;  %v3361_v10 = vadd.f32 1.0, %v8230_v20 }
 0x4cb   : > { %v8482_v30 = vpop.eup %5321  ;;  %4250 = vmatprep.mubr.bf16.mxu1 %v3689_v44  ;;  %v3686_v2 = vpack.c.bf16 %v3606_v50, %v3602_v4  ;;  %v3611_v41 = vmul.f32 %v3483_v56, %v8086_v1  ;;  %v3485_v18 = vmul.f32 0.5, %v3357_v36  ;;  %v3354_v58 = vadd.f32 1.0, %v8168_v51  ;;  %v9287_v56 = vld [vmem:[#allocation52_spill] sm:$0xff] }
 0x4cc   : > { %v8486_v19 = vpop.eup %5323  ;;  %v3688_v16 = vpack.c.bf16 %v3608_v32, %v3604_v43  ;;  %v3615_v28 = vmul.f32 %v3487_v34, %v8123_v49  ;;  %v3489_v40 = vmul.f32 0.5, %v3361_v10  ;;  %v3358_v48 = vadd.f32 1.0, %v8203_v11  ;;  %v8499_v11 = vpop.f32.mrb[84].mxu0  ;;  %v9288_v10 = vld [vmem:[#allocation58_spill] sm:$0xff] }
 0x4cd   : > { %v8490_v37 = vpop.eup %5325  ;;  %4090 = vmatmul.mubr.bf16.gmra.mrb[124].mxu0 %v3686_v2  ;;  %v3613_v20 = vmul.f32 %v3485_v18, %v8096_v13  ;;  %v3482_v61 = vmul.f32 0.5, %v3354_v58  ;;  %v3356_v4 = vadd.f32 1.0, %v8175_v29  ;;  %v3360_v1 = vadd.f32 1.0, %v8212_v9  ;;  %v8505_v9 = vpop.f32.mrb[85].mxu0 }
 0x4ce   : > { %v8495_v23 = vpop.eup %5327  ;;  %4251 = vmatmul.mubr.bf16.gmra.mrb[124].mxu1 %v3688_v16  ;;  %v3691_v51 = vpack.c.bf16 %v3615_v28, %v3611_v41  ;;  %v3617_v44 = vmul.f32 %v3489_v40, %v8132_v15  ;;  %v3486_v49 = vmul.f32 0.5, %v3358_v48  ;;  %v3363_v52 = vadd.f32 1.0, %v8280_v54  ;;  %v8509_v54 = vpop.f32.mrb[84].mxu1 }
 0x4cf   : > { %v8501_v50 = vpop.eup %5329  ;;  %v3610_v13 = vmul.f32 %v3482_v61, %v9287_v56  ;;  %v3484_v36 = vmul.f32 0.5, %v3356_v4  ;;  %v3488_v39 = vmul.f32 0.5, %v3360_v1  ;;  %v3367_v29 = vadd.f32 1.0, %v8317_v26  ;;  %v8511_v34 = vpop.f32.mrb[86].mxu0 }
 0x4d0   : > { %4097 = vmatprep.mubr.bf16.mxu0 %v3691_v51  ;;  %v3693_v43 = vpack.c.bf16 %v3617_v44, %v3613_v20  ;;  %v3614_v38 = vmul.f32 %v3486_v49, %v8105_v25  ;;  %v3491_v15 = vmul.f32 0.5, %v3363_v52  ;;  %v3365_v32 = vadd.f32 1.0, %v8290_v27  ;;  %v8516_v58 = vpop.f32.mrb[85].mxu1  ;;  %v8518_v16 = vpop.f32.mrb[87].mxu0  ;;  %v9289_v49 = vld [vmem:[#allocation91_spill] sm:$0xff] }
 0x4d1   : > { %v3612_v2 = vmul.f32 %v3484_v36, %v9288_v10  ;;  %v3616_v41 = vmul.f32 %v3488_v39, %v8114_v35  ;;  %v3495_v18 = vmul.f32 0.5, %v3367_v29  ;;  %v3369_v26 = vadd.f32 1.0, %v8326_v47  ;;  %v8522_v48 = vpop.f32.mrb[86].mxu1  ;;  %v9293_v10 = vld [vmem:[#allocation57_spill] sm:$0xff] }
 0x4d2   : > { %4258 = vmatprep.mubr.bf16.mxu1 %v3693_v43  ;;  %v3690_v25 = vpack.c.bf16 %v3614_v38, %v3610_v13  ;;  %v3619_v28 = vmul.f32 %v3491_v15, %v8182_v3  ;;  %v3493_v27 = vmul.f32 0.5, %v3365_v32  ;;  %v3362_v40 = vadd.f32 1.0, %v8264_v46  ;;  %v8526_v47 = vpop.f32.mrb[87].mxu1  ;;  %v9290_v46 = vld [vmem:[#allocation62_spill] sm:$0xff] }
 0x4d3   : > { %v3692_v20 = vpack.c.bf16 %v3616_v41, %v3612_v2  ;;  %v3623_v61 = vmul.f32 %v3495_v18, %v8219_v62  ;;  %v3497_v35 = vmul.f32 0.5, %v3369_v26  ;;  %v3366_v4 = vadd.f32 1.0, %v8299_v7  ;;  %v9291_v62 = vld [vmem:[#allocation121_spill] sm:$0xff]  ;;  %v9292_v38 = vld [vmem:[#allocation122_spill] sm:$0xff]  ;;  %v9294_v41 = vld [vmem:[#allocation48_spill] sm:$0xff] }
 0x4d4   : > { %v3621_v1 = vmul.f32 %v3493_v27, %v8192_v24  ;;  %v3490_v51 = vmul.f32 0.5, %v3362_v40  ;;  %v3364_v44 = vadd.f32 1.0, %v8271_v57  ;;  %v3368_v3 = vadd.f32 1.0, %v9289_v49  ;;  %v9297_v49 = vld [vmem:[#allocation54_spill] sm:$0xff] }
 0x4d5   : > { %4098 = vmatmul.mubr.bf16.gmra.mrb[128].mxu0 %v3690_v25  ;;  %v3695_v52 = vpack.c.bf16 %v3623_v61, %v3619_v28  ;;  %v3625_v56 = vmul.f32 %v3497_v35, %v9290_v46  ;;  %v3494_v13 = vmul.f32 0.5, %v3366_v4  ;;  %v3371_v36 = vadd.f32 1.0, %v8376_v14  ;;  %v9295_v35 = vld [vmem:[#allocation125_spill] sm:$0xff] }
 0x4d6   : > { %4259 = vmatmul.mubr.bf16.gmra.mrb[128].mxu1 %v3692_v20  ;;  %v3618_v39 = vmul.f32 %v3490_v51, %v9291_v62  ;;  %v3492_v7 = vmul.f32 0.5, %v3364_v44  ;;  %v3496_v29 = vmul.f32 0.5, %v3368_v3  ;;  %v3375_v43 = vadd.f32 1.0, %v8417_v8  ;;  %v9296_v51 = vld [vmem:[#allocation102_spill] sm:$0xff] }
 0x4d7   : > { %4105 = vmatprep.mubr.bf16.mxu0 %v3695_v52  ;;  %v3697_v24 = vpack.c.bf16 %v3625_v56, %v3621_v1  ;;  %v3622_v57 = vmul.f32 %v3494_v13, %v9292_v38  ;;  %v3499_v15 = vmul.f32 0.5, %v3371_v36  ;;  %v3373_v32 = vadd.f32 1.0, %v8386_v33  ;;  %v9298_v52 = vld [vmem:[#allocation82_spill] sm:$0xff] }
 0x4d8   : > { %v3620_v2 = vmul.f32 %v3492_v7, %v9293_v10  ;;  %v3624_v18 = vmul.f32 %v3496_v29, %v9294_v41  ;;  %v3503_v26 = vmul.f32 0.5, %v3375_v43  ;;  %v3377_v14 = vadd.f32 1.0, %v8428_v17 }
 0x4d9   : > { %4266 = vmatprep.mubr.bf16.mxu1 %v3697_v24  ;;  %v3694_v25 = vpack.c.bf16 %v3622_v57, %v3618_v39  ;;  %v3627_v28 = vmul.f32 %v3499_v15, %v8278_v6  ;;  %v3501_v27 = vmul.f32 0.5, %v3373_v32  ;;  %v3370_v8 = vadd.f32 1.0, %v8360_v21  ;;  %v9299_v21 = vld [vmem:[#allocation123_spill] sm:$0xff]  ;;  %v9300_v39 = vld [vmem:[#allocation126_spill] sm:$0xff]  ;;  %v9301_v24 = vld [vmem:[#allocation124_spill] sm:$0xff] }
 0x4da   : > { %v3696_v40 = vpack.c.bf16 %v3624_v18, %v3620_v2  ;;  %v3631_v20 = vmul.f32 %v3503_v26, %v8315_v12  ;;  %v3505_v61 = vmul.f32 0.5, %v3377_v14  ;;  %v3374_v33 = vadd.f32 1.0, %v8395_v45  ;;  %v9302_v57 = vld [vmem:[#allocation127_spill] sm:$0xff] }
 0x4db   : > { %v3629_v4 = vmul.f32 %v3501_v27, %v9295_v35  ;;  %v3498_v1 = vmul.f32 0.5, %v3370_v8  ;;  %v3372_v44 = vadd.f32 1.0, %v9296_v51  ;;  %v3376_v17 = vadd.f32 1.0, %v9297_v49 }
 0x4dc   : > { %v3699_v3 = vpack.c.bf16 %v3631_v20, %v3627_v28  ;;  %v3633_v46 = vmul.f32 %v3505_v61, %v9298_v52  ;;  %v3502_v6 = vmul.f32 0.5, %v3374_v33  ;;  %v3379_v56 = vadd.f32 1.0, %v8477_v31  ;;  %v9304_v20 = vld [vmem:[#allocation46_spill] sm:$0xff]  ;;  %v9305_v33 = vld [vmem:[#allocation67_spill] sm:$0xff] }
 0x4dd   : > { %4106 = vmatmul.mubr.bf16.gmra.mrb[132].mxu0 %v3694_v25  ;;  %v3626_v13 = vmul.f32 %v3498_v1, %v9299_v21  ;;  %v3500_v12 = vmul.f32 0.5, %v3372_v44  ;;  %v3504_v36 = vmul.f32 0.5, %v3376_v17  ;;  %v3383_v45 = vadd.f32 1.0, %v8495_v23  ;;  %v9307_v17 = vld [vmem:[#allocation55_spill] sm:$0xff] }
 0x4de   : > { %4267 = vmatmul.mubr.bf16.gmra.mrb[132].mxu1 %v3696_v40  ;;  %4113 = vmatprep.mubr.bf16.mxu0 %v3699_v3  ;;  %v3701_v62 = vpack.c.bf16 %v3633_v46, %v3629_v4  ;;  %v3630_v7 = vmul.f32 %v3502_v6, %v9300_v39  ;;  %v3507_v29 = vmul.f32 0.5, %v3379_v56  ;;  %v3381_v43 = vadd.f32 1.0, %v8482_v30  ;;  %v9308_v3 = vld [vmem:[#allocation71_spill] sm:$0xff] }
 0x4df   : > { %v3628_v38 = vmul.f32 %v3500_v12, %v9301_v24  ;;  %v3632_v15 = vmul.f32 %v3504_v36, %v9302_v57  ;;  %v3511_v31 = vmul.f32 0.5, %v3383_v45  ;;  %v3385_v32 = vadd.f32 1.0, %v8501_v50  ;;  %v9309_v56 = vld [vmem:[#allocation75_spill] sm:$0xff]  ;;  %v9311_v12 = vld [vmem:[#allocation60_spill] sm:$0xff] }
 0x4e0   : > { %4274 = vmatprep.mubr.bf16.mxu1 %v3701_v62  ;;  %v3698_v10 = vpack.c.bf16 %v3630_v7, %v3626_v13  ;;  %v3635_v2 = vmul.f32 %v3507_v29, %v8374_v0  ;;  %v3509_v23 = vmul.f32 0.5, %v3381_v43  ;;  %v3378_v41 = vadd.f32 1.0, %v8469_v42  ;;  %v8566_v0 = vld [vmem:[%s8749_s10] ss:$0 sm:$0xff]  ;;  %v4704_v1 = vpop.f32.mrb[88].mxu1 }
 0x4e1   : > { %v3700_v18 = vpack.c.bf16 %v3632_v15, %v3628_v38  ;;  %v3639_v26 = vmul.f32 %v3511_v31, %v8413_v22  ;;  %v3513_v14 = vmul.f32 0.5, %v3385_v32  ;;  %v3382_v30 = vadd.f32 1.0, %v8486_v19  ;;  %v9303_v22 = vld [vmem:[#allocation77_spill] sm:$0xff]  ;;  %v4592_v19 = vpop.f32.mrb[88].mxu0  ;;  %v4705_v46 = vpop.f32.mrb[89].mxu1  ;;  %v9312_v15 = vld [vmem:[#allocation14_spill] sm:$0xff] }
 0x4e2   : > { %v3637_v25 = vmul.f32 %v3509_v23, %v8384_v60  ;;  %v3506_v28 = vmul.f32 0.5, %v3378_v41  ;;  %v3380_v27 = vadd.f32 1.0, %v8473_v63  ;;  %v3384_v50 = vadd.f32 1.0, %v8490_v37  ;;  %v9306_v63 = vld [vmem:[#allocation63_spill] sm:$0xff]  ;;  %v4593_v51 = vpop.f32.mrb[89].mxu0  ;;  %v4707_v45 = vpop.f32.mrb[90].mxu1 }
 0x4e3   : > { %v3703_v8 = vpack.c.bf16 %v3639_v26, %v3635_v2  ;;  %v3641_v42 = vmul.f32 %v3513_v14, %v8424_v55  ;;  %v3510_v40 = vmul.f32 0.5, %v3382_v30  ;;  %v4582_v61 = vadd.f32 %v9304_v20, %v9303_v22  ;;  %v4595_v6 = vpop.f32.mrb[90].mxu0  ;;  %v4708_v43 = vpop.f32.mrb[91].mxu1  ;;  %v9315_v30 = vld [vmem:[#allocation17_spill] sm:$0xff] }
 0x4e4   : > { %v3634_v60 = vmul.f32 %v3506_v28, %v9305_v33  ;;  %v3508_v35 = vmul.f32 0.5, %v3380_v27  ;;  %v3512_v4 = vmul.f32 0.5, %v3384_v50  ;;  %v4694_v37 = vadd.f32 %v8444_v53, %v9306_v63  ;;  %v9310_v53 = vld [vmem:[#allocation50_spill] sm:$0xff]  ;;  %v4596_v62 = vpop.f32.mrb[91].mxu0 }
 0x4e5   : > { %4114 = vmatmul.mubr.bf16.gmra.mrb[136].mxu0 %v3698_v10  ;;  %v3705_v44 = vpack.c.bf16 %v3641_v42, %v3637_v25  ;;  %v3638_v49 = vmul.f32 %v3510_v40, %v8393_v59  ;;  %v4004_v55 = vadd.f32 %v4582_v61, %v8566_v0  ;;  %v4585_v52 = vadd.f32 %v9308_v3, %v9307_v17  ;;  %v9316_v27 = vld [vmem:[#allocation18_spill] sm:$0xff] }
 0x4e6   : > { %4275 = vmatmul.mubr.bf16.gmra.mrb[136].mxu1 %v3700_v18  ;;  %4121 = vmatprep.mubr.bf16.mxu0 %v3703_v8  ;;  %v3636_v21 = vmul.f32 %v3508_v35, %v9309_v56  ;;  %v3640_v13 = vmul.f32 %v3512_v4, %v8402_v5  ;;  %v4697_v36 = vadd.f32 %v9311_v12, %v9310_v53  ;;  %v9314_v18 = vld [vmem:[#allocation16_spill] sm:$0xff] }
 0x4e7   : > { %4282 = vmatprep.mubr.bf16.mxu1 %v3705_v44  ;;  %v3702_v59 = vpack.c.bf16 %v3638_v49, %v3634_v60  ;;  %v4165_v39 = vadd.f32 %v4694_v37, %v4004_v55  ;;  %v4007_v7 = vadd.f32 %v4585_v52, %v8566_v0  ;;  %v4588_v29 = vadd.f32 %v8505_v9, %v8499_v11  ;;  %v9317_v8 = vld [vmem:[#allocation20_spill] sm:$0xff]  ;;  %v9318_v55 = vld [vmem:[#allocation19_spill] sm:$0xff]  ;;  %v9319_v52 = vld [vmem:[#allocation22_spill] sm:$0xff] }
 0x4e8   : > { %v3704_v24 = vpack.c.bf16 %v3640_v13, %v3636_v21  ;;  %v4700_v38 = vadd.f32 %v8516_v58, %v8509_v54  ;;  %v4591_v5 = vadd.f32 %v8518_v16, %v8511_v34  ;;  %v4703_v57 = vadd.f32 %v8526_v47, %v8522_v48  ;;  %v9313_v54 = vld [vmem:[#allocation15_spill] sm:$0xff] }
 0x4e9   : > { %v4291_v31 = vadd.f32 %v4165_v39, %v9312_v15  ;;  %v4168_v32 = vadd.f32 %v4697_v36, %v4007_v7  ;;  %v4012_v10 = vadd.f32 %v4588_v29, %v8566_v0  ;;  %v4594_v2 = vadd.f32 %v4593_v51, %v4592_v19  ;;  %v9321_v15 = vld [vmem:[#allocation24_spill] sm:$0xff] }
 0x4ea   : > { %v4015_v23 = vadd.f32 %v4591_v5, %v8566_v0  ;;  %v4706_v11 = vadd.f32 %v4705_v46, %v4704_v1  ;;  %v4597_v9 = vadd.f32 %v4596_v62, %v4595_v6  ;;  %v4709_v41 = vadd.f32 %v4708_v43, %v4707_v45 }
 0x4eb   : > { %4323 = vst [vmem:[%s8596_s15] sm:$0xff] %v4291_v31  ;;  %v4292_v34 = vadd.f32 %v4168_v32, %v9313_v54  ;;  %v4173_v58 = vadd.f32 %v4700_v38, %v4012_v10  ;;  %v4020_v16 = vadd.f32 %v4594_v2, %v8566_v0  ;;  %v9320_v38 = vld [vmem:[#allocation21_spill] sm:$0xff] }
 0x4ec   : > { %v4176_v48 = vadd.f32 %v4703_v57, %v4015_v23  ;;  %v4023_v47 = vadd.f32 %v4597_v9, %v8566_v0 }
 0x4ed   : > { %4122 = vmatmul.mubr.bf16.gmra.mrb[140].mxu0 %v3702_v59  ;;  %4324 = vst [vmem:[%s8596_s15 + $0x8] sm:$0xff] %v4292_v34  ;;  %v4293_v26 = vadd.f32 %v4173_v58, %v9314_v18  ;;  %v4181_v14 = vadd.f32 %v4706_v11, %v4020_v16 }
 0x4ee   : > { %4283 = vmatmul.mubr.bf16.gmra.mrb[140].mxu1 %v3704_v24  ;;  %v4294_v25 = vadd.f32 %v4176_v48, %v9315_v30  ;;  %v4184_v28 = vadd.f32 %v4709_v41, %v4023_v47 }
 0x4ef   : > { %4325 = vst [vmem:[%s8596_s15 + $0x10] sm:$0xff] %v4293_v26  ;;  %v4295_v50 = vadd.f32 %v4181_v14, %v9316_v27  ;;  %v9322_v14 = vld [vmem:[#allocation23_spill] sm:$0xff] }
 0x4f0   : > { %4326 = vst [vmem:[%s8596_s15 + $0x18] sm:$0xff] %v4294_v25  ;;  %v4296_v42 = vadd.f32 %v4184_v28, %v9317_v8  ;;  %v9323_v28 = vld [vmem:[#allocation26_spill] sm:$0xff] }
 0x4f1   : > { %4327 = vst [vmem:[%s8596_s15 + $0x20] sm:$0xff] %v4295_v50 }
 0x4f2   : > { %4328 = vst [vmem:[%s8596_s15 + $0x28] sm:$0xff] %v4296_v42 }
 0x4f4   : > { %v4598_v40 = vpop.f32.mrb[92].mxu0 }
 0x4f5   : > { %v4710_v22 = vpop.f32.mrb[92].mxu1  ;;  %v4599_v20 = vpop.f32.mrb[93].mxu0 }
 0x4f6   : > { %v4600_v61 = vadd.f32 %v4599_v20, %v4598_v40  ;;  %v4711_v19 = vpop.f32.mrb[93].mxu1  ;;  %v4601_v33 = vpop.f32.mrb[94].mxu0 }
 0x4f7   : > { %v4712_v60 = vadd.f32 %v4711_v19, %v4710_v22  ;;  %v4713_v35 = vpop.f32.mrb[94].mxu1  ;;  %v4602_v4 = vpop.f32.mrb[95].mxu0 }
 0x4f8   : > { %v4028_v63 = vadd.f32 %v4600_v61, %v8566_v0  ;;  %v4603_v37 = vadd.f32 %v4602_v4, %v4601_v33  ;;  %v4714_v1 = vpop.f32.mrb[95].mxu1 }
 0x4f9   : > { %v4715_v51 = vadd.f32 %v4714_v1, %v4713_v35 }
 0x4fa   : > { %v4189_v44 = vadd.f32 %v4712_v60, %v4028_v63  ;;  %v4031_v49 = vadd.f32 %v4603_v37, %v8566_v0 }
 0x4fc   : > { %v4297_v17 = vadd.f32 %v4189_v44, %v9318_v55  ;;  %v4192_v3 = vadd.f32 %v4715_v51, %v4031_v49  ;;  %v9324_v51 = vld [vmem:[#allocation25_spill] sm:$0xff]  ;;  %v9325_v55 = vld [vmem:[#allocation28_spill] sm:$0xff] }
 0x4fe   : > { %4329 = vst [vmem:[%s8596_s15 + $0x30] sm:$0xff] %v4297_v17  ;;  %v4298_v46 = vadd.f32 %v4192_v3, %v9319_v52 }
 0x500   : > { %4330 = vst [vmem:[%s8596_s15 + $0x38] sm:$0xff] %v4298_v46 }
 0x50a   : > { %v4604_v6 = vpop.f32.mrb[96].mxu0 }
 0x50b   : > { %v4716_v56 = vpop.f32.mrb[96].mxu1  ;;  %v4605_v21 = vpop.f32.mrb[97].mxu0 }
 0x50c   : > { %v4606_v13 = vadd.f32 %v4605_v21, %v4604_v6  ;;  %v4717_v53 = vpop.f32.mrb[97].mxu1  ;;  %v4607_v12 = vpop.f32.mrb[98].mxu0 }
 0x50d   : > { %v4718_v36 = vadd.f32 %v4717_v53, %v4716_v56  ;;  %v4719_v45 = vpop.f32.mrb[98].mxu1  ;;  %v4608_v62 = vpop.f32.mrb[99].mxu0 }
 0x50e   : > { %v4036_v59 = vadd.f32 %v4606_v13, %v8566_v0  ;;  %v4609_v39 = vadd.f32 %v4608_v62, %v4607_v12  ;;  %v4720_v7 = vpop.f32.mrb[99].mxu1 }
 0x50f   : > { %v4721_v29 = vadd.f32 %v4720_v7, %v4719_v45 }
 0x510   : > { %v4197_v43 = vadd.f32 %v4718_v36, %v4036_v59  ;;  %v4039_v24 = vadd.f32 %v4609_v39, %v8566_v0 }
 0x512   : > { %v4299_v5 = vadd.f32 %v4197_v43, %v9320_v38  ;;  %v4200_v57 = vadd.f32 %v4721_v29, %v4039_v24  ;;  %v9326_v29 = vld [vmem:[#allocation27_spill] sm:$0xff]  ;;  %v9327_v38 = vld [vmem:[#allocation30_spill] sm:$0xff] }
 0x514   : > { %4331 = vst [vmem:[%s8596_s15 + $0x40] sm:$0xff] %v4299_v5  ;;  %v4300_v31 = vadd.f32 %v4200_v57, %v9321_v15 }
 0x516   : > { %4332 = vst [vmem:[%s8596_s15 + $0x48] sm:$0xff] %v4300_v31 }
 0x51f   : > { %v4610_v32 = vpop.f32.mrb[100].mxu0 }
 0x520   : > { %v4722_v10 = vpop.f32.mrb[100].mxu1  ;;  %v4611_v2 = vpop.f32.mrb[101].mxu0 }
 0x521   : > { %v4612_v23 = vadd.f32 %v4611_v2, %v4610_v32  ;;  %v4723_v11 = vpop.f32.mrb[101].mxu1  ;;  %v4613_v9 = vpop.f32.mrb[102].mxu0 }
 0x522   : > { %v4724_v41 = vadd.f32 %v4723_v11, %v4722_v10  ;;  %v4725_v54 = vpop.f32.mrb[102].mxu1  ;;  %v4614_v34 = vpop.f32.mrb[103].mxu0 }
 0x523   : > { %v4044_v58 = vadd.f32 %v4612_v23, %v8566_v0  ;;  %v4615_v16 = vadd.f32 %v4614_v34, %v4613_v9  ;;  %v4726_v48 = vpop.f32.mrb[103].mxu1 }
 0x524   : > { %v4727_v47 = vadd.f32 %v4726_v48, %v4725_v54 }
 0x525   : > { %v4205_v18 = vadd.f32 %v4724_v41, %v4044_v58  ;;  %v4047_v26 = vadd.f32 %v4615_v16, %v8566_v0 }
 0x527   : > { %v4301_v30 = vadd.f32 %v4205_v18, %v9322_v14  ;;  %v4208_v25 = vadd.f32 %v4727_v47, %v4047_v26  ;;  %v9328_v47 = vld [vmem:[#allocation29_spill] sm:$0xff]  ;;  %v9329_v14 = vld [vmem:[#allocation32_spill] sm:$0xff] }
 0x529   : > { %4333 = vst [vmem:[%s8596_s15 + $0x50] sm:$0xff] %v4301_v30  ;;  %v4302_v27 = vadd.f32 %v4208_v25, %v9323_v28 }
 0x52b   : > { %4334 = vst [vmem:[%s8596_s15 + $0x58] sm:$0xff] %v4302_v27 }
 0x535   : > { %v4616_v50 = vpop.f32.mrb[104].mxu0 }
 0x536   : > { %v4728_v8 = vpop.f32.mrb[104].mxu1  ;;  %v4617_v42 = vpop.f32.mrb[105].mxu0 }
 0x537   : > { %v4618_v40 = vadd.f32 %v4617_v42, %v4616_v50  ;;  %v4729_v22 = vpop.f32.mrb[105].mxu1  ;;  %v4619_v20 = vpop.f32.mrb[106].mxu0 }
 0x538   : > { %v4730_v61 = vadd.f32 %v4729_v22, %v4728_v8  ;;  %v4731_v19 = vpop.f32.mrb[106].mxu1  ;;  %v4620_v33 = vpop.f32.mrb[107].mxu0 }
 0x539   : > { %v4052_v60 = vadd.f32 %v4618_v40, %v8566_v0  ;;  %v4621_v35 = vadd.f32 %v4620_v33, %v4619_v20  ;;  %v4732_v4 = vpop.f32.mrb[107].mxu1 }
 0x53a   : > { %v4733_v63 = vadd.f32 %v4732_v4, %v4731_v19 }
 0x53b   : > { %v4213_v37 = vadd.f32 %v4730_v61, %v4052_v60  ;;  %v4055_v1 = vadd.f32 %v4621_v35, %v8566_v0 }
 0x53d   : > { %v4303_v44 = vadd.f32 %v4213_v37, %v9324_v51  ;;  %v4216_v49 = vadd.f32 %v4733_v63, %v4055_v1  ;;  %v9330_v63 = vld [vmem:[#allocation31_spill] sm:$0xff]  ;;  %v9331_v51 = vld [vmem:[#allocation34_spill] sm:$0xff] }
 0x53f   : > { %4335 = vst [vmem:[%s8596_s15 + $0x60] sm:$0xff] %v4303_v44  ;;  %v4304_v17 = vadd.f32 %v4216_v49, %v9325_v55 }
 0x541   : > { %4336 = vst [vmem:[%s8596_s15 + $0x68] sm:$0xff] %v4304_v17 }
 0x54b   : > { %v4622_v3 = vpop.f32.mrb[108].mxu0 }
 0x54c   : > { %v4734_v52 = vpop.f32.mrb[108].mxu1  ;;  %v4623_v46 = vpop.f32.mrb[109].mxu0 }
 0x54d   : > { %v4624_v6 = vadd.f32 %v4623_v46, %v4622_v3  ;;  %v4735_v56 = vpop.f32.mrb[109].mxu1  ;;  %v4625_v21 = vpop.f32.mrb[110].mxu0 }
 0x54e   : > { %v4736_v13 = vadd.f32 %v4735_v56, %v4734_v52  ;;  %v4737_v53 = vpop.f32.mrb[110].mxu1  ;;  %v4626_v12 = vpop.f32.mrb[111].mxu0 }
 0x54f   : > { %v4060_v36 = vadd.f32 %v4624_v6, %v8566_v0  ;;  %v4627_v45 = vadd.f32 %v4626_v12, %v4625_v21  ;;  %v4738_v62 = vpop.f32.mrb[111].mxu1 }
 0x550   : > { %v4739_v59 = vadd.f32 %v4738_v62, %v4737_v53 }
 0x551   : > { %v4221_v39 = vadd.f32 %v4736_v13, %v4060_v36  ;;  %v4063_v7 = vadd.f32 %v4627_v45, %v8566_v0 }
 0x553   : > { %v4305_v43 = vadd.f32 %v4221_v39, %v9326_v29  ;;  %v4224_v24 = vadd.f32 %v4739_v59, %v4063_v7  ;;  %v9332_v59 = vld [vmem:[#allocation33_spill] sm:$0xff]  ;;  %v9333_v29 = vld [vmem:[#allocation36_spill] sm:$0xff] }
 0x555   : > { %4337 = vst [vmem:[%s8596_s15 + $0x70] sm:$0xff] %v4305_v43  ;;  %v4306_v5 = vadd.f32 %v4224_v24, %v9327_v38 }
 0x557   : > { %4338 = vst [vmem:[%s8596_s15 + $0x78] sm:$0xff] %v4306_v5 }
 0x560   : > { %v4628_v57 = vpop.f32.mrb[112].mxu0 }
 0x561   : > { %v4740_v15 = vpop.f32.mrb[112].mxu1  ;;  %v4629_v31 = vpop.f32.mrb[113].mxu0 }
 0x562   : > { %v4630_v32 = vadd.f32 %v4629_v31, %v4628_v57  ;;  %v4741_v10 = vpop.f32.mrb[113].mxu1  ;;  %v4631_v2 = vpop.f32.mrb[114].mxu0 }
 0x563   : > { %v4742_v23 = vadd.f32 %v4741_v10, %v4740_v15  ;;  %v4743_v11 = vpop.f32.mrb[114].mxu1  ;;  %v4632_v9 = vpop.f32.mrb[115].mxu0 }
 0x564   : > { %v4068_v41 = vadd.f32 %v4630_v32, %v8566_v0  ;;  %v4633_v54 = vadd.f32 %v4632_v9, %v4631_v2  ;;  %v4744_v34 = vpop.f32.mrb[115].mxu1 }
 0x565   : > { %v4745_v58 = vadd.f32 %v4744_v34, %v4743_v11 }
 0x566   : > { %v4229_v16 = vadd.f32 %v4742_v23, %v4068_v41  ;;  %v4071_v48 = vadd.f32 %v4633_v54, %v8566_v0 }
 0x568   : > { %v4307_v18 = vadd.f32 %v4229_v16, %v9328_v47  ;;  %v4232_v26 = vadd.f32 %v4745_v58, %v4071_v48  ;;  %v9334_v58 = vld [vmem:[#allocation35_spill] sm:$0xff] }
 0x56a   : > { %4339 = vst [vmem:[%s8596_s15 + $0x80] sm:$0xff] %v4307_v18  ;;  %v4308_v30 = vadd.f32 %v4232_v26, %v9329_v14  ;;  %v9335_v14 = vld [vmem:[#allocation38_spill] sm:$0xff] }
 0x56c   : > { %4340 = vst [vmem:[%s8596_s15 + $0x88] sm:$0xff] %v4308_v30 }
 0x575   : > { %v4634_v25 = vpop.f32.mrb[116].mxu0 }
 0x576   : > { %v4635_v27 = vpop.f32.mrb[117].mxu0 }
 0x577   : > { %v4746_v28 = vpop.f32.mrb[116].mxu1  ;;  %v4636_v50 = vadd.f32 %v4635_v27, %v4634_v25  ;;  %v4637_v42 = vpop.f32.mrb[118].mxu0 }
 0x578   : > { %v4747_v8 = vpop.f32.mrb[117].mxu1  ;;  %v4638_v20 = vpop.f32.mrb[119].mxu0 }
 0x579   : > { %v4748_v40 = vadd.f32 %v4747_v8, %v4746_v28  ;;  %v4749_v22 = vpop.f32.mrb[118].mxu1  ;;  %v4076_v61 = vadd.f32 %v4636_v50, %v8566_v0  ;;  %v4639_v19 = vadd.f32 %v4638_v20, %v4637_v42 }
 0x57a   : > { %v4750_v33 = vpop.f32.mrb[119].mxu1 }
 0x57b   : > { %v4751_v60 = vadd.f32 %v4750_v33, %v4749_v22  ;;  %v4237_v35 = vadd.f32 %v4748_v40, %v4076_v61  ;;  %v4079_v4 = vadd.f32 %v4639_v19, %v8566_v0 }
 0x57d   : > { %v4309_v37 = vadd.f32 %v4237_v35, %v9330_v63  ;;  %v4240_v1 = vadd.f32 %v4751_v60, %v4079_v4  ;;  %v9336_v60 = vld [vmem:[#allocation37_spill] sm:$0xff] }
 0x57f   : > { %4341 = vst [vmem:[%s8596_s15 + $0x90] sm:$0xff] %v4309_v37  ;;  %v4310_v44 = vadd.f32 %v4240_v1, %v9331_v51  ;;  %v9337_v51 = vld [vmem:[#allocation40_spill] sm:$0xff] }
 0x581   : > { %4342 = vst [vmem:[%s8596_s15 + $0x98] sm:$0xff] %v4310_v44 }
 0x58b   : > { %v4640_v49 = vpop.f32.mrb[120].mxu0 }
 0x58c   : > { %v4752_v55 = vpop.f32.mrb[120].mxu1  ;;  %v4641_v17 = vpop.f32.mrb[121].mxu0 }
 0x58d   : > { %v4642_v3 = vadd.f32 %v4641_v17, %v4640_v49  ;;  %v4753_v52 = vpop.f32.mrb[121].mxu1  ;;  %v4643_v46 = vpop.f32.mrb[122].mxu0 }
 0x58e   : > { %v4754_v6 = vadd.f32 %v4753_v52, %v4752_v55  ;;  %v4755_v56 = vpop.f32.mrb[122].mxu1  ;;  %v4644_v21 = vpop.f32.mrb[123].mxu0 }
 0x58f   : > { %v4084_v13 = vadd.f32 %v4642_v3, %v8566_v0  ;;  %v4645_v53 = vadd.f32 %v4644_v21, %v4643_v46  ;;  %v4756_v12 = vpop.f32.mrb[123].mxu1 }
 0x590   : > { %v4757_v36 = vadd.f32 %v4756_v12, %v4755_v56 }
 0x591   : > { %v4245_v45 = vadd.f32 %v4754_v6, %v4084_v13  ;;  %v4087_v62 = vadd.f32 %v4645_v53, %v8566_v0 }
 0x593   : > { %v4311_v39 = vadd.f32 %v4245_v45, %v9332_v59  ;;  %v4248_v7 = vadd.f32 %v4757_v36, %v4087_v62  ;;  %v9338_v36 = vld [vmem:[#allocation39_spill] sm:$0xff] }
 0x595   : > { %4343 = vst [vmem:[%s8596_s15 + $0xa0] sm:$0xff] %v4311_v39  ;;  %v4312_v43 = vadd.f32 %v4248_v7, %v9333_v29  ;;  %v9339_v29 = vld [vmem:[#allocation42_spill] sm:$0xff] }
 0x597   : > { %4344 = vst [vmem:[%s8596_s15 + $0xa8] sm:$0xff] %v4312_v43 }
 0x5a0   : > { %v4646_v24 = vpop.f32.mrb[124].mxu0 }
 0x5a1   : > { %v4758_v38 = vpop.f32.mrb[124].mxu1  ;;  %v4647_v5 = vpop.f32.mrb[125].mxu0 }
 0x5a2   : > { %v4648_v57 = vadd.f32 %v4647_v5, %v4646_v24  ;;  %v4759_v15 = vpop.f32.mrb[125].mxu1  ;;  %v4649_v31 = vpop.f32.mrb[126].mxu0 }
 0x5a3   : > { %v4760_v32 = vadd.f32 %v4759_v15, %v4758_v38  ;;  %v4761_v10 = vpop.f32.mrb[126].mxu1  ;;  %v4650_v2 = vpop.f32.mrb[127].mxu0 }
 0x5a4   : > { %v4092_v23 = vadd.f32 %v4648_v57, %v8566_v0  ;;  %v4651_v11 = vadd.f32 %v4650_v2, %v4649_v31  ;;  %v4762_v9 = vpop.f32.mrb[127].mxu1 }
 0x5a5   : > { %v4763_v41 = vadd.f32 %v4762_v9, %v4761_v10 }
 0x5a6   : > { %v4253_v54 = vadd.f32 %v4760_v32, %v4092_v23  ;;  %v4095_v34 = vadd.f32 %v4651_v11, %v8566_v0 }
 0x5a8   : > { %v4313_v16 = vadd.f32 %v4253_v54, %v9334_v58  ;;  %v4256_v48 = vadd.f32 %v4763_v41, %v4095_v34  ;;  %v4652_v47 = vpop.f32.mrb[128].mxu0  ;;  %v9340_v41 = vld [vmem:[#allocation41_spill] sm:$0xff] }
 0x5a9   : > { %v4764_v18 = vpop.f32.mrb[128].mxu1  ;;  %v4653_v26 = vpop.f32.mrb[129].mxu0 }
 0x5aa   : > { %4345 = vst [vmem:[%s8596_s15 + $0xb0] sm:$0xff] %v4313_v16  ;;  %v4314_v30 = vadd.f32 %v4256_v48, %v9335_v14  ;;  %v4654_v25 = vadd.f32 %v4653_v26, %v4652_v47  ;;  %v4765_v28 = vpop.f32.mrb[129].mxu1  ;;  %v4655_v27 = vpop.f32.mrb[130].mxu0  ;;  %v9341_v47 = vld [vmem:[#allocation44_spill] sm:$0xff] }
 0x5ab   : > { %v4766_v50 = vadd.f32 %v4765_v28, %v4764_v18  ;;  %v4767_v8 = vpop.f32.mrb[130].mxu1  ;;  %v4656_v42 = vpop.f32.mrb[131].mxu0 }
 0x5ac   : > { %4346 = vst [vmem:[%s8596_s15 + $0xb8] sm:$0xff] %v4314_v30  ;;  %v4100_v40 = vadd.f32 %v4654_v25, %v8566_v0  ;;  %v4657_v22 = vadd.f32 %v4656_v42, %v4655_v27  ;;  %v4768_v20 = vpop.f32.mrb[131].mxu1 }
 0x5ad   : > { %v4769_v61 = vadd.f32 %v4768_v20, %v4767_v8 }
 0x5ae   : > { %v4261_v19 = vadd.f32 %v4766_v50, %v4100_v40  ;;  %v4103_v33 = vadd.f32 %v4657_v22, %v8566_v0 }
 0x5b0   : > { %v4315_v35 = vadd.f32 %v4261_v19, %v9336_v60  ;;  %v4264_v4 = vadd.f32 %v4769_v61, %v4103_v33  ;;  %v4658_v63 = vpop.f32.mrb[132].mxu0  ;;  %v9342_v61 = vld [vmem:[#allocation43_spill] sm:$0xff]  ;;  %v9344_v60 = vld [vmem:[#allocation45_spill] sm:$0xff] }
 0x5b1   : > { %v4770_v37 = vpop.f32.mrb[132].mxu1  ;;  %v4659_v1 = vpop.f32.mrb[133].mxu0 }
 0x5b2   : > { %4347 = vst [vmem:[%s8596_s15 + $0xc0] sm:$0xff] %v4315_v35  ;;  %v4316_v44 = vadd.f32 %v4264_v4, %v9337_v51  ;;  %v4660_v49 = vadd.f32 %v4659_v1, %v4658_v63  ;;  %v4771_v55 = vpop.f32.mrb[133].mxu1  ;;  %v4661_v17 = vpop.f32.mrb[134].mxu0 }
 0x5b3   : > { %v4772_v3 = vadd.f32 %v4771_v55, %v4770_v37  ;;  %v4773_v52 = vpop.f32.mrb[134].mxu1  ;;  %v4662_v46 = vpop.f32.mrb[135].mxu0 }
 0x5b4   : > { %4348 = vst [vmem:[%s8596_s15 + $0xc8] sm:$0xff] %v4316_v44  ;;  %v4108_v6 = vadd.f32 %v4660_v49, %v8566_v0  ;;  %v4663_v56 = vadd.f32 %v4662_v46, %v4661_v17  ;;  %v4774_v21 = vpop.f32.mrb[135].mxu1 }
 0x5b5   : > { %v4775_v13 = vadd.f32 %v4774_v21, %v4773_v52 }
 0x5b6   : > { %v4269_v53 = vadd.f32 %v4772_v3, %v4108_v6  ;;  %v4111_v12 = vadd.f32 %v4663_v56, %v8566_v0 }
 0x5b8   : > { %v4317_v45 = vadd.f32 %v4269_v53, %v9338_v36  ;;  %v4272_v62 = vadd.f32 %v4775_v13, %v4111_v12  ;;  %v4664_v59 = vpop.f32.mrb[136].mxu0 }
 0x5b9   : > { %v4776_v39 = vpop.f32.mrb[136].mxu1  ;;  %v4665_v7 = vpop.f32.mrb[137].mxu0 }
 0x5ba   : > { %4349 = vst [vmem:[%s8596_s15 + $0xd0] sm:$0xff] %v4317_v45  ;;  %v4318_v43 = vadd.f32 %v4272_v62, %v9339_v29  ;;  %v4666_v24 = vadd.f32 %v4665_v7, %v4664_v59  ;;  %v4777_v38 = vpop.f32.mrb[137].mxu1  ;;  %v4667_v5 = vpop.f32.mrb[138].mxu0 }
 0x5bb   : > { %v4778_v57 = vadd.f32 %v4777_v38, %v4776_v39  ;;  %v4779_v15 = vpop.f32.mrb[138].mxu1  ;;  %v4668_v31 = vpop.f32.mrb[139].mxu0 }
 0x5bc   : > { %4350 = vst [vmem:[%s8596_s15 + $0xd8] sm:$0xff] %v4318_v43  ;;  %v4116_v32 = vadd.f32 %v4666_v24, %v8566_v0  ;;  %v4669_v10 = vadd.f32 %v4668_v31, %v4667_v5  ;;  %v4780_v2 = vpop.f32.mrb[139].mxu1 }
 0x5bd   : > { %v4781_v23 = vadd.f32 %v4780_v2, %v4779_v15 }
 0x5be   : > { %v4277_v11 = vadd.f32 %v4778_v57, %v4116_v32  ;;  %v4119_v9 = vadd.f32 %v4669_v10, %v8566_v0 }
 0x5c0   : > { %v4319_v54 = vadd.f32 %v4277_v11, %v9340_v41  ;;  %v4280_v34 = vadd.f32 %v4781_v23, %v4119_v9  ;;  %v4670_v58 = vpop.f32.mrb[140].mxu0 }
 0x5c1   : > { %v4782_v16 = vpop.f32.mrb[140].mxu1  ;;  %v4671_v48 = vpop.f32.mrb[141].mxu0 }
 0x5c2   : > { %4351 = vst [vmem:[%s8596_s15 + $0xe0] sm:$0xff] %v4319_v54  ;;  %v4320_v18 = vadd.f32 %v4280_v34, %v9341_v47  ;;  %v4672_v26 = vadd.f32 %v4671_v48, %v4670_v58  ;;  %v4783_v14 = vpop.f32.mrb[141].mxu1  ;;  %v4673_v30 = vpop.f32.mrb[142].mxu0 }
 0x5c3   : > { %v4784_v25 = vadd.f32 %v4783_v14, %v4782_v16  ;;  %v4785_v28 = vpop.f32.mrb[142].mxu1  ;;  %v4674_v27 = vpop.f32.mrb[143].mxu0 }
 0x5c4   : > { %4352 = vst [vmem:[%s8596_s15 + $0xe8] sm:$0xff] %v4320_v18  ;;  %v4124_v50 = vadd.f32 %v4672_v26, %v8566_v0  ;;  %v4675_v8 = vadd.f32 %v4674_v27, %v4673_v30  ;;  %v4786_v42 = vpop.f32.mrb[143].mxu1 }
 0x5c5   : > { %v4787_v40 = vadd.f32 %v4786_v42, %v4785_v28 }
 0x5c6   : > { %v4285_v22 = vadd.f32 %v4784_v25, %v4124_v50  ;;  %v4127_v20 = vadd.f32 %v4675_v8, %v8566_v0 }
 0x5c8   : > { %v4321_v19 = vadd.f32 %v4285_v22, %v9342_v61  ;;  %v4288_v33 = vadd.f32 %v4787_v40, %v4127_v20 }
 0x5ca   : > { %4353 = vst [vmem:[%s8596_s15 + $0xf0] sm:$0xff] %v4321_v19  ;;  %v4322_v35 = vadd.f32 %v4288_v33, %v9344_v60 }
 0x5cc   : > { %4354 = vst [vmem:[%s8596_s15 + $0xf8] sm:$0xff] %v4322_v35 }
 0x5cd   : > { %5462 = shalt.err (!%p5459_p7)
}
 0x5ce   : > { %s5463_s27 = scalar_lea.hbm %s8691_s25, 4096  ;;  %s5467_s26 = scalar_lea.hbm %s9343_s23, 16384 }
 0x5cf   : > { %p5464_p9 = scmp.ne.s32.totalorder %s8691_s25, %s5463_s27  ;;  %p5468_p5 = scmp.lt.u32.totalorder %s8691_s25, %s9343_s23 }
 0x5d0   : > { %p5469_p10 = scmp.lt.u32.totalorder %s5467_s26, %s5463_s27  ;;  %p5471_p1 = scmp.lt.u32.totalorder %s5463_s27, %s8691_s25 }
 0x5d1   : > { %p5465_p12 = pnand %p5464_p9, %p5709_p6 }
 0x5d2   : > { %p5470_p11 = por %p5469_p10, %p5468_p5 }
 0x5d3   : > { %p5466_p0 = pneg %p5465_p12 }
 0x5d4   : > { %p5472_p2 = por %p5471_p1, %p5470_p11 }
 0x5d6   : > { %p5473_p4 = pnand %p5472_p2, %p5466_p0 }
 0x5d8   : > { %5476 = shalt.err (!%p5473_p4)
}
 0x5d9   : > { %s5532_s21 = smov 128   ;;  %s5533_s12 = smov 8  }
 0x5da   : > { %4798 = dma.vmem_to_hbm [thread:$0]  (%p5709_p6), %s8693_s29, 4096, %s8691_s25, %s4356_s11, %s5532_s21, %s5532_s21, %s5533_s12  }
 0x5db PF: > { %s9345_s14 = sld [smem:[#allocation12_spill]]  ;;  %s9346_s15 = sld [smem:[#allocation13_spill]] }
 0x5dc   : > { %p4820_p8 = scmp.ge.s32.totalorder %s5519_s20, 2 }
 0x5e1   : > { %s4385_s28 = sand.u32 1, %s9345_s14   ;;  %p9347_p13 = scmp.ne.s32.totalorder %s9346_s15, 0 }
 0x5e2   : > { %s4386_s27 = scalar_lea.sflag [#allocation4], %s4385_s28 }
 0x5e3   : > { %p4812_p3 = pnand %p4820_p8, %p9347_p13 }
 0x5e5   : > { %5502 = dma.done.wait (!%p4812_p3), %s4386_s27, 4096  }
 0x5e6   : > { %5504 = vsyncadd (!%p4812_p3), %s4386_s27, 4294963200  ;;  %p25_p7 = scmp.ge.s32.totalorder %s5696_s13, 6   ;;  %s9348_s17 = smov %s5511_s18 }
 0x5e7   : > { %s9349_s18 = smov %s5515_s19  ;;  %s9350_s19 = smov %s5705_s16 }
 0x5e8   : > { %s9351_s20 = smov %s5696_s13  ;;  %27 = sbr.rel (!%p25_p7) target bundleno = 8 (0x8), region = 117 }
 0x5ef   :  { %4391 = vsyncpa [#allocation3], 1 }
 0x5f0   :  { %4393 = vsyncpa [#allocation3 + $0x1], 1 }
 0x5f1   :  { %4394 = vsyncpa [#allocation6], 1 }
 0x5f2   :  { %4395 = vsyncpa [#allocation4], 1 }
 0x5f3   :  { %4397 = vsyncpa [#allocation4 + $0x1], 1 }

</bundles_post_ra>
